<compile_context>
chip_gen: v7x
topology: tpu7x:2x2x1
jax: 0.10.0
libtpu: 0.0.40
codegen_flags: <defaults>
</compile_context>

<pallas_src>
import functools

import jax
import jax.numpy as jnp
import numpy as np
from jax import lax
from jax.experimental import pallas as pl
from jax.experimental.pallas import tpu as pltpu


# ---------------------------------------------------------------------------
# helpers
# ---------------------------------------------------------------------------

def _vmem_limit_bytes():
    """Per-pallas_call VMEM budget; generation-aware (v7x has 64 MiB, v5e/v6e 128 MiB)."""
    try:
        cap = int(pltpu.get_tpu_info().vmem_capacity_bytes)
    except Exception:
        cap = 64 * 1024 * 1024          # conservative fallback (v7x per-core VMEM)
    return int(min(cap * 3 // 4, 96 * 1024 * 1024))


_VMEM_LIMIT = _vmem_limit_bytes()


def _pick_dim_tile(dim, candidates=(512, 256, 128)):
    for c in candidates:
        if dim % c == 0:
            return c
    return dim


def _linear_tiles(M, N, K, itemsize, has_residual):
    """Largest (tm, tn) whose double-buffered block working set fits the VMEM budget."""
    budget = int(_VMEM_LIMIT * 0.8)

    def fits(tm, tn):
        per_step = tm * K + K * tn + tm * tn * (2 if has_residual else 1) + tn + 2 * K
        return 2 * per_step * itemsize <= budget        # x2 for double buffering

    tm_opts = [c for c in (512, 256, 128) if M % c == 0] + [M]
    tn_opts = [c for c in (512, 256, 128) if N % c == 0] + [N]
    for tm in tm_opts:
        for tn in tn_opts:
            if fits(tm, tn):
                return tm, tn
    # TODO(synk): add an "arbitrary" K-reduction grid axis + f32 VMEM accumulator for shapes
    # whose whole-K blocks cannot fit VMEM (hard precondition of this fused-LN kernel).
    raise ValueError(
        f"pallas_linear: whole-K blocks for M={M}, N={N}, K={K} do not fit the VMEM "
        f"budget ({budget} bytes); a K-split reduction path is required.")


def _mxu_dot(a, b, dims=None):
    """MXU matmul with f32 accumulation.

    float32 operands run at HIGHEST precision so the kernel matches the f32 reference;
    bf16 operands stay in their native dtype (native single-pass MXU on v6e/v7x), i.e.
    nothing is upcast before the matmul.
    """
    prec = lax.Precision.HIGHEST if a.dtype == jnp.float32 else None
    if dims is None:
        return jnp.dot(a, b, preferred_element_type=jnp.float32, precision=prec)
    return lax.dot_general(a, b, dims, preferred_element_type=jnp.float32, precision=prec)


def _gelu(x):
    # TODO(synk): torch nn.GELU defaults to the exact erf form; the tanh approximation is used
    # here (guaranteed Mosaic lowering) and the validation reference uses the same formula.
    return jax.nn.gelu(x, approximate=True)


# ---------------------------------------------------------------------------
# Kernel A: fused [LayerNorm] + Linear [+ bias] [+ GELU] [+ residual]
# ---------------------------------------------------------------------------

def _linear_kernel(*refs, has_ln, has_bias, has_residual, activation, eps):
    it = iter(refs)
    x_ref = next(it)
    g_ref = next(it) if has_ln else None
    bt_ref = next(it) if has_ln else None
    w_ref = next(it)
    b_ref = next(it) if has_bias else None
    r_ref = next(it) if has_residual else None
    o_ref = next(it)

    lhs = x_ref[...]                                        # (tm, K)
    if has_ln:
        xf = lhs.astype(jnp.float32)
        inv_k = 1.0 / xf.shape[-1]
        s1 = jnp.sum(xf, axis=-1, keepdims=True)            # one-pass stats: sum
        s2 = jnp.sum(xf * xf, axis=-1, keepdims=True)       #               + sum of squares
        mean = s1 * inv_k
        var = s2 * inv_k - mean * mean
        xn = (xf - mean) * lax.rsqrt(var + eps) * g_ref[...] + bt_ref[...]
        lhs = xn.astype(x_ref.dtype)                         # keep MXU operand in input dtype

    acc = _mxu_dot(lhs, w_ref[...])                          # (tm, tn) f32
    if has_bias:
        acc = acc + b_ref[...]
    if activation == "gelu":
        acc = _gelu(acc)
    if has_residual:
        acc = acc + r_ref[...].astype(jnp.float32)
    o_ref[...] = acc.astype(o_ref.dtype)


def pallas_linear(x, w, *, bias=None, gamma=None, beta=None, residual=None,
                  activation=None, eps=1e-5):
    """out = act(LayerNorm(x) @ w + bias) + residual, all in one pallas_call."""
    M, K = x.shape
    K2, N = w.shape
    assert K == K2, (K, K2)
    has_ln = gamma is not None
    has_bias = bias is not None
    has_residual = residual is not None
    itemsize = x.dtype.itemsize
    tm, tn = _linear_tiles(M, N, K, itemsize, has_residual)
    gm, gn = M // tm, N // tn

    # Grid order: fetch the larger of {x, W} from HBM exactly once, re-stream the smaller.
    weights_outer = (K * N) >= (M * K)
    if weights_outer:
        grid = (gn, gm)
        x_map = lambda n_i, m_i: (m_i, 0)
        w_map = lambda n_i, m_i: (0, n_i)
        vec_map = lambda n_i, m_i: (0, n_i)
        mat_map = lambda n_i, m_i: (m_i, n_i)
    else:
        grid = (gm, gn)
        x_map = lambda m_i, n_i: (m_i, 0)
        w_map = lambda m_i, n_i: (0, n_i)
        vec_map = lambda m_i, n_i: (0, n_i)
        mat_map = lambda m_i, n_i: (m_i, n_i)

    operands = [x]
    in_specs = [pl.BlockSpec((tm, K), x_map)]
    if has_ln:
        ln_map = lambda a, b: (0, 0)
        operands += [gamma.reshape(1, K).astype(jnp.float32),
                     beta.reshape(1, K).astype(jnp.float32)]
        in_specs += [pl.BlockSpec((1, K), ln_map), pl.BlockSpec((1, K), ln_map)]
    operands.append(w)
    in_specs.append(pl.BlockSpec((K, tn), w_map))
    if has_bias:
        operands.append(bias.reshape(1, N).astype(jnp.float32))
        in_specs.append(pl.BlockSpec((1, tn), vec_map))
    if has_residual:
        operands.append(residual)
        in_specs.append(pl.BlockSpec((tm, tn), mat_map))

    bytes_accessed = (M * K + K * N + (2 if has_residual else 1) * M * N
                      + (N if has_bias else 0) + (2 * K if has_ln else 0)) * itemsize
    return pl.pallas_call(
        functools.partial(_linear_kernel, has_ln=has_ln, has_bias=has_bias,
                          has_residual=has_residual, activation=activation, eps=eps),
        out_shape=jax.ShapeDtypeStruct((M, N), x.dtype),
        grid_spec=pltpu.PrefetchScalarGridSpec(
            num_scalar_prefetch=0,
            grid=grid,
            in_specs=in_specs,
            out_specs=pl.BlockSpec((tm, tn), mat_map),
        ),
        compiler_params=pltpu.CompilerParams(
            dimension_semantics=("parallel", "parallel"),
            vmem_limit_bytes=_VMEM_LIMIT),
        cost_estimate=pl.CostEstimate(
            flops=int(2 * M * K * N),
            transcendentals=int(M * N if activation == "gelu" else 0),
            bytes_accessed=int(bytes_accessed)),
    )(*operands)


# ---------------------------------------------------------------------------
# Kernel B: fused multi-head attention + output projection + bias + residual
# ---------------------------------------------------------------------------

def _mha_out_kernel(q_ref, k_ref, v_ref, wo_ref, bo_ref, r_ref, o_ref, *,
                    scale, heads):
    # q_ref: (tq, H, dh)   k_ref, v_ref: (Nk, H, dh)
    # wo_ref: (H, dh, D)   bo_ref: (1, D)   r_ref, o_ref: (tq, D)
    acc = bo_ref[...] + r_ref[...].astype(jnp.float32)        # (tq, D) f32 accumulator
    for h in range(heads):                                     # static unroll: all heads per step
        q = q_ref[:, h, :] * scale                             # fold scale into the small q tile
        k = k_ref[:, h, :]
        v = v_ref[:, h, :]
        s = _mxu_dot(q, k, (((1,), (1,)), ((), ())))           # (tq, Nk) f32 scores
        m = jnp.max(s, axis=-1, keepdims=True)
        p = jnp.exp(s - m)
        denom = jnp.sum(p, axis=-1, keepdims=True)
        pv = _mxu_dot(p.astype(v.dtype), v)                    # (tq, dh) f32, un-normalized
        pv = pv * pl.reciprocal(denom, approx=False)           # normalize the (tq, dh) tile only
        # concat_h(pv_h) @ W_out  ==  sum_h pv_h @ W_out[h]  -> out-projection fused per head
        acc = acc + _mxu_dot(pv.astype(wo_ref.dtype), wo_ref[h])
    o_ref[...] = acc.astype(o_ref.dtype)


def pallas_mha_out(q_packed, q_idx, kv_packed, k_idx, v_idx, w_out, b_out,
                   residual, *, heads, dim_head, scale):
    """softmax(Q K^T * scale) V for all heads, fused with out-projection + bias + residual.

    q_packed : (B, Nq, Pq, H, dh) with Q at packing index q_idx
    kv_packed: (B, Nk, Pk, H, dh) with K, V at packing indices k_idx, v_idx
    w_out    : (H*dh, D), b_out: (D,), residual: (B, Nq, D)  ->  out: (B, Nq, D)

    Head split/merge is done by the BlockSpec index maps on the packed projection outputs
    (free reshapes only, no XLA transposes); the only store per step is the lane-dense
    (tq, D) residual-layout block.
    TODO(synk): full K/V per batch grid step; an online-softmax (flash) streaming variant
    over Nk would be used for long contexts.
    """
    B, Nq, _, H, dh = q_packed.shape
    Bk, Nk = kv_packed.shape[0], kv_packed.shape[1]
    assert Bk == B and H == heads and dh == dim_head
    D = residual.shape[-1]
    dtype = residual.dtype
    tq = _pick_dim_tile(Nq)

    wo3 = w_out.reshape(heads, dim_head, D)                    # free reshape
    bo2 = b_out.reshape(1, D).astype(jnp.float32)

    q_spec = pl.BlockSpec((None, tq, None, H, dh), lambda b, i: (b, i, q_idx, 0, 0))
    k_spec = pl.BlockSpec((None, Nk, None, H, dh), lambda b, i: (b, 0, k_idx, 0, 0))
    v_spec = pl.BlockSpec((None, Nk, None, H, dh), lambda b, i: (b, 0, v_idx, 0, 0))
    wo_spec = pl.BlockSpec((H, dh, D), lambda b, i: (0, 0, 0))
    bo_spec = pl.BlockSpec((1, D), lambda b, i: (0, 0))
    res_spec = pl.BlockSpec((None, tq, D), lambda b, i: (b, i, 0))
    out_spec = pl.BlockSpec((None, tq, D), lambda b, i: (b, i, 0))

    itemsize = dtype.itemsize
    bytes_accessed = (B * Nq * H * dh + 2 * B * Nk * H * dh + H * dh * D
                      + 2 * B * Nq * D) * itemsize
    return pl.pallas_call(
        functools.partial(_mha_out_kernel, scale=scale, heads=heads),
        out_shape=jax.ShapeDtypeStruct((B, Nq, D), dtype),
        grid_spec=pltpu.PrefetchScalarGridSpec(
            num_scalar_prefetch=0,
            grid=(B, Nq // tq),
            in_specs=[q_spec, k_spec, v_spec, wo_spec, bo_spec, res_spec],
            out_specs=out_spec,
        ),
        compiler_params=pltpu.CompilerParams(
            dimension_semantics=("parallel", "parallel"),
            vmem_limit_bytes=_VMEM_LIMIT),
        cost_estimate=pl.CostEstimate(
            flops=int(4 * B * H * Nq * Nk * dh + 2 * B * Nq * H * dh * D),
            transcendentals=int(B * H * Nq * Nk),
            bytes_accessed=int(bytes_accessed)),
    )(q_packed, kv_packed, kv_packed, wo3, bo2, residual)


# ---------------------------------------------------------------------------
# TransformerCrossAttn forward (composition of the two fused kernels)
# ---------------------------------------------------------------------------

def transformer_cross_attn_forward(x, params, *, heads, dim_head,
                                    context=None, context_list=None):
    B, N, D = x.shape
    scale = dim_head ** -0.5
    depth = len(params)
    if context_list is None:
        context_list = [context] * depth
    if len(context_list) != depth:
        raise ValueError(f"len(context_list) != depth ({len(context_list)} != {depth})")

    # TODO(synk): torch uses Identity for to_out when heads == 1 and dim_head == dim; that
    # configuration is not exercised here (projection + bias path only).
    for layer, ctx in zip(params, context_list):
        x_flat = x.reshape(B * N, D)

        # ---- self-attention: x = to_out(SA(LN(x))) + x -----------------------
        qkv = pallas_linear(x_flat, layer["sa_qkv_w"],
                            gamma=layer["ln1_g"], beta=layer["ln1_b"])
        qkv = qkv.reshape(B, N, 3, heads, dim_head)        # free reshape (chunk(3) + head split)
        x = pallas_mha_out(qkv, 0, qkv, 1, 2,
                           layer["sa_out_w"], layer["sa_out_b"], x,
                           heads=heads, dim_head=dim_head, scale=scale)

        # ---- cross-attention: x = to_out(CA(LN(x), ctx)) + x ------------------
        x_flat = x.reshape(B * N, D)
        q = pallas_linear(x_flat, layer["ca_q_w"],
                          gamma=layer["ln2_g"], beta=layer["ln2_b"])
        q = q.reshape(B, N, 1, heads, dim_head)
        if ctx is None:
            # torch: context = default(context, x) with x already LayerNorm'ed, so fuse the
            # same LN into the kv projection instead of materializing LN(x).
            kv = pallas_linear(x_flat, layer["ca_kv_w"],
                               gamma=layer["ln2_g"], beta=layer["ln2_b"])
            Bc, Nc = B, N
        else:
            Bc, Nc, Dc = ctx.shape
            kv = pallas_linear(ctx.reshape(Bc * Nc, Dc), layer["ca_kv_w"])
        kv = kv.reshape(Bc, Nc, 2, heads, dim_head)
        x = pallas_mha_out(q, 0, kv, 0, 1,
                           layer["ca_out_w"], layer["ca_out_b"], x,
                           heads=heads, dim_head=dim_head, scale=scale)

        # ---- feed-forward: x = W2 GELU(W1 LN(x) + b1) + b2 + x ----------------
        x_flat = x.reshape(B * N, D)
        h = pallas_linear(x_flat, layer["ff_w1"], bias=layer["ff_b1"],
                          gamma=layer["ln3_g"], beta=layer["ln3_b"],
                          activation="gelu")
        x = pallas_linear(h, layer["ff_w2"], bias=layer["ff_b2"],
                          residual=x_flat).reshape(B, N, D)
    return x


# ---------------------------------------------------------------------------
# Pure-JAX reference (mirrors the torch module; matmuls at HIGHEST precision)
# ---------------------------------------------------------------------------

def _ref_layernorm(x, g, b, eps=1e-5):
    xf = x.astype(jnp.float32)
    m = jnp.mean(xf, axis=-1, keepdims=True)
    v = jnp.mean((xf - m) ** 2, axis=-1, keepdims=True)
    return ((xf - m) * lax.rsqrt(v + eps) * g + b).astype(x.dtype)


def _ref_attention(q, k, v, scale):
    s = jnp.einsum("bhqd,bhkd->bhqk", q, k, precision=lax.Precision.HIGHEST) * scale
    p = jax.nn.softmax(s, axis=-1)
    return jnp.einsum("bhqk,bhkd->bhqd", p, v, precision=lax.Precision.HIGHEST)


def _ref_forward(x, params, *, heads, dim_head, context=None, context_list=None):
    B, N, D = x.shape
    inner = heads * dim_head
    scale = dim_head ** -0.5
    mm = functools.partial(jnp.matmul, precision=lax.Precision.HIGHEST)
    if context_list is None:
        context_list = [context] * len(params)
    for layer, ctx in zip(params, context_list):
        h = _ref_layernorm(x, layer["ln1_g"], layer["ln1_b"])
        qkv = mm(h, layer["sa_qkv_w"]).reshape(B, N, 3, heads, dim_head)
        q, k, v = (jnp.transpose(qkv[:, :, i], (0, 2, 1, 3)) for i in range(3))
        att = _ref_attention(q, k, v, scale)
        att = jnp.transpose(att, (0, 2, 1, 3)).reshape(B, N, inner)
        x = mm(att, layer["sa_out_w"]) + layer["sa_out_b"] + x

        h = _ref_layernorm(x, layer["ln2_g"], layer["ln2_b"])
        ctx_i = h if ctx is None else ctx
        q = jnp.transpose(mm(h, layer["ca_q_w"]).reshape(B, N, heads, dim_head),
                          (0, 2, 1, 3))
        kv = mm(ctx_i, layer["ca_kv_w"]).reshape(ctx_i.shape[0], ctx_i.shape[1],
                                                 2, heads, dim_head)
        k, v = (jnp.transpose(kv[:, :, i], (0, 2, 1, 3)) for i in range(2))
        att = _ref_attention(q, k, v, scale)
        att = jnp.transpose(att, (0, 2, 1, 3)).reshape(B, N, inner)
        x = mm(att, layer["ca_out_w"]) + layer["ca_out_b"] + x

        h = _ref_layernorm(x, layer["ln3_g"], layer["ln3_b"])
        h = _gelu(mm(h, layer["ff_w1"]) + layer["ff_b1"])
        x = mm(h, layer["ff_w2"]) + layer["ff_b2"] + x
    return x


# ---------------------------------------------------------------------------
# Parameter construction + smoke test
# ---------------------------------------------------------------------------

def init_params(key, depth, dim, heads, dim_head, mlp_dim, context_dim=None):
    context_dim = dim if context_dim is None else context_dim
    inner = heads * dim_head
    params = []
    for _ in range(depth):
        keys = jax.random.split(key, 16)
        key = keys[0]

        def w(k, shape, s=0.05):
            return jax.random.normal(k, shape, jnp.float32) * s

        params.append({
            "ln1_g": 1.0 + 0.1 * jax.random.normal(keys[1], (dim,), jnp.float32),
            "ln1_b": 0.05 * jax.random.normal(keys[2], (dim,), jnp.float32),
            "ln2_g": 1.0 + 0.1 * jax.random.normal(keys[3], (dim,), jnp.float32),
            "ln2_b": 0.05 * jax.random.normal(keys[4], (dim,), jnp.float32),
            "ln3_g": 1.0 + 0.1 * jax.random.normal(keys[5], (dim,), jnp.float32),
            "ln3_b": 0.05 * jax.random.normal(keys[6], (dim,), jnp.float32),
            "sa_qkv_w": w(keys[7], (dim, 3 * inner)),
            "sa_out_w": w(keys[8], (inner, dim)),
            "sa_out_b": 0.02 * jax.random.normal(keys[9], (dim,), jnp.float32),
            "ca_q_w": w(keys[10], (dim, inner)),
            "ca_kv_w": w(keys[11], (context_dim, 2 * inner)),
            "ca_out_w": w(keys[12], (inner, dim)),
            "ca_out_b": 0.02 * jax.random.normal(keys[13], (dim,), jnp.float32),
            "ff_w1": w(keys[14], (dim, mlp_dim)),
            "ff_b1": jnp.zeros((mlp_dim,), jnp.float32),
            "ff_w2": w(keys[15], (mlp_dim, dim)),
            "ff_b2": jnp.zeros((dim,), jnp.float32),
        })
    return params


if __name__ == "__main__":
    root = jax.random.PRNGKey(0)
    k_x, k_ctx, k_par = jax.random.split(root, 3)

    B, N, DIM = 2, 8, 32
    HEADS, DIM_HEAD, MLP_DIM, DEPTH = 2, 16, 64, 2
    N_CTX = 16

    x = jax.random.normal(k_x, (B, N, DIM), jnp.float32)
    context = jax.random.normal(k_ctx, (B, N_CTX, DIM), jnp.float32)
    params = init_params(k_par, DEPTH, DIM, HEADS, DIM_HEAD, MLP_DIM)

    fwd = jax.jit(functools.partial(transformer_cross_attn_forward,
                                    heads=HEADS, dim_head=DIM_HEAD))
    out = jax.block_until_ready(fwd(x, params, context=context))

    ref = _ref_forward(x, params, heads=HEADS, dim_head=DIM_HEAD, context=context)
    # Kernel matmuls run at HIGHEST precision for f32 operands, so only transcendental
    # (exp / rsqrt) implementation differences remain -> tight tolerance.
    np.testing.assert_allclose(np.asarray(out), np.asarray(ref), rtol=1e-3, atol=1e-3)

    print("KERNEL_OK")
</pallas_src>

<mosaic_0001>
module attributes {stable_mosaic.version = 11 : i64} {
  func.func @_linear_kernel(%arg0: i32, %arg1: i32, %arg2: memref<16x32xf32, #tpu.memory_space<vmem>>, %arg3: memref<1x32xf32, #tpu.memory_space<vmem>>, %arg4: memref<1x32xf32, #tpu.memory_space<vmem>>, %arg5: memref<32x32xf32, #tpu.memory_space<vmem>>, %arg6: memref<16x32xf32, #tpu.memory_space<vmem>>) attributes {dimension_semantics = [#tpu.dimension_semantics<parallel>, #tpu.dimension_semantics<parallel>], iteration_bounds = array<i64: 1, 1>, scalar_prefetch = 0 : i64, scratch_operands = 0 : i64, tpu.core_type = #tpu.core_type<tc>, window_params = [{transform_indices = @transform_0, window_bounds = array<i64: 16, 32>}, {pipeline_mode = #tpu.pipeline_mode<synchronous>, transform_indices = @transform_1, window_bounds = array<i64: 1, 32>}, {pipeline_mode = #tpu.pipeline_mode<synchronous>, transform_indices = @transform_2, window_bounds = array<i64: 1, 32>}, {transform_indices = @transform_3, window_bounds = array<i64: 32, 32>}, {transform_indices = @transform_4, window_bounds = array<i64: 16, 32>}]} {
    %c0 = arith.constant 0 : index
    %c0_0 = arith.constant 0 : index
    %0 = vector.load %arg2[%c0, %c0_0] : memref<16x32xf32, #tpu.memory_space<vmem>>, vector<16x32xf32>
    %cst = arith.constant dense<0.000000e+00> : vector<16xf32>
    %1 = vector.multi_reduction <add>, %0, %cst [1] : vector<16x32xf32> to vector<16xf32>
    %2 = vector.shape_cast %1 : vector<16xf32> to vector<16x1xf32>
    %3 = arith.mulf %0, %0 : vector<16x32xf32>
    %cst_1 = arith.constant dense<0.000000e+00> : vector<16xf32>
    %4 = vector.multi_reduction <add>, %3, %cst_1 [1] : vector<16x32xf32> to vector<16xf32>
    %5 = vector.shape_cast %4 : vector<16xf32> to vector<16x1xf32>
    %cst_2 = arith.constant 3.125000e-02 : f32
    %6 = vector.broadcast %cst_2 : f32 to vector<16x1xf32>
    %7 = arith.mulf %2, %6 : vector<16x1xf32>
    %cst_3 = arith.constant 3.125000e-02 : f32
    %8 = vector.broadcast %cst_3 : f32 to vector<16x1xf32>
    %9 = arith.mulf %5, %8 : vector<16x1xf32>
    %10 = arith.mulf %7, %7 : vector<16x1xf32>
    %11 = arith.subf %9, %10 : vector<16x1xf32>
    %12 = vector.broadcast %7 : vector<16x1xf32> to vector<16x32xf32>
    %13 = arith.subf %0, %12 : vector<16x32xf32>
    %cst_4 = arith.constant 9.99999974E-6 : f32
    %14 = vector.broadcast %cst_4 : f32 to vector<16x1xf32>
    %15 = arith.addf %11, %14 : vector<16x1xf32>
    %16 = math.rsqrt %15 : vector<16x1xf32>
    %17 = vector.broadcast %16 : vector<16x1xf32> to vector<16x32xf32>
    %18 = arith.mulf %13, %17 : vector<16x32xf32>
    %c0_5 = arith.constant 0 : index
    %c0_6 = arith.constant 0 : index
    %19 = vector.load %arg3[%c0_5, %c0_6] : memref<1x32xf32, #tpu.memory_space<vmem>>, vector<1x32xf32>
    %20 = vector.broadcast %19 : vector<1x32xf32> to vector<16x32xf32>
    %21 = arith.mulf %18, %20 : vector<16x32xf32>
    %c0_7 = arith.constant 0 : index
    %c0_8 = arith.constant 0 : index
    %22 = vector.load %arg4[%c0_7, %c0_8] : memref<1x32xf32, #tpu.memory_space<vmem>>, vector<1x32xf32>
    %23 = vector.broadcast %22 : vector<1x32xf32> to vector<16x32xf32>
    %24 = arith.addf %21, %23 : vector<16x32xf32>
    %c0_9 = arith.constant 0 : index
    %c0_10 = arith.constant 0 : index
    %25 = vector.load %arg5[%c0_9, %c0_10] : memref<32x32xf32, #tpu.memory_space<vmem>>, vector<32x32xf32>
    %cst_11 = arith.constant dense<0.000000e+00> : vector<16x32xf32>
    %26 = tpu.matmul %24, %25, %cst_11 {dimension_numbers = #tpu.dot_dimension_numbers<[1], [0], [0], [1], [0, 0, 1, 1], [], []>, precision = #tpu.contract_precision<fp32>} : vector<16x32xf32>, vector<32x32xf32>, vector<16x32xf32> -> vector<16x32xf32>
    %c0_12 = arith.constant 0 : index
    %c0_13 = arith.constant 0 : index
    %27 = vector.load %arg6[%c0_12, %c0_13] : memref<16x32xf32, #tpu.memory_space<vmem>>, vector<16x32xf32>
    tpu.vector_store %arg6[%c0_12, %c0_13], %26 {strides = array<i32>} : memref<16x32xf32, #tpu.memory_space<vmem>>, vector<16x32xf32>,
    return
  }
  func.func @transform_0(%arg0: i32, %arg1: i32) -> (i32, i32) {
    %c0_i32 = arith.constant 0 : i32
    %c0_i32_0 = arith.constant 0 : i32
    return %arg1, %c0_i32 : i32, i32
  }
  func.func @transform_1(%arg0: i32, %arg1: i32) -> (i32, i32) {
    %c0_i32 = arith.constant 0 : i32
    %c0_i32_0 = arith.constant 0 : i32
    %c0_i32_1 = arith.constant 0 : i32
    return %c0_i32, %c0_i32_0 : i32, i32
  }
  func.func @transform_2(%arg0: i32, %arg1: i32) -> (i32, i32) {
    %c0_i32 = arith.constant 0 : i32
    %c0_i32_0 = arith.constant 0 : i32
    %c0_i32_1 = arith.constant 0 : i32
    return %c0_i32, %c0_i32_0 : i32, i32
  }
  func.func @transform_3(%arg0: i32, %arg1: i32) -> (i32, i32) {
    %c0_i32 = arith.constant 0 : i32
    %c0_i32_0 = arith.constant 0 : i32
    return %c0_i32, %arg0 : i32, i32
  }
  func.func @transform_4(%arg0: i32, %arg1: i32) -> (i32, i32) {
    %c0_i32 = arith.constant 0 : i32
    return %arg1, %arg0 : i32, i32
  }
}

module attributes {stable_mosaic.version = 11 : i64} {
  func.func @_linear_kernel(%arg0: i32, %arg1: i32, %arg2: memref<16x32xf32, #tpu.memory_space<vmem>>, %arg3: memref<1x32xf32, #tpu.memory_space<vmem>>, %arg4: memref<1x32xf32, #tpu.memory_space<vmem>>, %arg5: memref<32x96xf32, #tpu.memory_space<vmem>>, %arg6: memref<16x96xf32, #tpu.memory_space<vmem>>) attributes {dimension_semantics = [#tpu.dimension_semantics<parallel>, #tpu.dimension_semantics<parallel>], iteration_bounds = array<i64: 1, 1>, scalar_prefetch = 0 : i64, scratch_operands = 0 : i64, tpu.core_type = #tpu.core_type<tc>, window_params = [{transform_indices = @transform_0, window_bounds = array<i64: 16, 32>}, {pipeline_mode = #tpu.pipeline_mode<synchronous>, transform_indices = @transform_1, window_bounds = array<i64: 1, 32>}, {pipeline_mode = #tpu.pipeline_mode<synchronous>, transform_indices = @transform_2, window_bounds = array<i64: 1, 32>}, {transform_indices = @transform_3, window_bounds = array<i64: 32, 96>}, {transform_indices = @transform_4, window_bounds = array<i64: 16, 96>}]} {
    %c0 = arith.constant 0 : index
    %c0_0 = arith.constant 0 : index
    %0 = vector.load %arg2[%c0, %c0_0] : memref<16x32xf32, #tpu.memory_space<vmem>>, vector<16x32xf32>
    %cst = arith.constant dense<0.000000e+00> : vector<16xf32>
    %1 = vector.multi_reduction <add>, %0, %cst [1] : vector<16x32xf32> to vector<16xf32>
    %2 = vector.shape_cast %1 : vector<16xf32> to vector<16x1xf32>
    %3 = arith.mulf %0, %0 : vector<16x32xf32>
    %cst_1 = arith.constant dense<0.000000e+00> : vector<16xf32>
    %4 = vector.multi_reduction <add>, %3, %cst_1 [1] : vector<16x32xf32> to vector<16xf32>
    %5 = vector.shape_cast %4 : vector<16xf32> to vector<16x1xf32>
    %cst_2 = arith.constant 3.125000e-02 : f32
    %6 = vector.broadcast %cst_2 : f32 to vector<16x1xf32>
    %7 = arith.mulf %2, %6 : vector<16x1xf32>
    %cst_3 = arith.constant 3.125000e-02 : f32
    %8 = vector.broadcast %cst_3 : f32 to vector<16x1xf32>
    %9 = arith.mulf %5, %8 : vector<16x1xf32>
    %10 = arith.mulf %7, %7 : vector<16x1xf32>
    %11 = arith.subf %9, %10 : vector<16x1xf32>
    %12 = vector.broadcast %7 : vector<16x1xf32> to vector<16x32xf32>
    %13 = arith.subf %0, %12 : vector<16x32xf32>
    %cst_4 = arith.constant 9.99999974E-6 : f32
    %14 = vector.broadcast %cst_4 : f32 to vector<16x1xf32>
    %15 = arith.addf %11, %14 : vector<16x1xf32>
    %16 = math.rsqrt %15 : vector<16x1xf32>
    %17 = vector.broadcast %16 : vector<16x1xf32> to vector<16x32xf32>
    %18 = arith.mulf %13, %17 : vector<16x32xf32>
    %c0_5 = arith.constant 0 : index
    %c0_6 = arith.constant 0 : index
    %19 = vector.load %arg3[%c0_5, %c0_6] : memref<1x32xf32, #tpu.memory_space<vmem>>, vector<1x32xf32>
    %20 = vector.broadcast %19 : vector<1x32xf32> to vector<16x32xf32>
    %21 = arith.mulf %18, %20 : vector<16x32xf32>
    %c0_7 = arith.constant 0 : index
    %c0_8 = arith.constant 0 : index
    %22 = vector.load %arg4[%c0_7, %c0_8] : memref<1x32xf32, #tpu.memory_space<vmem>>, vector<1x32xf32>
    %23 = vector.broadcast %22 : vector<1x32xf32> to vector<16x32xf32>
    %24 = arith.addf %21, %23 : vector<16x32xf32>
    %c0_9 = arith.constant 0 : index
    %c0_10 = arith.constant 0 : index
    %25 = vector.load %arg5[%c0_9, %c0_10] : memref<32x96xf32, #tpu.memory_space<vmem>>, vector<32x96xf32>
    %cst_11 = arith.constant dense<0.000000e+00> : vector<16x96xf32>
    %26 = tpu.matmul %24, %25, %cst_11 {dimension_numbers = #tpu.dot_dimension_numbers<[1], [0], [0], [1], [0, 0, 1, 1], [], []>, precision = #tpu.contract_precision<fp32>} : vector<16x32xf32>, vector<32x96xf32>, vector<16x96xf32> -> vector<16x96xf32>
    %c0_12 = arith.constant 0 : index
    %c0_13 = arith.constant 0 : index
    %27 = vector.load %arg6[%c0_12, %c0_13] : memref<16x96xf32, #tpu.memory_space<vmem>>, vector<16x96xf32>
    tpu.vector_store %arg6[%c0_12, %c0_13], %26 {strides = array<i32>} : memref<16x96xf32, #tpu.memory_space<vmem>>, vector<16x96xf32>,
    return
  }
  func.func @transform_0(%arg0: i32, %arg1: i32) -> (i32, i32) {
    %c0_i32 = arith.constant 0 : i32
    %c0_i32_0 = arith.constant 0 : i32
    return %arg1, %c0_i32 : i32, i32
  }
  func.func @transform_1(%arg0: i32, %arg1: i32) -> (i32, i32) {
    %c0_i32 = arith.constant 0 : i32
    %c0_i32_0 = arith.constant 0 : i32
    %c0_i32_1 = arith.constant 0 : i32
    return %c0_i32, %c0_i32_0 : i32, i32
  }
  func.func @transform_2(%arg0: i32, %arg1: i32) -> (i32, i32) {
    %c0_i32 = arith.constant 0 : i32
    %c0_i32_0 = arith.constant 0 : i32
    %c0_i32_1 = arith.constant 0 : i32
    return %c0_i32, %c0_i32_0 : i32, i32
  }
  func.func @transform_3(%arg0: i32, %arg1: i32) -> (i32, i32) {
    %c0_i32 = arith.constant 0 : i32
    %c0_i32_0 = arith.constant 0 : i32
    return %c0_i32, %arg0 : i32, i32
  }
  func.func @transform_4(%arg0: i32, %arg1: i32) -> (i32, i32) {
    %c0_i32 = arith.constant 0 : i32
    return %arg1, %arg0 : i32, i32
  }
}

module attributes {stable_mosaic.version = 11 : i64} {
  func.func @_mha_out_kernel(%arg0: i32, %arg1: i32, %arg2: memref<1x8x1x2x16xf32, #tpu.memory_space<vmem>>, %arg3: memref<1x8x1x2x16xf32, #tpu.memory_space<vmem>>, %arg4: memref<1x8x1x2x16xf32, #tpu.memory_space<vmem>>, %arg5: memref<2x16x32xf32, #tpu.memory_space<vmem>>, %arg6: memref<1x32xf32, #tpu.memory_space<vmem>>, %arg7: memref<1x8x32xf32, #tpu.memory_space<vmem>>, %arg8: memref<1x8x32xf32, #tpu.memory_space<vmem>>) attributes {dimension_semantics = [#tpu.dimension_semantics<parallel>, #tpu.dimension_semantics<parallel>], iteration_bounds = array<i64: 2, 1>, scalar_prefetch = 0 : i64, scratch_operands = 0 : i64, tpu.core_type = #tpu.core_type<tc>, window_params = [{transform_indices = @transform_0, window_bounds = array<i64: 1, 8, 1, 2, 16>}, {transform_indices = @transform_1, window_bounds = array<i64: 1, 8, 1, 2, 16>}, {transform_indices = @transform_2, window_bounds = array<i64: 1, 8, 1, 2, 16>}, {pipeline_mode = #tpu.pipeline_mode<synchronous>, transform_indices = @transform_3, window_bounds = array<i64: 2, 16, 32>}, {pipeline_mode = #tpu.pipeline_mode<synchronous>, transform_indices = @transform_4, window_bounds = array<i64: 1, 32>}, {transform_indices = @transform_5, window_bounds = array<i64: 1, 8, 32>}, {transform_indices = @transform_6, window_bounds = array<i64: 1, 8, 32>}]} {
    %c0 = arith.constant 0 : index
    %c0_0 = arith.constant 0 : index
    %0 = vector.load %arg6[%c0, %c0_0] : memref<1x32xf32, #tpu.memory_space<vmem>>, vector<1x32xf32>
    %c0_1 = arith.constant 0 : index
    %c0_2 = arith.constant 0 : index
    %c0_3 = arith.constant 0 : index
    %1 = vector.load %arg7[%c0_1, %c0_2, %c0_3] : memref<1x8x32xf32, #tpu.memory_space<vmem>>, vector<1x8x32xf32>
    %2 = vector.shape_cast %1 : vector<1x8x32xf32> to vector<8x32xf32>
    %3 = vector.broadcast %0 : vector<1x32xf32> to vector<8x32xf32>
    %4 = arith.addf %3, %2 : vector<8x32xf32>
    %c0_4 = arith.constant 0 : index
    %c0_5 = arith.constant 0 : index
    %c0_6 = arith.constant 0 : index
    %c0_7 = arith.constant 0 : index
    %c0_8 = arith.constant 0 : index
    %5 = vector.load %arg2[%c0_4, %c0_5, %c0_6, %c0_7, %c0_8] : memref<1x8x1x2x16xf32, #tpu.memory_space<vmem>>, vector<1x8x1x1x16xf32>
    %6 = vector.shape_cast %5 : vector<1x8x1x1x16xf32> to vector<8x16xf32>
    %cst = arith.constant 2.500000e-01 : f32
    %7 = vector.broadcast %cst : f32 to vector<8x16xf32>
    %8 = arith.mulf %6, %7 : vector<8x16xf32>
    %c0_9 = arith.constant 0 : index
    %c0_10 = arith.constant 0 : index
    %c0_11 = arith.constant 0 : index
    %c0_12 = arith.constant 0 : index
    %c0_13 = arith.constant 0 : index
    %9 = vector.load %arg3[%c0_9, %c0_10, %c0_11, %c0_12, %c0_13] : memref<1x8x1x2x16xf32, #tpu.memory_space<vmem>>, vector<1x8x1x1x16xf32>
    %10 = vector.shape_cast %9 : vector<1x8x1x1x16xf32> to vector<8x16xf32>
    %c0_14 = arith.constant 0 : index
    %c0_15 = arith.constant 0 : index
    %c0_16 = arith.constant 0 : index
    %c0_17 = arith.constant 0 : index
    %c0_18 = arith.constant 0 : index
    %11 = vector.load %arg4[%c0_14, %c0_15, %c0_16, %c0_17, %c0_18] : memref<1x8x1x2x16xf32, #tpu.memory_space<vmem>>, vector<1x8x1x1x16xf32>
    %12 = vector.shape_cast %11 : vector<1x8x1x1x16xf32> to vector<8x16xf32>
    %cst_19 = arith.constant dense<0.000000e+00> : vector<8x8xf32>
    %13 = tpu.matmul %8, %10, %cst_19 {dimension_numbers = #tpu.dot_dimension_numbers<[1], [1], [0], [0], [0, 0, 1, 0], [], []>, precision = #tpu.contract_precision<fp32>} : vector<8x16xf32>, vector<8x16xf32>, vector<8x8xf32> -> vector<8x8xf32>
    %cst_20 = arith.constant dense<0xFF800000> : vector<8xf32>
    %14 = vector.multi_reduction <maximumf>, %13, %cst_20 [1] : vector<8x8xf32> to vector<8xf32>
    %15 = vector.shape_cast %14 : vector<8xf32> to vector<8x1xf32>
    %16 = vector.broadcast %15 : vector<8x1xf32> to vector<8x8xf32>
    %17 = arith.subf %13, %16 : vector<8x8xf32>
    %18 = math.exp %17 : vector<8x8xf32>
    %cst_21 = arith.constant dense<0.000000e+00> : vector<8xf32>
    %19 = vector.multi_reduction <add>, %18, %cst_21 [1] : vector<8x8xf32> to vector<8xf32>
    %20 = vector.shape_cast %19 : vector<8xf32> to vector<8x1xf32>
    %cst_22 = arith.constant dense<0.000000e+00> : vector<8x16xf32>
    %21 = tpu.matmul %18, %12, %cst_22 {dimension_numbers = #tpu.dot_dimension_numbers<[1], [0], [0], [1], [0, 0, 1, 1], [], []>, precision = #tpu.contract_precision<fp32>} : vector<8x8xf32>, vector<8x16xf32>, vector<8x16xf32> -> vector<8x16xf32>
    %22 = tpu.reciprocal %20 : vector<8x1xf32> -> vector<8x1xf32>
    %23 = vector.broadcast %22 : vector<8x1xf32> to vector<8x16xf32>
    %24 = arith.mulf %21, %23 : vector<8x16xf32>
    %c0_23 = arith.constant 0 : index
    %c0_24 = arith.constant 0 : index
    %c0_25 = arith.constant 0 : index
    %25 = vector.load %arg5[%c0_23, %c0_24, %c0_25] : memref<2x16x32xf32, #tpu.memory_space<vmem>>, vector<1x16x32xf32>
    %26 = vector.shape_cast %25 : vector<1x16x32xf32> to vector<16x32xf32>
    %cst_26 = arith.constant dense<0.000000e+00> : vector<8x32xf32>
    %27 = tpu.matmul %24, %26, %cst_26 {dimension_numbers = #tpu.dot_dimension_numbers<[1], [0], [0], [1], [0, 0, 1, 1], [], []>, precision = #tpu.contract_precision<fp32>} : vector<8x16xf32>, vector<16x32xf32>, vector<8x32xf32> -> vector<8x32xf32>
    %28 = arith.addf %4, %27 : vector<8x32xf32>
    %c0_27 = arith.constant 0 : index
    %c0_28 = arith.constant 0 : index
    %c0_29 = arith.constant 0 : index
    %c1 = arith.constant 1 : index
    %c0_30 = arith.constant 0 : index
    %29 = vector.load %arg2[%c0_27, %c0_28, %c0_29, %c1, %c0_30] : memref<1x8x1x2x16xf32, #tpu.memory_space<vmem>>, vector<1x8x1x1x16xf32>
    %30 = vector.shape_cast %29 : vector<1x8x1x1x16xf32> to vector<8x16xf32>
    %cst_31 = arith.constant 2.500000e-01 : f32
    %31 = vector.broadcast %cst_31 : f32 to vector<8x16xf32>
    %32 = arith.mulf %30, %31 : vector<8x16xf32>
    %c0_32 = arith.constant 0 : index
    %c0_33 = arith.constant 0 : index
    %c0_34 = arith.constant 0 : index
    %c1_35 = arith.constant 1 : index
    %c0_36 = arith.constant 0 : index
    %33 = vector.load %arg3[%c0_32, %c0_33, %c0_34, %c1_35, %c0_36] : memref<1x8x1x2x16xf32, #tpu.memory_space<vmem>>, vector<1x8x1x1x16xf32>
    %34 = vector.shape_cast %33 : vector<1x8x1x1x16xf32> to vector<8x16xf32>
    %c0_37 = arith.constant 0 : index
    %c0_38 = arith.constant 0 : index
    %c0_39 = arith.constant 0 : index
    %c1_40 = arith.constant 1 : index
    %c0_41 = arith.constant 0 : index
    %35 = vector.load %arg4[%c0_37, %c0_38, %c0_39, %c1_40, %c0_41] : memref<1x8x1x2x16xf32, #tpu.memory_space<vmem>>, vector<1x8x1x1x16xf32>
    %36 = vector.shape_cast %35 : vector<1x8x1x1x16xf32> to vector<8x16xf32>
    %cst_42 = arith.constant dense<0.000000e+00> : vector<8x8xf32>
    %37 = tpu.matmul %32, %34, %cst_42 {dimension_numbers = #tpu.dot_dimension_numbers<[1], [1], [0], [0], [0, 0, 1, 0], [], []>, precision = #tpu.contract_precision<fp32>} : vector<8x16xf32>, vector<8x16xf32>, vector<8x8xf32> -> vector<8x8xf32>
    %cst_43 = arith.constant dense<0xFF800000> : vector<8xf32>
    %38 = vector.multi_reduction <maximumf>, %37, %cst_43 [1] : vector<8x8xf32> to vector<8xf32>
    %39 = vector.shape_cast %38 : vector<8xf32> to vector<8x1xf32>
    %40 = vector.broadcast %39 : vector<8x1xf32> to vector<8x8xf32>
    %41 = arith.subf %37, %40 : vector<8x8xf32>
    %42 = math.exp %41 : vector<8x8xf32>
    %cst_44 = arith.constant dense<0.000000e+00> : vector<8xf32>
    %43 = vector.multi_reduction <add>, %42, %cst_44 [1] : vector<8x8xf32> to vector<8xf32>
    %44 = vector.shape_cast %43 : vector<8xf32> to vector<8x1xf32>
    %cst_45 = arith.constant dense<0.000000e+00> : vector<8x16xf32>
    %45 = tpu.matmul %42, %36, %cst_45 {dimension_numbers = #tpu.dot_dimension_numbers<[1], [0], [0], [1], [0, 0, 1, 1], [], []>, precision = #tpu.contract_precision<fp32>} : vector<8x8xf32>, vector<8x16xf32>, vector<8x16xf32> -> vector<8x16xf32>
    %46 = tpu.reciprocal %44 : vector<8x1xf32> -> vector<8x1xf32>
    %47 = vector.broadcast %46 : vector<8x1xf32> to vector<8x16xf32>
    %48 = arith.mulf %45, %47 : vector<8x16xf32>
    %c1_46 = arith.constant 1 : index
    %c0_47 = arith.constant 0 : index
    %c0_48 = arith.constant 0 : index
    %49 = vector.load %arg5[%c1_46, %c0_47, %c0_48] : memref<2x16x32xf32, #tpu.memory_space<vmem>>, vector<1x16x32xf32>
    %50 = vector.shape_cast %49 : vector<1x16x32xf32> to vector<16x32xf32>
    %cst_49 = arith.constant dense<0.000000e+00> : vector<8x32xf32>
    %51 = tpu.matmul %48, %50, %cst_49 {dimension_numbers = #tpu.dot_dimension_numbers<[1], [0], [0], [1], [0, 0, 1, 1], [], []>, precision = #tpu.contract_precision<fp32>} : vector<8x16xf32>, vector<16x32xf32>, vector<8x32xf32> -> vector<8x32xf32>
    %52 = arith.addf %28, %51 : vector<8x32xf32>
    %c0_50 = arith.constant 0 : index
    %c0_51 = arith.constant 0 : index
    %c0_52 = arith.constant 0 : index
    %53 = vector.load %arg8[%c0_50, %c0_51, %c0_52] : memref<1x8x32xf32, #tpu.memory_space<vmem>>, vector<1x8x32xf32>
    %54 = vector.shape_cast %53 : vector<1x8x32xf32> to vector<8x32xf32>
    %55 = vector.shape_cast %52 : vector<8x32xf32> to vector<1x8x32xf32>
    tpu.vector_store %arg8[%c0_50, %c0_51, %c0_52], %55 {strides = array<i32>} : memref<1x8x32xf32, #tpu.memory_space<vmem>>, vector<1x8x32xf32>,
    return
  }
  func.func @transform_0(%arg0: i32, %arg1: i32) -> (i32, i32, i32, i32, i32) {
    %c0_i32 = arith.constant 0 : i32
    %c0_i32_0 = arith.constant 0 : i32
    %c0_i32_1 = arith.constant 0 : i32
    %c0_i32_2 = arith.constant 0 : i32
    return %arg0, %arg1, %c0_i32, %c0_i32_0, %c0_i32_1 : i32, i32, i32, i32, i32
  }
  func.func @transform_1(%arg0: i32, %arg1: i32) -> (i32, i32, i32, i32, i32) {
    %c0_i32 = arith.constant 0 : i32
    %c1_i32 = arith.constant 1 : i32
    %c0_i32_0 = arith.constant 0 : i32
    %c0_i32_1 = arith.constant 0 : i32
    %c0_i32_2 = arith.constant 0 : i32
    return %arg0, %c0_i32, %c1_i32, %c0_i32_0, %c0_i32_1 : i32, i32, i32, i32, i32
  }
  func.func @transform_2(%arg0: i32, %arg1: i32) -> (i32, i32, i32, i32, i32) {
    %c0_i32 = arith.constant 0 : i32
    %c2_i32 = arith.constant 2 : i32
    %c0_i32_0 = arith.constant 0 : i32
    %c0_i32_1 = arith.constant 0 : i32
    %c0_i32_2 = arith.constant 0 : i32
    return %arg0, %c0_i32, %c2_i32, %c0_i32_0, %c0_i32_1 : i32, i32, i32, i32, i32
  }
  func.func @transform_3(%arg0: i32, %arg1: i32) -> (i32, i32, i32) {
    %c0_i32 = arith.constant 0 : i32
    %c0_i32_0 = arith.constant 0 : i32
    %c0_i32_1 = arith.constant 0 : i32
    %c0_i32_2 = arith.constant 0 : i32
    return %c0_i32, %c0_i32_0, %c0_i32_1 : i32, i32, i32
  }
  func.func @transform_4(%arg0: i32, %arg1: i32) -> (i32, i32) {
    %c0_i32 = arith.constant 0 : i32
    %c0_i32_0 = arith.constant 0 : i32
    %c0_i32_1 = arith.constant 0 : i32
    return %c0_i32, %c0_i32_0 : i32, i32
  }
  func.func @transform_5(%arg0: i32, %arg1: i32) -> (i32, i32, i32) {
    %c0_i32 = arith.constant 0 : i32
    %c0_i32_0 = arith.constant 0 : i32
    return %arg0, %arg1, %c0_i32 : i32, i32, i32
  }
  func.func @transform_6(%arg0: i32, %arg1: i32) -> (i32, i32, i32) {
    %c0_i32 = arith.constant 0 : i32
    %c0_i32_0 = arith.constant 0 : i32
    return %arg0, %arg1, %c0_i32 : i32, i32, i32
  }
}

module attributes {stable_mosaic.version = 11 : i64} {
  func.func @_linear_kernel(%arg0: i32, %arg1: i32, %arg2: memref<32x32xf32, #tpu.memory_space<vmem>>, %arg3: memref<32x64xf32, #tpu.memory_space<vmem>>, %arg4: memref<32x64xf32, #tpu.memory_space<vmem>>) attributes {dimension_semantics = [#tpu.dimension_semantics<parallel>, #tpu.dimension_semantics<parallel>], iteration_bounds = array<i64: 1, 1>, scalar_prefetch = 0 : i64, scratch_operands = 0 : i64, tpu.core_type = #tpu.core_type<tc>, window_params = [{transform_indices = @transform_0, window_bounds = array<i64: 32, 32>}, {transform_indices = @transform_1, window_bounds = array<i64: 32, 64>}, {transform_indices = @transform_2, window_bounds = array<i64: 32, 64>}]} {
    %c0 = arith.constant 0 : index
    %c0_0 = arith.constant 0 : index
    %0 = vector.load %arg2[%c0, %c0_0] : memref<32x32xf32, #tpu.memory_space<vmem>>, vector<32x32xf32>
    %c0_1 = arith.constant 0 : index
    %c0_2 = arith.constant 0 : index
    %1 = vector.load %arg3[%c0_1, %c0_2] : memref<32x64xf32, #tpu.memory_space<vmem>>, vector<32x64xf32>
    %cst = arith.constant dense<0.000000e+00> : vector<32x64xf32>
    %2 = tpu.matmul %0, %1, %cst {dimension_numbers = #tpu.dot_dimension_numbers<[1], [0], [0], [1], [0, 0, 1, 1], [], []>, precision = #tpu.contract_precision<fp32>} : vector<32x32xf32>, vector<32x64xf32>, vector<32x64xf32> -> vector<32x64xf32>
    %c0_3 = arith.constant 0 : index
    %c0_4 = arith.constant 0 : index
    %3 = vector.load %arg4[%c0_3, %c0_4] : memref<32x64xf32, #tpu.memory_space<vmem>>, vector<32x64xf32>
    tpu.vector_store %arg4[%c0_3, %c0_4], %2 {strides = array<i32>} : memref<32x64xf32, #tpu.memory_space<vmem>>, vector<32x64xf32>,
    return
  }
  func.func @transform_0(%arg0: i32, %arg1: i32) -> (i32, i32) {
    %c0_i32 = arith.constant 0 : i32
    %c0_i32_0 = arith.constant 0 : i32
    return %arg1, %c0_i32 : i32, i32
  }
  func.func @transform_1(%arg0: i32, %arg1: i32) -> (i32, i32) {
    %c0_i32 = arith.constant 0 : i32
    %c0_i32_0 = arith.constant 0 : i32
    return %c0_i32, %arg0 : i32, i32
  }
  func.func @transform_2(%arg0: i32, %arg1: i32) -> (i32, i32) {
    %c0_i32 = arith.constant 0 : i32
    return %arg1, %arg0 : i32, i32
  }
}

module attributes {stable_mosaic.version = 11 : i64} {
  func.func @_mha_out_kernel(%arg0: i32, %arg1: i32, %arg2: memref<1x8x1x2x16xf32, #tpu.memory_space<vmem>>, %arg3: memref<1x16x1x2x16xf32, #tpu.memory_space<vmem>>, %arg4: memref<1x16x1x2x16xf32, #tpu.memory_space<vmem>>, %arg5: memref<2x16x32xf32, #tpu.memory_space<vmem>>, %arg6: memref<1x32xf32, #tpu.memory_space<vmem>>, %arg7: memref<1x8x32xf32, #tpu.memory_space<vmem>>, %arg8: memref<1x8x32xf32, #tpu.memory_space<vmem>>) attributes {dimension_semantics = [#tpu.dimension_semantics<parallel>, #tpu.dimension_semantics<parallel>], iteration_bounds = array<i64: 2, 1>, scalar_prefetch = 0 : i64, scratch_operands = 0 : i64, tpu.core_type = #tpu.core_type<tc>, window_params = [{transform_indices = @transform_0, window_bounds = array<i64: 1, 8, 1, 2, 16>}, {transform_indices = @transform_1, window_bounds = array<i64: 1, 16, 1, 2, 16>}, {transform_indices = @transform_2, window_bounds = array<i64: 1, 16, 1, 2, 16>}, {pipeline_mode = #tpu.pipeline_mode<synchronous>, transform_indices = @transform_3, window_bounds = array<i64: 2, 16, 32>}, {pipeline_mode = #tpu.pipeline_mode<synchronous>, transform_indices = @transform_4, window_bounds = array<i64: 1, 32>}, {transform_indices = @transform_5, window_bounds = array<i64: 1, 8, 32>}, {transform_indices = @transform_6, window_bounds = array<i64: 1, 8, 32>}]} {
    %c0 = arith.constant 0 : index
    %c0_0 = arith.constant 0 : index
    %0 = vector.load %arg6[%c0, %c0_0] : memref<1x32xf32, #tpu.memory_space<vmem>>, vector<1x32xf32>
    %c0_1 = arith.constant 0 : index
    %c0_2 = arith.constant 0 : index
    %c0_3 = arith.constant 0 : index
    %1 = vector.load %arg7[%c0_1, %c0_2, %c0_3] : memref<1x8x32xf32, #tpu.memory_space<vmem>>, vector<1x8x32xf32>
    %2 = vector.shape_cast %1 : vector<1x8x32xf32> to vector<8x32xf32>
    %3 = vector.broadcast %0 : vector<1x32xf32> to vector<8x32xf32>
    %4 = arith.addf %3, %2 : vector<8x32xf32>
    %c0_4 = arith.constant 0 : index
    %c0_5 = arith.constant 0 : index
    %c0_6 = arith.constant 0 : index
    %c0_7 = arith.constant 0 : index
    %c0_8 = arith.constant 0 : index
    %5 = vector.load %arg2[%c0_4, %c0_5, %c0_6, %c0_7, %c0_8] : memref<1x8x1x2x16xf32, #tpu.memory_space<vmem>>, vector<1x8x1x1x16xf32>
    %6 = vector.shape_cast %5 : vector<1x8x1x1x16xf32> to vector<8x16xf32>
    %cst = arith.constant 2.500000e-01 : f32
    %7 = vector.broadcast %cst : f32 to vector<8x16xf32>
    %8 = arith.mulf %6, %7 : vector<8x16xf32>
    %c0_9 = arith.constant 0 : index
    %c0_10 = arith.constant 0 : index
    %c0_11 = arith.constant 0 : index
    %c0_12 = arith.constant 0 : index
    %c0_13 = arith.constant 0 : index
    %9 = vector.load %arg3[%c0_9, %c0_10, %c0_11, %c0_12, %c0_13] : memref<1x16x1x2x16xf32, #tpu.memory_space<vmem>>, vector<1x16x1x1x16xf32>
    %10 = vector.shape_cast %9 : vector<1x16x1x1x16xf32> to vector<16x16xf32>
    %c0_14 = arith.constant 0 : index
    %c0_15 = arith.constant 0 : index
    %c0_16 = arith.constant 0 : index
    %c0_17 = arith.constant 0 : index
    %c0_18 = arith.constant 0 : index
    %11 = vector.load %arg4[%c0_14, %c0_15, %c0_16, %c0_17, %c0_18] : memref<1x16x1x2x16xf32, #tpu.memory_space<vmem>>, vector<1x16x1x1x16xf32>
    %12 = vector.shape_cast %11 : vector<1x16x1x1x16xf32> to vector<16x16xf32>
    %cst_19 = arith.constant dense<0.000000e+00> : vector<8x16xf32>
    %13 = tpu.matmul %8, %10, %cst_19 {dimension_numbers = #tpu.dot_dimension_numbers<[1], [1], [0], [0], [0, 0, 1, 0], [], []>, precision = #tpu.contract_precision<fp32>} : vector<8x16xf32>, vector<16x16xf32>, vector<8x16xf32> -> vector<8x16xf32>
    %cst_20 = arith.constant dense<0xFF800000> : vector<8xf32>
    %14 = vector.multi_reduction <maximumf>, %13, %cst_20 [1] : vector<8x16xf32> to vector<8xf32>
    %15 = vector.shape_cast %14 : vector<8xf32> to vector<8x1xf32>
    %16 = vector.broadcast %15 : vector<8x1xf32> to vector<8x16xf32>
    %17 = arith.subf %13, %16 : vector<8x16xf32>
    %18 = math.exp %17 : vector<8x16xf32>
    %cst_21 = arith.constant dense<0.000000e+00> : vector<8xf32>
    %19 = vector.multi_reduction <add>, %18, %cst_21 [1] : vector<8x16xf32> to vector<8xf32>
    %20 = vector.shape_cast %19 : vector<8xf32> to vector<8x1xf32>
    %cst_22 = arith.constant dense<0.000000e+00> : vector<8x16xf32>
    %21 = tpu.matmul %18, %12, %cst_22 {dimension_numbers = #tpu.dot_dimension_numbers<[1], [0], [0], [1], [0, 0, 1, 1], [], []>, precision = #tpu.contract_precision<fp32>} : vector<8x16xf32>, vector<16x16xf32>, vector<8x16xf32> -> vector<8x16xf32>
    %22 = tpu.reciprocal %20 : vector<8x1xf32> -> vector<8x1xf32>
    %23 = vector.broadcast %22 : vector<8x1xf32> to vector<8x16xf32>
    %24 = arith.mulf %21, %23 : vector<8x16xf32>
    %c0_23 = arith.constant 0 : index
    %c0_24 = arith.constant 0 : index
    %c0_25 = arith.constant 0 : index
    %25 = vector.load %arg5[%c0_23, %c0_24, %c0_25] : memref<2x16x32xf32, #tpu.memory_space<vmem>>, vector<1x16x32xf32>
    %26 = vector.shape_cast %25 : vector<1x16x32xf32> to vector<16x32xf32>
    %cst_26 = arith.constant dense<0.000000e+00> : vector<8x32xf32>
    %27 = tpu.matmul %24, %26, %cst_26 {dimension_numbers = #tpu.dot_dimension_numbers<[1], [0], [0], [1], [0, 0, 1, 1], [], []>, precision = #tpu.contract_precision<fp32>} : vector<8x16xf32>, vector<16x32xf32>, vector<8x32xf32> -> vector<8x32xf32>
    %28 = arith.addf %4, %27 : vector<8x32xf32>
    %c0_27 = arith.constant 0 : index
    %c0_28 = arith.constant 0 : index
    %c0_29 = arith.constant 0 : index
    %c1 = arith.constant 1 : index
    %c0_30 = arith.constant 0 : index
    %29 = vector.load %arg2[%c0_27, %c0_28, %c0_29, %c1, %c0_30] : memref<1x8x1x2x16xf32, #tpu.memory_space<vmem>>, vector<1x8x1x1x16xf32>
    %30 = vector.shape_cast %29 : vector<1x8x1x1x16xf32> to vector<8x16xf32>
    %cst_31 = arith.constant 2.500000e-01 : f32
    %31 = vector.broadcast %cst_31 : f32 to vector<8x16xf32>
    %32 = arith.mulf %30, %31 : vector<8x16xf32>
    %c0_32 = arith.constant 0 : index
    %c0_33 = arith.constant 0 : index
    %c0_34 = arith.constant 0 : index
    %c1_35 = arith.constant 1 : index
    %c0_36 = arith.constant 0 : index
    %33 = vector.load %arg3[%c0_32, %c0_33, %c0_34, %c1_35, %c0_36] : memref<1x16x1x2x16xf32, #tpu.memory_space<vmem>>, vector<1x16x1x1x16xf32>
    %34 = vector.shape_cast %33 : vector<1x16x1x1x16xf32> to vector<16x16xf32>
    %c0_37 = arith.constant 0 : index
    %c0_38 = arith.constant 0 : index
    %c0_39 = arith.constant 0 : index
    %c1_40 = arith.constant 1 : index
    %c0_41 = arith.constant 0 : index
    %35 = vector.load %arg4[%c0_37, %c0_38, %c0_39, %c1_40, %c0_41] : memref<1x16x1x2x16xf32, #tpu.memory_space<vmem>>, vector<1x16x1x1x16xf32>
    %36 = vector.shape_cast %35 : vector<1x16x1x1x16xf32> to vector<16x16xf32>
    %cst_42 = arith.constant dense<0.000000e+00> : vector<8x16xf32>
    %37 = tpu.matmul %32, %34, %cst_42 {dimension_numbers = #tpu.dot_dimension_numbers<[1], [1], [0], [0], [0, 0, 1, 0], [], []>, precision = #tpu.contract_precision<fp32>} : vector<8x16xf32>, vector<16x16xf32>, vector<8x16xf32> -> vector<8x16xf32>
    %cst_43 = arith.constant dense<0xFF800000> : vector<8xf32>
    %38 = vector.multi_reduction <maximumf>, %37, %cst_43 [1] : vector<8x16xf32> to vector<8xf32>
    %39 = vector.shape_cast %38 : vector<8xf32> to vector<8x1xf32>
    %40 = vector.broadcast %39 : vector<8x1xf32> to vector<8x16xf32>
    %41 = arith.subf %37, %40 : vector<8x16xf32>
    %42 = math.exp %41 : vector<8x16xf32>
    %cst_44 = arith.constant dense<0.000000e+00> : vector<8xf32>
    %43 = vector.multi_reduction <add>, %42, %cst_44 [1] : vector<8x16xf32> to vector<8xf32>
    %44 = vector.shape_cast %43 : vector<8xf32> to vector<8x1xf32>
    %cst_45 = arith.constant dense<0.000000e+00> : vector<8x16xf32>
    %45 = tpu.matmul %42, %36, %cst_45 {dimension_numbers = #tpu.dot_dimension_numbers<[1], [0], [0], [1], [0, 0, 1, 1], [], []>, precision = #tpu.contract_precision<fp32>} : vector<8x16xf32>, vector<16x16xf32>, vector<8x16xf32> -> vector<8x16xf32>
    %46 = tpu.reciprocal %44 : vector<8x1xf32> -> vector<8x1xf32>
    %47 = vector.broadcast %46 : vector<8x1xf32> to vector<8x16xf32>
    %48 = arith.mulf %45, %47 : vector<8x16xf32>
    %c1_46 = arith.constant 1 : index
    %c0_47 = arith.constant 0 : index
    %c0_48 = arith.constant 0 : index
    %49 = vector.load %arg5[%c1_46, %c0_47, %c0_48] : memref<2x16x32xf32, #tpu.memory_space<vmem>>, vector<1x16x32xf32>
    %50 = vector.shape_cast %49 : vector<1x16x32xf32> to vector<16x32xf32>
    %cst_49 = arith.constant dense<0.000000e+00> : vector<8x32xf32>
    %51 = tpu.matmul %48, %50, %cst_49 {dimension_numbers = #tpu.dot_dimension_numbers<[1], [0], [0], [1], [0, 0, 1, 1], [], []>, precision = #tpu.contract_precision<fp32>} : vector<8x16xf32>, vector<16x32xf32>, vector<8x32xf32> -> vector<8x32xf32>
    %52 = arith.addf %28, %51 : vector<8x32xf32>
    %c0_50 = arith.constant 0 : index
    %c0_51 = arith.constant 0 : index
    %c0_52 = arith.constant 0 : index
    %53 = vector.load %arg8[%c0_50, %c0_51, %c0_52] : memref<1x8x32xf32, #tpu.memory_space<vmem>>, vector<1x8x32xf32>
    %54 = vector.shape_cast %53 : vector<1x8x32xf32> to vector<8x32xf32>
    %55 = vector.shape_cast %52 : vector<8x32xf32> to vector<1x8x32xf32>
    tpu.vector_store %arg8[%c0_50, %c0_51, %c0_52], %55 {strides = array<i32>} : memref<1x8x32xf32, #tpu.memory_space<vmem>>, vector<1x8x32xf32>,
    return
  }
  func.func @transform_0(%arg0: i32, %arg1: i32) -> (i32, i32, i32, i32, i32) {
    %c0_i32 = arith.constant 0 : i32
    %c0_i32_0 = arith.constant 0 : i32
    %c0_i32_1 = arith.constant 0 : i32
    %c0_i32_2 = arith.constant 0 : i32
    return %arg0, %arg1, %c0_i32, %c0_i32_0, %c0_i32_1 : i32, i32, i32, i32, i32
  }
  func.func @transform_1(%arg0: i32, %arg1: i32) -> (i32, i32, i32, i32, i32) {
    %c0_i32 = arith.constant 0 : i32
    %c0_i32_0 = arith.constant 0 : i32
    %c0_i32_1 = arith.constant 0 : i32
    %c0_i32_2 = arith.constant 0 : i32
    %c0_i32_3 = arith.constant 0 : i32
    return %arg0, %c0_i32, %c0_i32_0, %c0_i32_1, %c0_i32_2 : i32, i32, i32, i32, i32
  }
  func.func @transform_2(%arg0: i32, %arg1: i32) -> (i32, i32, i32, i32, i32) {
    %c0_i32 = arith.constant 0 : i32
    %c1_i32 = arith.constant 1 : i32
    %c0_i32_0 = arith.constant 0 : i32
    %c0_i32_1 = arith.constant 0 : i32
    %c0_i32_2 = arith.constant 0 : i32
    return %arg0, %c0_i32, %c1_i32, %c0_i32_0, %c0_i32_1 : i32, i32, i32, i32, i32
  }
  func.func @transform_3(%arg0: i32, %arg1: i32) -> (i32, i32, i32) {
    %c0_i32 = arith.constant 0 : i32
    %c0_i32_0 = arith.constant 0 : i32
    %c0_i32_1 = arith.constant 0 : i32
    %c0_i32_2 = arith.constant 0 : i32
    return %c0_i32, %c0_i32_0, %c0_i32_1 : i32, i32, i32
  }
  func.func @transform_4(%arg0: i32, %arg1: i32) -> (i32, i32) {
    %c0_i32 = arith.constant 0 : i32
    %c0_i32_0 = arith.constant 0 : i32
    %c0_i32_1 = arith.constant 0 : i32
    return %c0_i32, %c0_i32_0 : i32, i32
  }
  func.func @transform_5(%arg0: i32, %arg1: i32) -> (i32, i32, i32) {
    %c0_i32 = arith.constant 0 : i32
    %c0_i32_0 = arith.constant 0 : i32
    return %arg0, %arg1, %c0_i32 : i32, i32, i32
  }
  func.func @transform_6(%arg0: i32, %arg1: i32) -> (i32, i32, i32) {
    %c0_i32 = arith.constant 0 : i32
    %c0_i32_0 = arith.constant 0 : i32
    return %arg0, %arg1, %c0_i32 : i32, i32, i32
  }
}

module attributes {stable_mosaic.version = 11 : i64} {
  func.func @_linear_kernel(%arg0: i32, %arg1: i32, %arg2: memref<16x32xf32, #tpu.memory_space<vmem>>, %arg3: memref<1x32xf32, #tpu.memory_space<vmem>>, %arg4: memref<1x32xf32, #tpu.memory_space<vmem>>, %arg5: memref<32x64xf32, #tpu.memory_space<vmem>>, %arg6: memref<1x64xf32, #tpu.memory_space<vmem>>, %arg7: memref<16x64xf32, #tpu.memory_space<vmem>>) attributes {dimension_semantics = [#tpu.dimension_semantics<parallel>, #tpu.dimension_semantics<parallel>], iteration_bounds = array<i64: 1, 1>, scalar_prefetch = 0 : i64, scratch_operands = 0 : i64, tpu.core_type = #tpu.core_type<tc>, window_params = [{transform_indices = @transform_0, window_bounds = array<i64: 16, 32>}, {pipeline_mode = #tpu.pipeline_mode<synchronous>, transform_indices = @transform_1, window_bounds = array<i64: 1, 32>}, {pipeline_mode = #tpu.pipeline_mode<synchronous>, transform_indices = @transform_2, window_bounds = array<i64: 1, 32>}, {transform_indices = @transform_3, window_bounds = array<i64: 32, 64>}, {transform_indices = @transform_4, window_bounds = array<i64: 1, 64>}, {transform_indices = @transform_5, window_bounds = array<i64: 16, 64>}]} {
    %c0 = arith.constant 0 : index
    %c0_0 = arith.constant 0 : index
    %0 = vector.load %arg2[%c0, %c0_0] : memref<16x32xf32, #tpu.memory_space<vmem>>, vector<16x32xf32>
    %cst = arith.constant dense<0.000000e+00> : vector<16xf32>
    %1 = vector.multi_reduction <add>, %0, %cst [1] : vector<16x32xf32> to vector<16xf32>
    %2 = vector.shape_cast %1 : vector<16xf32> to vector<16x1xf32>
    %3 = arith.mulf %0, %0 : vector<16x32xf32>
    %cst_1 = arith.constant dense<0.000000e+00> : vector<16xf32>
    %4 = vector.multi_reduction <add>, %3, %cst_1 [1] : vector<16x32xf32> to vector<16xf32>
    %5 = vector.shape_cast %4 : vector<16xf32> to vector<16x1xf32>
    %cst_2 = arith.constant 3.125000e-02 : f32
    %6 = vector.broadcast %cst_2 : f32 to vector<16x1xf32>
    %7 = arith.mulf %2, %6 : vector<16x1xf32>
    %cst_3 = arith.constant 3.125000e-02 : f32
    %8 = vector.broadcast %cst_3 : f32 to vector<16x1xf32>
    %9 = arith.mulf %5, %8 : vector<16x1xf32>
    %10 = arith.mulf %7, %7 : vector<16x1xf32>
    %11 = arith.subf %9, %10 : vector<16x1xf32>
    %12 = vector.broadcast %7 : vector<16x1xf32> to vector<16x32xf32>
    %13 = arith.subf %0, %12 : vector<16x32xf32>
    %cst_4 = arith.constant 9.99999974E-6 : f32
    %14 = vector.broadcast %cst_4 : f32 to vector<16x1xf32>
    %15 = arith.addf %11, %14 : vector<16x1xf32>
    %16 = math.rsqrt %15 : vector<16x1xf32>
    %17 = vector.broadcast %16 : vector<16x1xf32> to vector<16x32xf32>
    %18 = arith.mulf %13, %17 : vector<16x32xf32>
    %c0_5 = arith.constant 0 : index
    %c0_6 = arith.constant 0 : index
    %19 = vector.load %arg3[%c0_5, %c0_6] : memref<1x32xf32, #tpu.memory_space<vmem>>, vector<1x32xf32>
    %20 = vector.broadcast %19 : vector<1x32xf32> to vector<16x32xf32>
    %21 = arith.mulf %18, %20 : vector<16x32xf32>
    %c0_7 = arith.constant 0 : index
    %c0_8 = arith.constant 0 : index
    %22 = vector.load %arg4[%c0_7, %c0_8] : memref<1x32xf32, #tpu.memory_space<vmem>>, vector<1x32xf32>
    %23 = vector.broadcast %22 : vector<1x32xf32> to vector<16x32xf32>
    %24 = arith.addf %21, %23 : vector<16x32xf32>
    %c0_9 = arith.constant 0 : index
    %c0_10 = arith.constant 0 : index
    %25 = vector.load %arg5[%c0_9, %c0_10] : memref<32x64xf32, #tpu.memory_space<vmem>>, vector<32x64xf32>
    %cst_11 = arith.constant dense<0.000000e+00> : vector<16x64xf32>
    %26 = tpu.matmul %24, %25, %cst_11 {dimension_numbers = #tpu.dot_dimension_numbers<[1], [0], [0], [1], [0, 0, 1, 1], [], []>, precision = #tpu.contract_precision<fp32>} : vector<16x32xf32>, vector<32x64xf32>, vector<16x64xf32> -> vector<16x64xf32>
    %c0_12 = arith.constant 0 : index
    %c0_13 = arith.constant 0 : index
    %27 = vector.load %arg6[%c0_12, %c0_13] : memref<1x64xf32, #tpu.memory_space<vmem>>, vector<1x64xf32>
    %28 = vector.broadcast %27 : vector<1x64xf32> to vector<16x64xf32>
    %29 = arith.addf %26, %28 : vector<16x64xf32>
    %30 = arith.mulf %29, %29 : vector<16x64xf32>
    %31 = arith.mulf %29, %30 : vector<16x64xf32>
    %cst_14 = arith.constant 4.471500e-02 : f32
    %32 = vector.broadcast %cst_14 : f32 to vector<16x64xf32>
    %33 = arith.mulf %32, %31 : vector<16x64xf32>
    %34 = arith.addf %29, %33 : vector<16x64xf32>
    %cst_15 = arith.constant 0.797884583 : f32
    %35 = vector.broadcast %cst_15 : f32 to vector<16x64xf32>
    %36 = arith.mulf %35, %34 : vector<16x64xf32>
    %37 = math.tanh %36 : vector<16x64xf32>
    %cst_16 = arith.constant 1.000000e+00 : f32
    %38 = vector.broadcast %cst_16 : f32 to vector<16x64xf32>
    %39 = arith.addf %38, %37 : vector<16x64xf32>
    %cst_17 = arith.constant 5.000000e-01 : f32
    %40 = vector.broadcast %cst_17 : f32 to vector<16x64xf32>
    %41 = arith.mulf %40, %39 : vector<16x64xf32>
    %42 = arith.mulf %29, %41 : vector<16x64xf32>
    %c0_18 = arith.constant 0 : index
    %c0_19 = arith.constant 0 : index
    %43 = vector.load %arg7[%c0_18, %c0_19] : memref<16x64xf32, #tpu.memory_space<vmem>>, vector<16x64xf32>
    tpu.vector_store %arg7[%c0_18, %c0_19], %42 {strides = array<i32>} : memref<16x64xf32, #tpu.memory_space<vmem>>, vector<16x64xf32>,
    return
  }
  func.func @transform_0(%arg0: i32, %arg1: i32) -> (i32, i32) {
    %c0_i32 = arith.constant 0 : i32
    %c0_i32_0 = arith.constant 0 : i32
    return %arg1, %c0_i32 : i32, i32
  }
  func.func @transform_1(%arg0: i32, %arg1: i32) -> (i32, i32) {
    %c0_i32 = arith.constant 0 : i32
    %c0_i32_0 = arith.constant 0 : i32
    %c0_i32_1 = arith.constant 0 : i32
    return %c0_i32, %c0_i32_0 : i32, i32
  }
  func.func @transform_2(%arg0: i32, %arg1: i32) -> (i32, i32) {
    %c0_i32 = arith.constant 0 : i32
    %c0_i32_0 = arith.constant 0 : i32
    %c0_i32_1 = arith.constant 0 : i32
    return %c0_i32, %c0_i32_0 : i32, i32
  }
  func.func @transform_3(%arg0: i32, %arg1: i32) -> (i32, i32) {
    %c0_i32 = arith.constant 0 : i32
    %c0_i32_0 = arith.constant 0 : i32
    return %c0_i32, %arg0 : i32, i32
  }
  func.func @transform_4(%arg0: i32, %arg1: i32) -> (i32, i32) {
    %c0_i32 = arith.constant 0 : i32
    %c0_i32_0 = arith.constant 0 : i32
    return %c0_i32, %arg0 : i32, i32
  }
  func.func @transform_5(%arg0: i32, %arg1: i32) -> (i32, i32) {
    %c0_i32 = arith.constant 0 : i32
    return %arg1, %arg0 : i32, i32
  }
}

module attributes {stable_mosaic.version = 11 : i64} {
  func.func @_linear_kernel(%arg0: i32, %arg1: i32, %arg2: memref<16x64xf32, #tpu.memory_space<vmem>>, %arg3: memref<64x32xf32, #tpu.memory_space<vmem>>, %arg4: memref<1x32xf32, #tpu.memory_space<vmem>>, %arg5: memref<16x32xf32, #tpu.memory_space<vmem>>, %arg6: memref<16x32xf32, #tpu.memory_space<vmem>>) attributes {dimension_semantics = [#tpu.dimension_semantics<parallel>, #tpu.dimension_semantics<parallel>], iteration_bounds = array<i64: 1, 1>, scalar_prefetch = 0 : i64, scratch_operands = 0 : i64, tpu.core_type = #tpu.core_type<tc>, window_params = [{transform_indices = @transform_0, window_bounds = array<i64: 16, 64>}, {transform_indices = @transform_1, window_bounds = array<i64: 64, 32>}, {transform_indices = @transform_2, window_bounds = array<i64: 1, 32>}, {transform_indices = @transform_3, window_bounds = array<i64: 16, 32>}, {transform_indices = @transform_4, window_bounds = array<i64: 16, 32>}]} {
    %c0 = arith.constant 0 : index
    %c0_0 = arith.constant 0 : index
    %0 = vector.load %arg2[%c0, %c0_0] : memref<16x64xf32, #tpu.memory_space<vmem>>, vector<16x64xf32>
    %c0_1 = arith.constant 0 : index
    %c0_2 = arith.constant 0 : index
    %1 = vector.load %arg3[%c0_1, %c0_2] : memref<64x32xf32, #tpu.memory_space<vmem>>, vector<64x32xf32>
    %cst = arith.constant dense<0.000000e+00> : vector<16x32xf32>
    %2 = tpu.matmul %0, %1, %cst {dimension_numbers = #tpu.dot_dimension_numbers<[1], [0], [0], [1], [0, 0, 1, 1], [], []>, precision = #tpu.contract_precision<fp32>} : vector<16x64xf32>, vector<64x32xf32>, vector<16x32xf32> -> vector<16x32xf32>
    %c0_3 = arith.constant 0 : index
    %c0_4 = arith.constant 0 : index
    %3 = vector.load %arg4[%c0_3, %c0_4] : memref<1x32xf32, #tpu.memory_space<vmem>>, vector<1x32xf32>
    %4 = vector.broadcast %3 : vector<1x32xf32> to vector<16x32xf32>
    %5 = arith.addf %2, %4 : vector<16x32xf32>
    %c0_5 = arith.constant 0 : index
    %c0_6 = arith.constant 0 : index
    %6 = vector.load %arg5[%c0_5, %c0_6] : memref<16x32xf32, #tpu.memory_space<vmem>>, vector<16x32xf32>
    %7 = arith.addf %5, %6 : vector<16x32xf32>
    %c0_7 = arith.constant 0 : index
    %c0_8 = arith.constant 0 : index
    %8 = vector.load %arg6[%c0_7, %c0_8] : memref<16x32xf32, #tpu.memory_space<vmem>>, vector<16x32xf32>
    tpu.vector_store %arg6[%c0_7, %c0_8], %7 {strides = array<i32>} : memref<16x32xf32, #tpu.memory_space<vmem>>, vector<16x32xf32>,
    return
  }
  func.func @transform_0(%arg0: i32, %arg1: i32) -> (i32, i32) {
    %c0_i32 = arith.constant 0 : i32
    %c0_i32_0 = arith.constant 0 : i32
    return %arg1, %c0_i32 : i32, i32
  }
  func.func @transform_1(%arg0: i32, %arg1: i32) -> (i32, i32) {
    %c0_i32 = arith.constant 0 : i32
    %c0_i32_0 = arith.constant 0 : i32
    return %c0_i32, %arg0 : i32, i32
  }
  func.func @transform_2(%arg0: i32, %arg1: i32) -> (i32, i32) {
    %c0_i32 = arith.constant 0 : i32
    %c0_i32_0 = arith.constant 0 : i32
    return %c0_i32, %arg0 : i32, i32
  }
  func.func @transform_3(%arg0: i32, %arg1: i32) -> (i32, i32) {
    %c0_i32 = arith.constant 0 : i32
    return %arg1, %arg0 : i32, i32
  }
  func.func @transform_4(%arg0: i32, %arg1: i32) -> (i32, i32) {
    %c0_i32 = arith.constant 0 : i32
    return %arg1, %arg0 : i32, i32
  }
}

module attributes {stable_mosaic.version = 11 : i64} {
  func.func @_linear_kernel(%arg0: i32, %arg1: i32, %arg2: memref<16x64xf32, #tpu.memory_space<vmem>>, %arg3: memref<64x32xf32, #tpu.memory_space<vmem>>, %arg4: memref<1x32xf32, #tpu.memory_space<vmem>>, %arg5: memref<16x32xf32, #tpu.memory_space<vmem>>, %arg6: memref<16x32xf32, #tpu.memory_space<vmem>>) attributes {dimension_semantics = [#tpu.dimension_semantics<parallel>, #tpu.dimension_semantics<parallel>], iteration_bounds = array<i64: 1, 1>, scalar_prefetch = 0 : i64, scratch_operands = 0 : i64, tpu.core_type = #tpu.core_type<tc>, window_params = [{transform_indices = @transform_0, window_bounds = array<i64: 16, 64>}, {transform_indices = @transform_1, window_bounds = array<i64: 64, 32>}, {transform_indices = @transform_2, window_bounds = array<i64: 1, 32>}, {transform_indices = @transform_3, window_bounds = array<i64: 16, 32>}, {transform_indices = @transform_4, window_bounds = array<i64: 16, 32>}]} {
    %c0 = arith.constant 0 : index
    %c0_0 = arith.constant 0 : index
    %0 = vector.load %arg2[%c0, %c0_0] : memref<16x64xf32, #tpu.memory_space<vmem>>, vector<16x64xf32>
    %c0_1 = arith.constant 0 : index
    %c0_2 = arith.constant 0 : index
    %1 = vector.load %arg3[%c0_1, %c0_2] : memref<64x32xf32, #tpu.memory_space<vmem>>, vector<64x32xf32>
    %cst = arith.constant dense<0.000000e+00> : vector<16x32xf32>
    %2 = tpu.matmul %0, %1, %cst {dimension_numbers = #tpu.dot_dimension_numbers<[1], [0], [0], [1], [0, 0, 1, 1], [], []>, precision = #tpu.contract_precision<fp32>} : vector<16x64xf32>, vector<64x32xf32>, vector<16x32xf32> -> vector<16x32xf32>
    %c0_3 = arith.constant 0 : index
    %c0_4 = arith.constant 0 : index
    %3 = vector.load %arg4[%c0_3, %c0_4] : memref<1x32xf32, #tpu.memory_space<vmem>>, vector<1x32xf32>
    %4 = vector.broadcast %3 : vector<1x32xf32> to vector<16x32xf32>
    %5 = arith.addf %2, %4 : vector<16x32xf32>
    %c0_5 = arith.constant 0 : index
    %c0_6 = arith.constant 0 : index
    %6 = vector.load %arg5[%c0_5, %c0_6] : memref<16x32xf32, #tpu.memory_space<vmem>>, vector<16x32xf32>
    %7 = arith.addf %5, %6 : vector<16x32xf32>
    %c0_7 = arith.constant 0 : index
    %c0_8 = arith.constant 0 : index
    %8 = vector.load %arg6[%c0_7, %c0_8] : memref<16x32xf32, #tpu.memory_space<vmem>>, vector<16x32xf32>
    tpu.vector_store %arg6[%c0_7, %c0_8], %7 {strides = array<i32>} : memref<16x32xf32, #tpu.memory_space<vmem>>, vector<16x32xf32>,
    return
  }
  func.func @transform_0(%arg0: i32, %arg1: i32) -> (i32, i32) {
    %c0_i32 = arith.constant 0 : i32
    %c0_i32_0 = arith.constant 0 : i32
    return %arg1, %c0_i32 : i32, i32
  }
  func.func @transform_1(%arg0: i32, %arg1: i32) -> (i32, i32) {
    %c0_i32 = arith.constant 0 : i32
    %c0_i32_0 = arith.constant 0 : i32
    return %c0_i32, %arg0 : i32, i32
  }
  func.func @transform_2(%arg0: i32, %arg1: i32) -> (i32, i32) {
    %c0_i32 = arith.constant 0 : i32
    %c0_i32_0 = arith.constant 0 : i32
    return %c0_i32, %arg0 : i32, i32
  }
  func.func @transform_3(%arg0: i32, %arg1: i32) -> (i32, i32) {
    %c0_i32 = arith.constant 0 : i32
    return %arg1, %arg0 : i32, i32
  }
  func.func @transform_4(%arg0: i32, %arg1: i32) -> (i32, i32) {
    %c0_i32 = arith.constant 0 : i32
    return %arg1, %arg0 : i32, i32
  }
}

</mosaic_0001>

<bundles_post_ra>
// kernel: transformer_cross_attn_forward.16
= control target key start
LH: loop header
LB: loop body
LE: loop exit
PB: predicated region body
PF: predicated region fallthrough
CT: control target
= control target key end

     0   :  { %vm19_vm0 = vcmask 261120   ;;  %s877_s0 = inlined_call_operand.vmem [shape: f32[16,32], index: 0, kind: input, shape index: {}]   ;;  %s878_s3 = inlined_call_operand.vmem [shape: f32[32,32], index: 3, kind: input, shape index: {}]   ;;  %s879_s1 = inlined_call_operand.vmem [shape: f32[1,32], index: 1, kind: input, shape index: {}]   ;;  %s880_s2 = inlined_call_operand.vmem [shape: f32[1,32], index: 2, kind: input, shape index: {}]   ;;  %s881_s4 = inlined_call_operand.vmem [shape: f32[16,32], index: 4, kind: output, shape index: {}]  }
   0x1   :  { %v806_v0 = vld [vmem:[%s877_s0] sm:$0xff]  ;;  %v811_v1 = vld [vmem:[%s877_s0 + $0x8] sm:$0xff]  ;;  %v70_v10 = vld [vmem:[%s878_s3 + $0x10] sm:$0xff] }
   0x2   :  { %v20_v2 = vsel %vm19_vm0, %v806_v0, 0.0  ;;  %v26_v3 = vmul.f32 %v806_v0, %v806_v0  ;;  %v27_v4 = vmul.f32 %v811_v1, %v811_v1  ;;  %v23_v6 = vsel %vm19_vm0, %v811_v1, 0.0  ;;  %v68_v8 = vld [vmem:[%s878_s3] sm:$0xff]  ;;  %v69_v9 = vld [vmem:[%s878_s3 + $0x8] sm:$0xff]  ;;  %v71_v13 = vld [vmem:[%s878_s3 + $0x18] sm:$0xff] }
   0x3   :  { %21 = vadd.xlane.f32.xlu0 %v20_v2  ;;  %v79_v11 = vand.u32 4294901760, %v68_v8  ;;  %v82_v12 = vand.u32 4294901760, %v69_v9  ;;  %v85_v14 = vand.u32 4294901760, %v70_v10  ;;  %v88_v15 = vand.u32 4294901760, %v71_v13  ;;  %v612_v56 = vld [vmem:[%s879_s1] ss:$0 sm:$0xff] }
   0x4   :  { %v28_v5 = vsel %vm19_vm0, %v26_v3, 0.0  ;;  %v31_v7 = vsel %vm19_vm0, %v27_v4, 0.0  ;;  %v613_v58 = vld [vmem:[%s880_s2] ss:$0 sm:$0xff] }
   0x5   :  { %29 = vadd.xlane.f32.xlu1 %v28_v5  ;;  %v835_v16 = vpack.c.bf16 %v82_v12, %v79_v11  ;;  %v837_v17 = vpack.c.bf16 %v88_v15, %v85_v14  ;;  %v169_v18 = vsub.f32 %v68_v8, %v79_v11  ;;  %v176_v19 = vsub.f32 %v69_v9, %v82_v12 }
   0x6   :  { %v183_v25 = vsub.f32 %v70_v10, %v85_v14  ;;  %v190_v26 = vsub.f32 %v71_v13, %v88_v15 }
   0x7   :  { %24 = vadd.xlane.f32.xlu0 %v23_v6  ;;  %741 = vmatprep.subr.bf16.mxu0 %v835_v16  ;;  %v170_v20 = vand.u32 4294901760, %v169_v18  ;;  %v177_v21 = vand.u32 4294901760, %v176_v19  ;;  %v732_v38 = vpack.c.bf16 %v176_v19, %v169_v18 }
   0x8   :  { %717 = vmatprep.subr.bf16.mxu1 %v835_v16  ;;  %743 = vmatpush3.bf16.msra.mxu0 %v835_v16  ;;  %v184_v29 = vand.u32 4294901760, %v183_v25  ;;  %v191_v30 = vand.u32 4294901760, %v190_v26  ;;  %v850_v39 = vpack.c.bf16 %v190_v26, %v183_v25 }
   0x9   :  { %32 = vadd.xlane.f32.xlu1 %v31_v7  ;;  %719 = vmatpush3.bf16.msra.mxu1 %v835_v16  ;;  %v847_v22 = vpack.c.bf16 %v177_v21, %v170_v20  ;;  %v171_v23 = vsub.f32 %v169_v18, %v170_v20  ;;  %v178_v24 = vsub.f32 %v176_v19, %v177_v21 }
   0xa   :  { %745 = vmatprep.subr.bf16.mxu0 %v837_v17  ;;  %721 = vmatprep.subr.bf16.mxu1 %v837_v17  ;;  %v752_v32 = vpack.c.bf16 %v191_v30, %v184_v29  ;;  %v185_v33 = vsub.f32 %v183_v25, %v184_v29  ;;  %v192_v34 = vsub.f32 %v190_v26, %v191_v30 }
   0xb   :  { %v172_v27 = vand.u32 4294901760, %v171_v23  ;;  %v179_v28 = vand.u32 4294901760, %v178_v24 }
   0xc   :  { %747 = vmatpush3.bf16.msra.mxu0 %v837_v17  ;;  %v186_v35 = vand.u32 4294901760, %v185_v33  ;;  %v193_v36 = vand.u32 4294901760, %v192_v34 }
   0xd   :  { %723 = vmatpush3.bf16.msra.mxu1 %v837_v17  ;;  %749 = vmatprep.subr.bf16.mxu0 %v847_v22  ;;  %v724_v31 = vpack.c.bf16 %v179_v28, %v172_v27 }
   0xe   :  { %v728_v37 = vpack.c.bf16 %v193_v36, %v186_v35 }
   0xf   :  { %725 = vmatprep.subr.bf16.mxu1 %v724_v31 }
  0x90   :  { %v22_v40 = vpop.xlane.xlu0 %21 }
  0x91   :  { %v34_v41 = vmul.f32 0.03125, %v22_v40 }
  0x92   :  { %v30_v42 = vpop.xlane.xlu1 %29 }
  0x93   :  { %v38_v43 = vmul.f32 %v34_v41, %v34_v41  ;;  %v36_v44 = vmul.f32 0.03125, %v30_v42  ;;  %v42_v54 = vsub.f32 %v806_v0, %v34_v41 }
  0x94   :  { %v25_v45 = vpop.xlane.xlu0 %24 }
  0x95   :  { %v40_v46 = vsub.f32 %v36_v44, %v38_v43  ;;  %v35_v47 = vmul.f32 0.03125, %v25_v45 }
  0x96   :  { %v33_v48 = vpop.xlane.xlu1 %32 }
  0x97   :  { %v44_v49 = vadd.f32 1e-05, %v40_v46  ;;  %v39_v50 = vmul.f32 %v35_v47, %v35_v47  ;;  %v37_v51 = vmul.f32 0.03125, %v33_v48  ;;  %v43_v59 = vsub.f32 %v811_v1, %v35_v47 }
  0x99   :  { %774 = vrsqrt.f32 %v44_v49  ;;  %v41_v52 = vsub.f32 %v37_v51, %v39_v50 }
  0x9b   :  { %v45_v53 = vadd.f32 1e-05, %v41_v52 }
  0x9d   :  { %776 = vrsqrt.f32 %v45_v53 }
  0xa3   :  { %v775_v55 = vpop.eup %774 }
  0xa4   :  { %v48_v57 = vmul.f32 %v775_v55, %v42_v54 }
  0xa6   :  { %v57_v60 = vmul.f32 %v612_v56, %v48_v57 }
  0xa7   :  { %v777_v61 = vpop.eup %776 }
  0xa8   :  { %v49_v62 = vmul.f32 %v777_v61, %v43_v59  ;;  %v66_v63 = vadd.f32 %v613_v58, %v57_v60 }
  0xaa   :  { %v58_v2 = vmul.f32 %v612_v56, %v49_v62  ;;  %v73_v3 = vsel %vm19_vm0, %v66_v63, 0 }
  0xab   :  { %v147_v0 = vand.u32 4294901760, %v73_v3 }
  0xac   :  { %v67_v4 = vadd.f32 %v613_v58, %v58_v2 }
  0xad   :  { %v148_v5 = vsub.f32 %v73_v3, %v147_v0 }
  0xae   :  { %v76_v6 = vsel %vm19_vm0, %v67_v4, 0 }
  0xaf   :  { %v149_v7 = vand.u32 4294901760, %v148_v5  ;;  %v157_v8 = vand.u32 4294901760, %v76_v6 }
  0xb1   :  { %691 = vmatprep.mubr.f32.mxu0 %v149_v7  ;;  %v150_v9 = vsub.f32 %v148_v5, %v149_v7  ;;  %v158_v10 = vsub.f32 %v76_v6, %v157_v8 }
  0xb3   :  { %v151_v11 = vand.u32 4294901760, %v150_v9  ;;  %v159_v12 = vand.u32 4294901760, %v158_v10 }
  0xb5   :  { %658 = vmatprep.mubr.f32.mxu1 %v151_v11  ;;  %692 = vmatmul.mubr.f32.vlgmr.msra.gmra.mrb[0].mxu0 %v159_v12  ;;  %v160_v1 = vsub.f32 %v158_v10, %v159_v12 }
  0xb6   :  { %751 = vmatpush3.bf16.msra.mxu0 %v847_v22  ;;  %702 = vmatprep.mubr.f32.mxu0 %v147_v0 }
  0xb7   :  { %v161_v13 = vand.u32 4294901760, %v160_v1  ;;  %753 = vmatprep.subr.bf16.mxu0 %v752_v32 }
  0xb9   :  { %659 = vmatmul.mubr.f32.vlgmr.msra.gmra.mrb[0].mxu1 %v161_v13 }
  0xba   :  { %727 = vmatpush3.bf16.msra.mxu1 %v724_v31  ;;  %669 = vmatprep.mubr.f32.mxu1 %v147_v0 }
  0xbb   :  { %755 = vmatpush3.bf16.msra.mxu0 %v752_v32  ;;  %729 = vmatprep.subr.bf16.mxu1 %v728_v37 }
  0xbc   :  { %757 = vmatprep.subr.bf16.mxu0 %v835_v16 }
  0xbe   :  { %731 = vmatpush3.bf16.msra.mxu1 %v728_v37  ;;  %703 = vmatmul.mubr.f32.vlgmr.msra.gmra.mrb[0].mxu0 %v157_v8 }
  0xbf   :  { %759 = vmatpush3.bf16.msra.mxu0 %v835_v16  ;;  %713 = vmatprep.mubr.f32.mxu0 %v147_v0 }
  0xc0   :  { %733 = vmatprep.subr.bf16.mxu1 %v732_v38  ;;  %761 = vmatprep.subr.bf16.mxu0 %v837_v17 }
  0xc1   :  { %670 = vmatmul.mubr.f32.vlgmr.msra.gmra.mrb[0].mxu1 %v157_v8 }
  0xc2   :  { %735 = vmatpush3.bf16.msra.mxu1 %v732_v38  ;;  %680 = vmatprep.mubr.f32.mxu1 %v148_v5 }
  0xc3   :  { %763 = vmatpush3.bf16.msra.mxu0 %v837_v17  ;;  %737 = vmatprep.subr.bf16.mxu1 %v850_v39 }
  0xc6   :  { %739 = vmatpush3.bf16.msra.mxu1 %v850_v39  ;;  %714 = vmatmul.mubr.f32.vlgmr.msra.gmra.mrb[0].mxu0 %v157_v8 }
  0xc9   :  { %681 = vmatmul.mubr.f32.vlgmr.msra.gmra.mrb[0].mxu1 %v158_v10 }
 0x199   :  { %v715_v14 = vpop.f32.mrb[0].mxu0 }
 0x19a   :  { %v596_v15 = vpop.f32.mrb[1].mxu0 }
 0x19c   :  { %v682_v18 = vpop.f32.mrb[0].mxu1 }
 0x19d   :  { %v764_v19 = vadd.f32 %v715_v14, %v682_v18  ;;  %v340_v16 = vpop.f32.mrb[1].mxu1 }
 0x19e   :  { %v765_v20 = vadd.f32 %v596_v15, %v340_v16 }
 0x19f   :  { %607 = vst.msk [vmem:[%s881_s4 + $0x8] sm:$0xff] %vm19_vm0, %v764_v19 }
 0x1a0   :  { %606 = vst.msk [vmem:[%s881_s4] sm:$0xff] %vm19_vm0, %v765_v20 }

// kernel: transformer_cross_attn_forward.14
= control target key start
LH: loop header
LB: loop body
LE: loop exit
PB: predicated region body
PF: predicated region fallthrough
CT: control target
= control target key end

     0   :  { %vm19_vm0 = vcmask 261120   ;;  %vm606_vm1 = vcmask 785408   ;;  %s876_s0 = inlined_call_operand.vmem [shape: f32[16,32], index: 0, kind: input, shape index: {}]   ;;  %s877_s3 = inlined_call_operand.vmem [shape: f32[32,96], index: 3, kind: input, shape index: {}]   ;;  %s878_s1 = inlined_call_operand.vmem [shape: f32[1,32], index: 1, kind: input, shape index: {}]   ;;  %s879_s2 = inlined_call_operand.vmem [shape: f32[1,32], index: 2, kind: input, shape index: {}]   ;;  %s880_s4 = inlined_call_operand.vmem [shape: f32[16,96], index: 4, kind: output, shape index: {}]  }
   0x1   :  { %v807_v0 = vld [vmem:[%s876_s0] sm:$0xff]  ;;  %v812_v1 = vld [vmem:[%s876_s0 + $0x8] sm:$0xff]  ;;  %v70_v10 = vld [vmem:[%s877_s3 + $0x10] sm:$0xff] }
   0x2   :  { %v20_v2 = vsel %vm19_vm0, %v807_v0, 0.0  ;;  %v26_v3 = vmul.f32 %v807_v0, %v807_v0  ;;  %v27_v4 = vmul.f32 %v812_v1, %v812_v1  ;;  %v23_v6 = vsel %vm19_vm0, %v812_v1, 0.0  ;;  %v68_v8 = vld [vmem:[%s877_s3] sm:$0xff]  ;;  %v69_v9 = vld [vmem:[%s877_s3 + $0x8] sm:$0xff]  ;;  %v71_v13 = vld [vmem:[%s877_s3 + $0x18] sm:$0xff] }
   0x3   :  { %21 = vadd.xlane.f32.xlu0 %v20_v2  ;;  %v79_v11 = vand.u32 4294901760, %v68_v8  ;;  %v82_v12 = vand.u32 4294901760, %v69_v9  ;;  %v85_v14 = vand.u32 4294901760, %v70_v10  ;;  %v88_v15 = vand.u32 4294901760, %v71_v13  ;;  %v613_v56 = vld [vmem:[%s878_s1] ss:$0 sm:$0xff] }
   0x4   :  { %v28_v5 = vsel %vm19_vm0, %v26_v3, 0.0  ;;  %v31_v7 = vsel %vm19_vm0, %v27_v4, 0.0  ;;  %v614_v58 = vld [vmem:[%s879_s2] ss:$0 sm:$0xff] }
   0x5   :  { %29 = vadd.xlane.f32.xlu1 %v28_v5  ;;  %v836_v16 = vpack.c.bf16 %v82_v12, %v79_v11  ;;  %v838_v17 = vpack.c.bf16 %v88_v15, %v85_v14  ;;  %v169_v18 = vsub.f32 %v68_v8, %v79_v11  ;;  %v176_v19 = vsub.f32 %v69_v9, %v82_v12 }
   0x6   :  { %v183_v25 = vsub.f32 %v70_v10, %v85_v14  ;;  %v190_v26 = vsub.f32 %v71_v13, %v88_v15 }
   0x7   :  { %24 = vadd.xlane.f32.xlu0 %v23_v6  ;;  %742 = vmatprep.subr.bf16.mxu0 %v836_v16  ;;  %v170_v20 = vand.u32 4294901760, %v169_v18  ;;  %v177_v21 = vand.u32 4294901760, %v176_v19  ;;  %v733_v38 = vpack.c.bf16 %v176_v19, %v169_v18 }
   0x8   :  { %718 = vmatprep.subr.bf16.mxu1 %v836_v16  ;;  %744 = vmatpush3.bf16.msra.mxu0 %v836_v16  ;;  %v184_v29 = vand.u32 4294901760, %v183_v25  ;;  %v191_v30 = vand.u32 4294901760, %v190_v26  ;;  %v851_v39 = vpack.c.bf16 %v190_v26, %v183_v25 }
   0x9   :  { %32 = vadd.xlane.f32.xlu1 %v31_v7  ;;  %720 = vmatpush3.bf16.msra.mxu1 %v836_v16  ;;  %v848_v22 = vpack.c.bf16 %v177_v21, %v170_v20  ;;  %v171_v23 = vsub.f32 %v169_v18, %v170_v20  ;;  %v178_v24 = vsub.f32 %v176_v19, %v177_v21 }
   0xa   :  { %746 = vmatprep.subr.bf16.mxu0 %v838_v17  ;;  %722 = vmatprep.subr.bf16.mxu1 %v838_v17  ;;  %v753_v32 = vpack.c.bf16 %v191_v30, %v184_v29  ;;  %v185_v33 = vsub.f32 %v183_v25, %v184_v29  ;;  %v192_v34 = vsub.f32 %v190_v26, %v191_v30 }
   0xb   :  { %v172_v27 = vand.u32 4294901760, %v171_v23  ;;  %v179_v28 = vand.u32 4294901760, %v178_v24 }
   0xc   :  { %748 = vmatpush3.bf16.msra.mxu0 %v838_v17  ;;  %v186_v35 = vand.u32 4294901760, %v185_v33  ;;  %v193_v36 = vand.u32 4294901760, %v192_v34 }
   0xd   :  { %724 = vmatpush3.bf16.msra.mxu1 %v838_v17  ;;  %750 = vmatprep.subr.bf16.mxu0 %v848_v22  ;;  %v725_v31 = vpack.c.bf16 %v179_v28, %v172_v27 }
   0xe   :  { %v729_v37 = vpack.c.bf16 %v193_v36, %v186_v35 }
   0xf   :  { %726 = vmatprep.subr.bf16.mxu1 %v725_v31 }
  0x90   :  { %v22_v40 = vpop.xlane.xlu0 %21 }
  0x91   :  { %v34_v41 = vmul.f32 0.03125, %v22_v40 }
  0x92   :  { %v30_v42 = vpop.xlane.xlu1 %29 }
  0x93   :  { %v38_v43 = vmul.f32 %v34_v41, %v34_v41  ;;  %v36_v44 = vmul.f32 0.03125, %v30_v42  ;;  %v42_v54 = vsub.f32 %v807_v0, %v34_v41 }
  0x94   :  { %v25_v45 = vpop.xlane.xlu0 %24 }
  0x95   :  { %v40_v46 = vsub.f32 %v36_v44, %v38_v43  ;;  %v35_v47 = vmul.f32 0.03125, %v25_v45 }
  0x96   :  { %v33_v48 = vpop.xlane.xlu1 %32 }
  0x97   :  { %v44_v49 = vadd.f32 1e-05, %v40_v46  ;;  %v39_v50 = vmul.f32 %v35_v47, %v35_v47  ;;  %v37_v51 = vmul.f32 0.03125, %v33_v48  ;;  %v43_v59 = vsub.f32 %v812_v1, %v35_v47 }
  0x99   :  { %775 = vrsqrt.f32 %v44_v49  ;;  %v41_v52 = vsub.f32 %v37_v51, %v39_v50 }
  0x9b   :  { %v45_v53 = vadd.f32 1e-05, %v41_v52 }
  0x9d   :  { %777 = vrsqrt.f32 %v45_v53 }
  0xa3   :  { %v776_v55 = vpop.eup %775 }
  0xa4   :  { %v48_v57 = vmul.f32 %v776_v55, %v42_v54 }
  0xa6   :  { %v57_v60 = vmul.f32 %v613_v56, %v48_v57 }
  0xa7   :  { %v778_v61 = vpop.eup %777 }
  0xa8   :  { %v49_v62 = vmul.f32 %v778_v61, %v43_v59  ;;  %v66_v63 = vadd.f32 %v614_v58, %v57_v60 }
  0xaa   :  { %v58_v2 = vmul.f32 %v613_v56, %v49_v62  ;;  %v73_v3 = vsel %vm19_vm0, %v66_v63, 0 }
  0xab   :  { %v147_v0 = vand.u32 4294901760, %v73_v3 }
  0xac   :  { %v67_v4 = vadd.f32 %v614_v58, %v58_v2 }
  0xad   :  { %v148_v5 = vsub.f32 %v73_v3, %v147_v0 }
  0xae   :  { %v76_v6 = vsel %vm19_vm0, %v67_v4, 0 }
  0xaf   :  { %v149_v7 = vand.u32 4294901760, %v148_v5  ;;  %v157_v8 = vand.u32 4294901760, %v76_v6 }
  0xb1   :  { %692 = vmatprep.mubr.f32.mxu0 %v149_v7  ;;  %v150_v9 = vsub.f32 %v148_v5, %v149_v7  ;;  %v158_v10 = vsub.f32 %v76_v6, %v157_v8 }
  0xb3   :  { %v151_v11 = vand.u32 4294901760, %v150_v9  ;;  %v159_v12 = vand.u32 4294901760, %v158_v10 }
  0xb5   :  { %659 = vmatprep.mubr.f32.mxu1 %v151_v11  ;;  %693 = vmatmul.mubr.f32.vlgmr.msra.gmra.mrb[0].mxu0 %v159_v12  ;;  %v160_v1 = vsub.f32 %v158_v10, %v159_v12 }
  0xb6   :  { %752 = vmatpush3.bf16.msra.mxu0 %v848_v22  ;;  %703 = vmatprep.mubr.f32.mxu0 %v147_v0 }
  0xb7   :  { %v161_v13 = vand.u32 4294901760, %v160_v1  ;;  %754 = vmatprep.subr.bf16.mxu0 %v753_v32 }
  0xb9   :  { %660 = vmatmul.mubr.f32.vlgmr.msra.gmra.mrb[0].mxu1 %v161_v13 }
  0xba   :  { %728 = vmatpush3.bf16.msra.mxu1 %v725_v31  ;;  %670 = vmatprep.mubr.f32.mxu1 %v147_v0 }
  0xbb   :  { %756 = vmatpush3.bf16.msra.mxu0 %v753_v32  ;;  %730 = vmatprep.subr.bf16.mxu1 %v729_v37 }
  0xbc   :  { %758 = vmatprep.subr.bf16.mxu0 %v836_v16 }
  0xbe   :  { %732 = vmatpush3.bf16.msra.mxu1 %v729_v37  ;;  %704 = vmatmul.mubr.f32.vlgmr.msra.gmra.mrb[0].mxu0 %v157_v8 }
  0xbf   :  { %760 = vmatpush3.bf16.msra.mxu0 %v836_v16  ;;  %714 = vmatprep.mubr.f32.mxu0 %v147_v0 }
  0xc0   :  { %734 = vmatprep.subr.bf16.mxu1 %v733_v38  ;;  %762 = vmatprep.subr.bf16.mxu0 %v838_v17 }
  0xc1   :  { %671 = vmatmul.mubr.f32.vlgmr.msra.gmra.mrb[0].mxu1 %v157_v8 }
  0xc2   :  { %736 = vmatpush3.bf16.msra.mxu1 %v733_v38  ;;  %681 = vmatprep.mubr.f32.mxu1 %v148_v5 }
  0xc3   :  { %764 = vmatpush3.bf16.msra.mxu0 %v838_v17  ;;  %738 = vmatprep.subr.bf16.mxu1 %v851_v39 }
  0xc6   :  { %740 = vmatpush3.bf16.msra.mxu1 %v851_v39  ;;  %715 = vmatmul.mubr.f32.vlgmr.msra.gmra.mrb[0].mxu0 %v157_v8 }
  0xc9   :  { %682 = vmatmul.mubr.f32.vlgmr.msra.gmra.mrb[0].mxu1 %v158_v10 }
 0x199   :  { %v716_v14 = vpop.f32.mrb[0].mxu0 }
 0x19a   :  { %v596_v15 = vpop.f32.mrb[1].mxu0 }
 0x19c   :  { %v683_v18 = vpop.f32.mrb[0].mxu1 }
 0x19d   :  { %v765_v16 = vadd.f32 %v716_v14, %v683_v18  ;;  %v340_v19 = vpop.f32.mrb[1].mxu1 }
 0x19e   :  { %v766_v20 = vadd.f32 %v596_v15, %v340_v19 }
 0x19f   :  { %608 = vst.msk [vmem:[%s880_s4 + $0x8] sm:$0xff] %vm606_vm1, %v765_v16 }
 0x1a0   :  { %607 = vst.msk [vmem:[%s880_s4] sm:$0xff] %vm606_vm1, %v766_v20 }

// kernel: transformer_cross_attn_forward.17
= control target key start
LH: loop header
LB: loop body
LE: loop exit
PB: predicated region body
PF: predicated region fallthrough
CT: control target
= control target key end

     0   :  { %vm19_vm0 = vcmask 261120   ;;  %vm646_vm1 = vcmask 523264   ;;  %s970_s1 = inlined_call_operand.vmem [shape: f32[32,64], index: 1, kind: input, shape index: {}]   ;;  %s971_s0 = inlined_call_operand.vmem [shape: f32[32,32], index: 0, kind: input, shape index: {}]   ;;  %s972_s2 = inlined_call_operand.vmem [shape: f32[32,64], index: 2, kind: output, shape index: {}]  }
   0x1   :  { %v15_v0 = vld [vmem:[%s970_s1] sm:$0xff]  ;;  %v16_v1 = vld [vmem:[%s970_s1 + $0x8] sm:$0xff]  ;;  %v17_v2 = vld [vmem:[%s970_s1 + $0x10] sm:$0xff] }
   0x2   :  { %v33_v3 = vand.u32 4294901760, %v15_v0  ;;  %v36_v4 = vand.u32 4294901760, %v16_v1  ;;  %v18_v5 = vld [vmem:[%s970_s1 + $0x18] sm:$0xff]  ;;  %v39_v6 = vand.u32 4294901760, %v17_v2  ;;  %v11_v7 = vld [vmem:[%s971_s0] sm:$0xff]  ;;  %v12_v8 = vld [vmem:[%s971_s0 + $0x8] sm:$0xff] }
   0x3   :  { %v42_v9 = vand.u32 4294901760, %v18_v5  ;;  %v21_v10 = vsel %vm19_vm0, %v11_v7, 0  ;;  %v24_v11 = vsel %vm19_vm0, %v12_v8, 0  ;;  %v13_v12 = vld [vmem:[%s971_s0 + $0x10] sm:$0xff]  ;;  %v14_v13 = vld [vmem:[%s971_s0 + $0x18] sm:$0xff] }
   0x4   :  { %v896_v14 = vpack.c.bf16 %v36_v4, %v33_v3  ;;  %v898_v15 = vand.u32 4294901760, %v21_v10  ;;  %v900_v16 = vand.u32 4294901760, %v24_v11  ;;  %v143_v17 = vsub.f32 %v15_v0, %v33_v3 }
   0x5   :  { %v902_v18 = vpack.c.bf16 %v42_v9, %v39_v6  ;;  %v150_v19 = vsub.f32 %v16_v1, %v36_v4  ;;  %v27_v20 = vsel %vm19_vm0, %v13_v12, 0  ;;  %v30_v21 = vsel %vm19_vm0, %v14_v13, 0 }
   0x6   :  { %788 = vmatprep.subr.bf16.mxu1 %v896_v14  ;;  %812 = vmatprep.subr.bf16.mxu0 %v896_v14  ;;  %v909_v22 = vsub.f32 %v21_v10, %v898_v15  ;;  %v912_v23 = vsub.f32 %v24_v11, %v900_v16  ;;  %v144_v24 = vand.u32 4294901760, %v143_v17  ;;  %v914_v25 = vand.u32 4294901760, %v27_v20 }
   0x7   :  { %790 = vmatpush3.bf16.msra.mxu1 %v896_v14  ;;  %814 = vmatpush3.bf16.msra.mxu0 %v896_v14  ;;  %v151_v26 = vand.u32 4294901760, %v150_v19  ;;  %v918_v27 = vand.u32 4294901760, %v30_v21  ;;  %v157_v28 = vsub.f32 %v17_v2, %v39_v6  ;;  %v164_v29 = vsub.f32 %v18_v5, %v42_v9 }
   0x8   :  { %792 = vmatprep.subr.bf16.mxu1 %v902_v18  ;;  %816 = vmatprep.subr.bf16.mxu0 %v902_v18  ;;  %v103_v30 = vand.u32 4294901760, %v909_v22  ;;  %v113_v31 = vand.u32 4294901760, %v912_v23  ;;  %v145_v32 = vsub.f32 %v143_v17, %v144_v24  ;;  %v925_v33 = vsub.f32 %v27_v20, %v914_v25 }
   0x9   :  { %v152_v34 = vsub.f32 %v150_v19, %v151_v26  ;;  %v819_v35 = vpack.c.bf16 %v151_v26, %v144_v24  ;;  %v928_v36 = vsub.f32 %v30_v21, %v918_v27  ;;  %v158_v37 = vand.u32 4294901760, %v157_v28 }
   0xa   :  { %v104_v38 = vsub.f32 %v909_v22, %v103_v30  ;;  %753 = vmatprep.mubr.f32.mxu0 %v103_v30  ;;  %v114_v39 = vsub.f32 %v912_v23, %v113_v31  ;;  %v146_v40 = vand.u32 4294901760, %v145_v32  ;;  %v123_v41 = vand.u32 4294901760, %v925_v33 }
   0xb   :  { %794 = vmatpush3.bf16.msra.mxu1 %v902_v18  ;;  %818 = vmatpush3.bf16.msra.mxu0 %v902_v18  ;;  %v153_v42 = vand.u32 4294901760, %v152_v34  ;;  %v133_v43 = vand.u32 4294901760, %v928_v36  ;;  %v159_v44 = vsub.f32 %v157_v28, %v158_v37  ;;  %v165_v45 = vand.u32 4294901760, %v164_v29 }
   0xc   :  { %v105_v46 = vand.u32 4294901760, %v104_v38  ;;  %v115_v47 = vand.u32 4294901760, %v114_v39  ;;  %820 = vmatprep.subr.bf16.mxu0 %v819_v35  ;;  %v124_v48 = vsub.f32 %v925_v33, %v123_v41  ;;  %v803_v58 = vpack.c.bf16 %v150_v19, %v143_v17 }
   0xd   :  { %v795_v49 = vpack.c.bf16 %v153_v42, %v146_v40  ;;  %v134_v50 = vsub.f32 %v928_v36, %v133_v43  ;;  %v160_v51 = vand.u32 4294901760, %v159_v44  ;;  %v166_v52 = vsub.f32 %v164_v29, %v165_v45 }
   0xe   :  { %711 = vmatprep.mubr.f32.mxu1 %v105_v46  ;;  %754 = vmatmul.mubr.f32.vlgmr.msra.gmra.mrb[0].mxu0 %v113_v31  ;;  %v125_v53 = vand.u32 4294901760, %v124_v48  ;;  %v823_v54 = vpack.c.bf16 %v165_v45, %v158_v37  ;;  %v807_v59 = vpack.c.bf16 %v164_v29, %v157_v28 }
   0xf   :  { %712 = vmatmul.mubr.f32.vlgmr.msra.gmra.mrb[0].mxu1 %v115_v47  ;;  %796 = vmatprep.subr.bf16.mxu1 %v795_v49  ;;  %v135_v55 = vand.u32 4294901760, %v134_v50  ;;  %v167_v56 = vand.u32 4294901760, %v166_v52 }
  0x10   :  { %798 = vmatpush3.bf16.msra.mxu1 %v795_v49  ;;  %822 = vmatpush3.bf16.msra.mxu0 %v819_v35 }
  0x11   :  { %714 = vmatprep.mubr.f32.mxu1 %v125_v53  ;;  %756 = vmatprep.mubr.f32.mxu0 %v123_v41  ;;  %v799_v57 = vpack.c.bf16 %v167_v56, %v160_v51 }
  0x12   :  { %757 = vmatmul.mubr.f32.gmra.mrb[2].mxu0 %v133_v43  ;;  %824 = vmatprep.subr.bf16.mxu0 %v823_v54 }
  0x13   :  { %715 = vmatmul.mubr.f32.gmra.mrb[2].mxu1 %v135_v55  ;;  %800 = vmatprep.subr.bf16.mxu1 %v799_v57 }
  0x14   :  { %802 = vmatpush3.bf16.msra.mxu1 %v799_v57  ;;  %826 = vmatpush3.bf16.msra.mxu0 %v823_v54 }
  0x15   :  { %725 = vmatprep.mubr.f32.mxu1 %v898_v15  ;;  %767 = vmatprep.mubr.f32.mxu0 %v898_v15 }
  0x16   :  { %804 = vmatprep.subr.bf16.mxu1 %v803_v58  ;;  %828 = vmatprep.subr.bf16.mxu0 %v896_v14 }
  0x17   :  { %726 = vmatmul.mubr.f32.vlgmr.msra.gmra.mrb[0].mxu1 %v900_v16  ;;  %768 = vmatmul.mubr.f32.vlgmr.msra.gmra.mrb[0].mxu0 %v900_v16 }
  0x18   :  { %806 = vmatpush3.bf16.msra.mxu1 %v803_v58  ;;  %830 = vmatpush3.bf16.msra.mxu0 %v896_v14 }
  0x19   :  { %728 = vmatprep.mubr.f32.mxu1 %v914_v25  ;;  %770 = vmatprep.mubr.f32.mxu0 %v914_v25 }
  0x1a   :  { %808 = vmatprep.subr.bf16.mxu1 %v807_v59  ;;  %832 = vmatprep.subr.bf16.mxu0 %v902_v18 }
  0x1b   :  { %729 = vmatmul.mubr.f32.gmra.mrb[2].mxu1 %v918_v27  ;;  %771 = vmatmul.mubr.f32.gmra.mrb[2].mxu0 %v918_v27 }
  0x1c   :  { %810 = vmatpush3.bf16.msra.mxu1 %v807_v59  ;;  %834 = vmatpush3.bf16.msra.mxu0 %v902_v18 }
  0x1d   :  { %739 = vmatprep.mubr.f32.mxu1 %v909_v22  ;;  %781 = vmatprep.mubr.f32.mxu0 %v898_v15 }
  0x1f   :  { %740 = vmatmul.mubr.f32.vlgmr.msra.gmra.mrb[0].mxu1 %v912_v23  ;;  %782 = vmatmul.mubr.f32.vlgmr.msra.gmra.mrb[0].mxu0 %v900_v16 }
  0x20   :  { %742 = vmatprep.mubr.f32.mxu1 %v925_v33  ;;  %784 = vmatprep.mubr.f32.mxu0 %v914_v25 }
  0x23   :  { %743 = vmatmul.mubr.f32.gmra.mrb[2].mxu1 %v928_v36  ;;  %785 = vmatmul.mubr.f32.gmra.mrb[2].mxu0 %v918_v27 }
  0xf2   :  { %v741_v60 = vpop.f32.mrb[0].mxu1  ;;  %v783_v61 = vpop.f32.mrb[0].mxu0 }
  0xf3   :  { %v835_v62 = vadd.f32 %v783_v61, %v741_v60  ;;  %v326_v63 = vpop.f32.mrb[1].mxu1  ;;  %v624_v0 = vpop.f32.mrb[1].mxu0 }
  0xf4   :  { %v836_v1 = vadd.f32 %v624_v0, %v326_v63 }
  0xf5   :  { %648 = vst.msk [vmem:[%s972_s2 + $0x8] sm:$0xff] %vm646_vm1, %v835_v62 }
  0xf6   :  { %647 = vst.msk [vmem:[%s972_s2] sm:$0xff] %vm646_vm1, %v836_v1  ;;  %v744_v2 = vpop.f32.mrb[2].mxu1  ;;  %v786_v3 = vpop.f32.mrb[2].mxu0 }
  0xf7   :  { %v837_v4 = vadd.f32 %v786_v3, %v744_v2  ;;  %v340_v5 = vpop.f32.mrb[3].mxu1  ;;  %v636_v6 = vpop.f32.mrb[3].mxu0 }
  0xf8   :  { %v838_v7 = vadd.f32 %v636_v6, %v340_v5 }
  0xf9   :  { %650 = vst.msk [vmem:[%s972_s2 + $0x18] sm:$0xff] %vm646_vm1, %v837_v4 }
  0xfa   :  { %649 = vst.msk [vmem:[%s972_s2 + $0x10] sm:$0xff] %vm646_vm1, %v838_v7 }

// kernel: transformer_cross_attn_forward.15
= control target key start
LH: loop header
LB: loop body
LE: loop exit
PB: predicated region body
PF: predicated region fallthrough
CT: control target
= control target key end

     0   :  { %s4214_s21 = smov 0   ;;  %s4216_s22 = smov 0   ;;  %s4569_s0 = inlined_call_operand.vmem [shape: f32[2,8,3,2,16], index: 0, kind: input, shape index: {}, may-alias: {0,1,2}]   ;;  %s4570_s1 = inlined_call_operand.vmem [shape: f32[2,8,3,2,16], index: 1, kind: input, shape index: {}, may-alias: {0,1,2}]   ;;  %s4571_s2 = inlined_call_operand.vmem [shape: f32[2,8,3,2,16], index: 2, kind: input, shape index: {}, may-alias: {0,1,2}]   ;;  %s4572_s3 = inlined_call_operand.vmem [shape: f32[2,16,32], index: 3, kind: input, shape index: {}]   ;;  %s4573_s4 = inlined_call_operand.vmem [shape: f32[1,32], index: 4, kind: input, shape index: {}]   ;;  %s4574_s5 = inlined_call_operand.vmem [shape: f32[2,8,32], index: 5, kind: input, shape index: {}]   ;;  %s4575_s6 = inlined_call_operand.vmem [shape: f32[2,8,32], index: 6, kind: output, shape index: {}]  }
   0x1   :  { %s4218_s23 = smov 0   ;;  %s4220_s24 = smov 0  }
   0x2   :  { %s4222_s25 = smov 0  }
   0x3 LB: > { %s28_s26 = sadd.s32 1, %s4170_s24  ;;  %p44_p1 = scmp.ne.s32.totalorder %s4162_s22, %s4158_s21  ;;  %s4174_s25 = sphi %s4222_s25, %s16_s25   ;;  %s4170_s24 = sphi %s4220_s24, %s4580_s24   ;;  %s4166_s23 = sphi %s4218_s23, %s4579_s23   ;;  %s4162_s22 = sphi %s4216_s22, %s4578_s22   ;;  %s4158_s21 = sphi %s4214_s21, %s4577_s21  }
   0x4   : > { %p30_p0 = scmp.ge.s32.totalorder %s28_s26, 2  ;;  %p45_p2 = scmp.eq.s32.totalorder %s4174_s25, 0 }
   0x5   : > { %s37_s29 = sadd.s32 1, %s4162_s22  ;;  %p3663_p5 = scmp.ge.s32.totalorder %s4174_s25, 2 }
   0x6   : > { %s4582_s26 = smov (%p30_p0, %s28_s26), 0  ;;  %p4245_p3 = por %p45_p2, %p44_p1 }
   0x7   : > { %s32_s28 = ssub.s32 %s4170_s24, %s4582_s26  ;;  %226 = sbr.rel (%p3663_p5) target bundleno = 44 (0x2c), region = 24 }
   0x8   : > { %p35_p4 = scmp.eq.s32.totalorder %s32_s28, 0 }
   0xa   : > { %s4253_s30 = scalar_select %p35_p4, %s4162_s22, %s37_s29  }
   0xe   : > { %229 = sbr.rel (!%p4245_p3) target bundleno = 24 (0x18), region = 28  ;;  %s231_s7 = sand.u32 (%p4245_p3), 1, %s4162_s22  }
   0xf   : > { %s4084_s8 = smul.u32 (%p4245_p3), 48, %s4170_s24  ;;  %s3664_s9 = sshll.u32 (%p4245_p3), %s231_s7, 4 }
  0x10   : > { %s233_s13 = scalar_lea.vmem (%p4245_p3), [#allocation2], %s3664_s9 }
  0x11   : > { %s239_s12 = scalar_lea.vmem (%p4245_p3), %s4569_s0, %s4084_s8 }
  0x12   : > { %v255_v0 = vld [vmem:[%s239_s12] sm:$0x3] (%p4245_p3)  ;;  %v257_v1 = vld [vmem:[%s239_s12 + $0x6] sm:$0x3] (%p4245_p3)  ;;  %v259_v2 = vld [vmem:[%s239_s12 + $0xc] sm:$0x3] (%p4245_p3) }
  0x13   : > { %256 = vst [vmem:[%s233_s13] sm:$0x3] (%p4245_p3), %v255_v0  ;;  %258 = vst [vmem:[%s233_s13 + $0x2] sm:$0x3] (%p4245_p3), %v257_v1  ;;  %v261_v3 = vld [vmem:[%s239_s12 + $0x12] sm:$0x3] (%p4245_p3) }
  0x14   : > { %260 = vst [vmem:[%s233_s13 + $0x4] sm:$0x3] (%p4245_p3), %v259_v2  ;;  %v263_v4 = vld [vmem:[%s239_s12 + $0x18] sm:$0x3] (%p4245_p3)  ;;  %v265_v5 = vld [vmem:[%s239_s12 + $0x1e] sm:$0x3] (%p4245_p3) }
  0x15   : > { %262 = vst [vmem:[%s233_s13 + $0x6] sm:$0x3] %v261_v3  ;;  %264 = vst [vmem:[%s233_s13 + $0x8] sm:$0x3] %v263_v4  ;;  %v267_v6 = vld [vmem:[%s239_s12 + $0x24] sm:$0x3] }
  0x16   : > { %266 = vst [vmem:[%s233_s13 + $0xa] sm:$0x3] %v265_v5  ;;  %v269_v7 = vld [vmem:[%s239_s12 + $0x2a] sm:$0x3]  ;;  %268 = vst [vmem:[%s233_s13 + $0xc] sm:$0x3] %v267_v6 }
  0x17   : > { %270 = vst [vmem:[%s233_s13 + $0xe] sm:$0x3] %v269_v7 }
  0x18 PF: > { %309 = sbr.rel (!%p4245_p3) target bundleno = 34 (0x22), region = 69  ;;  %s311_s14 = sand.u32 (%p4245_p3), 1, %s4162_s22  }
  0x19   : > { %s3667_s15 = smul.u32 (%p4245_p3), 48, %s4170_s24  ;;  %s3666_s16 = sshll.u32 (%p4245_p3), %s311_s14, 4 }
  0x1a   : > { %s313_s20 = scalar_lea.vmem (%p4245_p3), [#allocation3], %s3666_s16 }
  0x1b   : > { %s3561_s19 = scalar_lea.vmem (%p4245_p3), %s4570_s1, %s3667_s15 }
  0x1c   : > { %v3668_v8 = vld [vmem:[%s3561_s19 + $0x2] sm:$0x3] (%p4245_p3)  ;;  %v3669_v9 = vld [vmem:[%s3561_s19 + $0x8] sm:$0x3] (%p4245_p3)  ;;  %v3670_v10 = vld [vmem:[%s3561_s19 + $0xe] sm:$0x3] (%p4245_p3) }
  0x1d   : > { %334 = vst [vmem:[%s313_s20] sm:$0x3] (%p4245_p3), %v3668_v8  ;;  %336 = vst [vmem:[%s313_s20 + $0x2] sm:$0x3] (%p4245_p3), %v3669_v9  ;;  %v3671_v11 = vld [vmem:[%s3561_s19 + $0x14] sm:$0x3] (%p4245_p3) }
  0x1e   : > { %338 = vst [vmem:[%s313_s20 + $0x4] sm:$0x3] (%p4245_p3), %v3670_v10  ;;  %v3672_v12 = vld [vmem:[%s3561_s19 + $0x1a] sm:$0x3] (%p4245_p3)  ;;  %v3673_v13 = vld [vmem:[%s3561_s19 + $0x20] sm:$0x3] (%p4245_p3) }
  0x1f   : > { %340 = vst [vmem:[%s313_s20 + $0x6] sm:$0x3] %v3671_v11  ;;  %342 = vst [vmem:[%s313_s20 + $0x8] sm:$0x3] %v3672_v12  ;;  %v3674_v14 = vld [vmem:[%s3561_s19 + $0x26] sm:$0x3] }
  0x20   : > { %344 = vst [vmem:[%s313_s20 + $0xa] sm:$0x3] %v3673_v13  ;;  %v3675_v15 = vld [vmem:[%s3561_s19 + $0x2c] sm:$0x3]  ;;  %346 = vst [vmem:[%s313_s20 + $0xc] sm:$0x3] %v3674_v14 }
  0x21   : > { %348 = vst [vmem:[%s313_s20 + $0xe] sm:$0x3] %v3675_v15 }
  0x22 PF: > { %387 = sbr.rel (!%p4245_p3) target bundleno = 44 (0x2c), region = 110  ;;  %s389_s28 = sand.u32 (%p4245_p3), 1, %s4162_s22  }
  0x23   : > { %s3677_s29 = smul.u32 (%p4245_p3), 48, %s4170_s24  ;;  %s3676_s7 = sshll.u32 (%p4245_p3), %s389_s28, 4 }
  0x24   : > { %s391_s11 = scalar_lea.vmem (%p4245_p3), [#allocation4], %s3676_s7 }
  0x25   : > { %s3567_s10 = scalar_lea.vmem (%p4245_p3), %s4571_s2, %s3677_s29 }
  0x26   : > { %v3678_v16 = vld [vmem:[%s3567_s10 + $0x4] sm:$0x3] (%p4245_p3)  ;;  %v3679_v17 = vld [vmem:[%s3567_s10 + $0xa] sm:$0x3] (%p4245_p3)  ;;  %v3680_v18 = vld [vmem:[%s3567_s10 + $0x10] sm:$0x3] (%p4245_p3) }
  0x27   : > { %412 = vst [vmem:[%s391_s11] sm:$0x3] (%p4245_p3), %v3678_v16  ;;  %414 = vst [vmem:[%s391_s11 + $0x2] sm:$0x3] (%p4245_p3), %v3679_v17  ;;  %v3681_v19 = vld [vmem:[%s3567_s10 + $0x16] sm:$0x3] (%p4245_p3) }
  0x28   : > { %416 = vst [vmem:[%s391_s11 + $0x4] sm:$0x3] (%p4245_p3), %v3680_v18  ;;  %v3682_v20 = vld [vmem:[%s3567_s10 + $0x1c] sm:$0x3] (%p4245_p3)  ;;  %v3683_v21 = vld [vmem:[%s3567_s10 + $0x22] sm:$0x3] (%p4245_p3) }
  0x29   : > { %418 = vst [vmem:[%s391_s11 + $0x6] sm:$0x3] %v3681_v19  ;;  %420 = vst [vmem:[%s391_s11 + $0x8] sm:$0x3] %v3682_v20  ;;  %v3684_v22 = vld [vmem:[%s3567_s10 + $0x28] sm:$0x3] }
  0x2a   : > { %422 = vst [vmem:[%s391_s11 + $0xa] sm:$0x3] %v3683_v21  ;;  %v3685_v23 = vld [vmem:[%s3567_s10 + $0x2e] sm:$0x3]  ;;  %424 = vst [vmem:[%s391_s11 + $0xc] sm:$0x3] %v3684_v22 }
  0x2b   : > { %426 = vst [vmem:[%s391_s11 + $0xe] sm:$0x3] %v3685_v23 }
  0x2c PF: > { %p3686_p6 = scmp.ge.s32.totalorder %s4174_s25, 1  ;;  %p474_p7 = scmp.lt.s32.totalorder %s4174_s25, 3 }
  0x2e   : > { %p475_p8 = pnand %p3686_p6, %p474_p7 }
  0x2f   : > { %s481_s27 = sand.u32 (!%p475_p8), 1, %s4158_s21   ;;  %v4176_v24 = vmov (!%p475_p8), 0.0   ;;  %vm606_vm0 = vcmask (!%p475_p8), 1041409   ;;  %vm609_vm1 = vcmask (!%p475_p8), 1042434   ;;  %vm612_vm2 = vcmask (!%p475_p8), 1043459   ;;  %p542_p9 = scmp.lt.s32.totalorder (!%p475_p8), %s4166_s23, 1 }
  0x30   : > { %478 = sbr.rel (%p475_p8) target bundleno = 1484 (0x5cc), region = 155  ;;  %3781 = vmatprep.subr.mxu0 (!%p475_p8), %v4176_v24  ;;  %s4281_s12 = sshll.u32 (!%p475_p8), %s481_s27, 4  ;;  %vm615_vm3 = vcmask (!%p475_p8), 1044484   ;;  %vm618_vm4 = vcmask (!%p475_p8), 1045509   ;;  %vm621_vm5 = vcmask (!%p475_p8), 1046534   ;;  %vm4177_vm6 = vmmov (!%p475_p8), 0  }
  0x31   : > { %s4284_s13 = scalar_lea.vmem (!%p475_p8), [#allocation3], %s4281_s12  ;;  %3783 = vmatprep.mubr.msk.f32.mxu0 (!%p475_p8), %vm4177_vm6, %v4176_v24  ;;  %3845 = vmatprep.mubr.msk.f32.mxu1 (!%p475_p8), %vm4177_vm6, %v4176_v24  ;;  %vm624_vm7 = vcmask (!%p475_p8), 1047559   ;;  %s4299_s21 = scalar_lea.vmem (!%p475_p8), [#allocation2], %s4281_s12  ;;  %vm648_vm8 = vcmask (!%p475_p8), 130048   ;;  %vm1099_vm9 = vcmask (!%p475_p8), 64512   ;;  %vm3523_vm10 = vcmask (!%p475_p8), 261120  }
  0x32   : > { %v581_v25 = vld [vmem:[%s4284_s13] sm:$0x1] (!%p475_p8)  ;;  %v582_v26 = vld [vmem:[%s4284_s13 + $0x2] sm:$0x1] (!%p475_p8)  ;;  %v583_v27 = vld [vmem:[%s4284_s13 + $0x4] sm:$0x1] (!%p475_p8) }
  0x33   : > { %v584_v28 = vld [vmem:[%s4284_s13 + $0x6] sm:$0x1] (!%p475_p8)  ;;  %v585_v29 = vld [vmem:[%s4284_s13 + $0x8] sm:$0x1] (!%p475_p8)  ;;  %v586_v30 = vld [vmem:[%s4284_s13 + $0xa] sm:$0x1] (!%p475_p8) }
  0x34   : > { %v587_v31 = vld [vmem:[%s4284_s13 + $0xc] sm:$0x1] (!%p475_p8)  ;;  %v588_v32 = vld [vmem:[%s4284_s13 + $0xe] sm:$0x1] (!%p475_p8)  ;;  %v634_v33 = vrot.slane (!%p475_p8), %v582_v26, 7  ;;  %v636_v34 = vrot.slane (!%p475_p8), %v583_v27, 6 }
  0x35   : > { %v638_v35 = vrot.slane (!%p475_p8), %v584_v28, 5  ;;  %v640_v36 = vrot.slane (!%p475_p8), %v585_v29, 4  ;;  %v642_v37 = vrot.slane (!%p475_p8), %v586_v30, 3  ;;  %v644_v38 = vrot.slane (!%p475_p8), %v587_v31, 2  ;;  %v565_v39 = vld [vmem:[%s4299_s21] sm:$0x1] (!%p475_p8) }
  0x36   : > { %v635_v40 = vsel (!%p475_p8), %vm606_vm0, %v634_v33, %v581_v25  ;;  %v646_v41 = vrot.slane (!%p475_p8), %v588_v32, 1  ;;  %v566_v42 = vld [vmem:[%s4299_s21 + $0x2] sm:$0x1] (!%p475_p8)  ;;  %v567_v43 = vld [vmem:[%s4299_s21 + $0x4] sm:$0x1] (!%p475_p8)  ;;  %v573_v44 = vmul.f32 (!%p475_p8), 0.25, %v565_v39 }
  0x37   : > { %v637_v45 = vsel %vm609_vm1, %v636_v34, %v635_v40  ;;  %v568_v46 = vld [vmem:[%s4299_s21 + $0x6] sm:$0x1]  ;;  %v569_v47 = vld [vmem:[%s4299_s21 + $0x8] sm:$0x1]  ;;  %v570_v48 = vld [vmem:[%s4299_s21 + $0xa] sm:$0x1] }
  0x38   : > { %v639_v49 = vsel %vm612_vm2, %v638_v35, %v637_v45  ;;  %v571_v50 = vld [vmem:[%s4299_s21 + $0xc] sm:$0x1]  ;;  %v572_v51 = vld [vmem:[%s4299_s21 + $0xe] sm:$0x1]  ;;  %v574_v52 = vmul.f32 0.25, %v566_v42  ;;  %v575_v53 = vmul.f32 0.25, %v567_v43 }
  0x39   : > { %v641_v54 = vsel %vm615_vm3, %v640_v36, %v639_v49  ;;  %v576_v55 = vmul.f32 0.25, %v568_v46  ;;  %v577_v56 = vmul.f32 0.25, %v569_v47  ;;  %v578_v57 = vmul.f32 0.25, %v570_v48  ;;  %s4345_s14 = scalar_lea.vmem [#allocation4], %s4281_s12  ;;  %s4584_s23 = smov (!%p542_p9, %s4166_s23), 1 }
  0x3a   : > { %v643_v58 = vsel %vm618_vm4, %v642_v37, %v641_v54  ;;  %v579_v59 = vmul.f32 0.25, %v571_v50  ;;  %v580_v60 = vmul.f32 0.25, %v572_v51  ;;  %v605_v61 = vrot.slane %v574_v52, 7  ;;  %v590_v29 = vld [vmem:[%s4345_s14 + $0x2] sm:$0x1]  ;;  %s3690_s7 = sshll.u32 %s4584_s23, 3 }
  0x3b   : > { %v645_v62 = vsel %vm621_vm5, %v644_v38, %v643_v58  ;;  %v608_v63 = vrot.slane %v575_v53, 6  ;;  %v611_v0 = vrot.slane %v576_v55, 5  ;;  %v614_v1 = vrot.slane %v577_v56, 4  ;;  %v591_v30 = vld [vmem:[%s4345_s14 + $0x4] sm:$0x1]  ;;  %s548_s10 = scalar_lea.vmem %s4574_s5, %s3690_s7 }
  0x3c   : > { %v647_v2 = vsel %vm624_vm7, %v646_v41, %v645_v62  ;;  %v607_v3 = vsel %vm606_vm0, %v605_v61, %v573_v44  ;;  %v617_v4 = vrot.slane %v578_v57, 3  ;;  %v620_v7 = vrot.slane %v579_v59, 2  ;;  %v589_v32 = vld [vmem:[%s4345_s14] sm:$0x1]  ;;  %v592_v33 = vld [vmem:[%s4345_s14 + $0x6] sm:$0x1] }
  0x3d   : > { %v651_v5 = vsel %vm648_vm8, %v647_v2, 0  ;;  %v610_v6 = vsel %vm609_vm1, %v608_v63, %v607_v3  ;;  %v623_v10 = vrot.slane %v580_v60, 1  ;;  %v1117_v31 = vrot.slane %v590_v29, 7  ;;  %v593_v35 = vld [vmem:[%s4345_s14 + $0x8] sm:$0x1] }
  0x3e   : > { %v654_v8 = vand.u32 4294901760, %v651_v5  ;;  %v613_v9 = vsel %vm612_vm2, %v611_v0, %v610_v6  ;;  %v1119_v34 = vrot.slane %v591_v30, 6  ;;  %v594_v36 = vld [vmem:[%s4345_s14 + $0xa] sm:$0x1]  ;;  %v595_v37 = vld [vmem:[%s4345_s14 + $0xc] sm:$0x1] }
  0x3f   : > { %v616_v11 = vsel %vm615_vm3, %v614_v1, %v613_v9  ;;  %v1118_v38 = vsel %vm606_vm0, %v1117_v31, %v589_v32  ;;  %v596_v39 = vld [vmem:[%s4345_s14 + $0xe] sm:$0x1]  ;;  %v1121_v41 = vrot.slane %v592_v33, 5  ;;  %v1123_v42 = vrot.slane %v593_v35, 4  ;;  %v2049_v60 = vld [vmem:[%s4299_s21 + $0x3] sm:$0x1] }
  0x40   : > { %3782 = vmatpush3.xpose.msra.mxu0 %v654_v8  ;;  %v731_v12 = vsub.f32 %v651_v5, %v654_v8  ;;  %v619_v13 = vsel %vm618_vm4, %v617_v4, %v616_v11  ;;  %v1120_v40 = vsel %vm609_vm1, %v1119_v34, %v1118_v38  ;;  %v1125_v43 = vrot.slane %v594_v36, 3  ;;  %v2050_v63 = vld [vmem:[%s4299_s21 + $0x5] sm:$0x1]  ;;  %v2048_v2 = vld [vmem:[%s4299_s21 + $0x1] sm:$0x1] }
  0x41   : > { %3786 = vmatprep.subr.mxu0 %v4176_v24  ;;  %v622_v14 = vsel %vm621_vm5, %v620_v7, %v619_v13  ;;  %v1127_v44 = vrot.slane %v595_v37, 2  ;;  %v1122_v45 = vsel %vm612_vm2, %v1121_v41, %v1120_v40  ;;  %v1129_v46 = vrot.slane %v596_v39, 1  ;;  %v2065_v4 = vld [vmem:[%s4284_s13 + $0x3] sm:$0x1]  ;;  %v2051_v5 = vld [vmem:[%s4299_s21 + $0x7] sm:$0x1] }
  0x42   : > { %v625_v15 = vsel %vm624_vm7, %v623_v10, %v622_v14  ;;  %v732_v17 = vand.u32 4294901760, %v731_v12  ;;  %v1124_v47 = vsel %vm615_vm3, %v1123_v42, %v1122_v45  ;;  %v2057_v0 = vmul.f32 0.25, %v2049_v60  ;;  %v2066_v11 = vld [vmem:[%s4284_s13 + $0x5] sm:$0x1]  ;;  %v2064_v14 = vld [vmem:[%s4284_s13 + $0x1] sm:$0x1] }
  0x43   : > { %v649_v16 = vsel %vm648_vm8, %v625_v15, 0  ;;  %v1126_v48 = vsel %vm618_vm4, %v1125_v43, %v1124_v47  ;;  %v2058_v6 = vmul.f32 0.25, %v2050_v63  ;;  %v2052_v15 = vld [vmem:[%s4299_s21 + $0x9] sm:$0x1]  ;;  %v2054_v30 = vld [vmem:[%s4299_s21 + $0xd] sm:$0x1] }
  0x44   : > { %v719_v18 = vand.u32 4294901760, %v649_v16  ;;  %v733_v20 = vsub.f32 %v731_v12, %v732_v17  ;;  %v1128_v49 = vsel %vm621_vm5, %v1127_v44, %v1126_v48  ;;  %v2088_v9 = vrot.slane %v2057_v0, 7  ;;  %v2069_v33 = vld [vmem:[%s4284_s13 + $0xb] sm:$0x1]  ;;  %v2055_v37 = vld [vmem:[%s4299_s21 + $0xf] sm:$0x1] }
  0x45   : > { %v1130_v50 = vsel %vm624_vm7, %v1129_v46, %v1128_v49  ;;  %v2062_v38 = vmul.f32 0.25, %v2054_v30  ;;  %v2070_v40 = vld [vmem:[%s4284_s13 + $0xd] sm:$0x1]  ;;  %v2118_v41 = vrot.slane %v2069_v33, 3  ;;  %v2063_v44 = vmul.f32 0.25, %v2055_v37 }
  0x46   : > { %v720_v19 = vsub.f32 %v649_v16, %v719_v18  ;;  %v734_v23 = vand.u32 4294901760, %v733_v20  ;;  %v4362_v51 = vand.u32 4294901760, %v1130_v50  ;;  %v2059_v16 = vmul.f32 0.25, %v2051_v5  ;;  %v2071_v46 = vld [vmem:[%s4284_s13 + $0xf] sm:$0x1] }
  0x47   : > { %v2098_v45 = vrot.slane %v2062_v38, 2  ;;  %v2120_v47 = vrot.slane %v2070_v40, 2  ;;  %v2074_v37 = vld [vmem:[%s4345_s14 + $0x5] sm:$0x1]  ;;  %v2075_v40 = vld [vmem:[%s4345_s14 + $0x7] sm:$0x1] }
  0x48   : > { %v721_v21 = vand.u32 4294901760, %v720_v19  ;;  %v4367_v55 = vsub.f32 %v1130_v50, %v4362_v51  ;;  %v2100_v50 = vrot.slane %v2063_v44, 1  ;;  %v2078_v44 = vld [vmem:[%s4345_s14 + $0xd] sm:$0x1] }
  0x4a   : > { %v722_v22 = vsub.f32 %v720_v19, %v721_v21  ;;  %v1214_v59 = vand.u32 4294901760, %v4367_v55 }
  0x4c   : > { %v723_v25 = vand.u32 4294901760, %v722_v22  ;;  %v1215_v1 = vsub.f32 %v4367_v55, %v1214_v59  ;;  %v2053_v22 = vld [vmem:[%s4299_s21 + $0xb] sm:$0x1]  ;;  %s555_s21 = scalar_lea.vmem %s4575_s6, %s3690_s7 }
  0x4d   : > { %v2061_v31 = vmul.f32 0.25, %v2053_v22 }
  0x4e   : > { %3784 = vmatmul.mubr.f32.vlgmr.msra.gmra.mrb[0].mxu0 %v723_v25  ;;  %v1216_v10 = vand.u32 4294901760, %v1215_v1  ;;  %v2092_v25 = vrot.slane %v2059_v16, 5 }
  0x4f   : > { %3787 = vmatpush3.xpose.msra.mxu0 %v734_v23  ;;  %3788 = vmatprep.mubr.msk.f32.mxu0 %vm4177_vm6, %v4176_v24  ;;  %v2060_v23 = vmul.f32 0.25, %v2052_v15  ;;  %v2096_v39 = vrot.slane %v2061_v31, 3 }
  0x50   : > { %3791 = vmatprep.subr.mxu0 %v4176_v24 }
  0x51   : > { %v2094_v32 = vrot.slane %v2060_v23, 4 }
  0x56   : > { %3789 = vmatmul.mubr.f32.vlgmr.msra.gmra.mrb[0].mxu0 %v719_v18 }
  0x57   : > { %3792 = vmatpush3.xpose.msra.mxu0 %v731_v12  ;;  %3793 = vmatprep.mubr.msk.f32.mxu0 %vm4177_vm6, %v4176_v24  ;;  %v2110_v12 = vrot.slane %v2065_v4, 7 }
  0x58   : > { %3796 = vmatprep.subr.mxu0 %v4176_v24 }
  0x5e   : > { %3794 = vmatmul.mubr.f32.vlgmr.msra.gmra.mrb[0].mxu0 %v720_v19  ;;  %v2112_v19 = vrot.slane %v2066_v11, 6 }
  0x5f   : > { %3797 = vmatpush3.xpose.msra.mxu0 %v654_v8  ;;  %3798 = vmatprep.mubr.msk.f32.mxu0 %vm4177_vm6, %v4176_v24 }
  0x60   : > { %3801 = vmatprep.subr.mxu0 %v4176_v24 }
  0x66   : > { %3799 = vmatmul.mubr.f32.vlgmr.msra.gmra.mrb[0].mxu0 %v721_v21  ;;  %v2111_v21 = vsel %vm606_vm0, %v2110_v12, %v2064_v14 }
  0x67   : > { %3802 = vmatpush3.xpose.msra.mxu0 %v732_v17  ;;  %3803 = vmatprep.mubr.msk.f32.mxu0 %vm4177_vm6, %v4176_v24  ;;  %v2090_v17 = vrot.slane %v2058_v6, 6  ;;  %v2113_v29 = vsel %vm609_vm1, %v2112_v19, %v2111_v21  ;;  %v4178_v6 = vmov 0.0|0.0  }
  0x68   : > { %3806 = vmatprep.subr.mxu0 %v4176_v24  ;;  %3985 = vmatprep.subr.bf16.mxu1 %v4178_v6 }
  0x6e   : > { %3804 = vmatmul.mubr.f32.vlgmr.msra.gmra.mrb[0].mxu0 %v719_v18 }
  0x6f   : > { %3807 = vmatpush3.xpose.msra.mxu0 %v654_v8  ;;  %3808 = vmatprep.mubr.msk.f32.mxu0 %vm4177_vm6, %v4176_v24  ;;  %v2056_v8 = vmul.f32 0.25, %v2048_v2 }
  0x70   : > { %3811 = vmatprep.subr.mxu0 %v4176_v24 }
  0x71   : > { %v2089_v20 = vsel %vm606_vm0, %v2088_v9, %v2056_v8 }
  0x76   : > { %3809 = vmatmul.mubr.f32.vlgmr.msra.gmra.mrb[0].mxu0 %v719_v18  ;;  %v2067_v18 = vld [vmem:[%s4284_s13 + $0x7] sm:$0x1] }
  0x77   : > { %3813 = vmatprep.mubr.msk.f32.mxu0 %vm4177_vm6, %v4176_v24  ;;  %3812 = vmatpush3.msra.mxu0 %v4362_v51 }
  0x78   : > { %3816 = vmatprep.subr.mxu0 %v4176_v24 }
 0x149   : > { %v1095_v26 = vpop.f32.mrb[0].mxu0 }
 0x14a   : > { %v3810_v27 = vpop.f32.mrb[1].mxu0  ;;  %v1100_v28 = vsel %vm1099_vm9, %v1095_v26, -inf }
 0x14b   : > { %1101 = vmax.xlane.f32.xlu0 %v1100_v28  ;;  %v2114_v27 = vrot.slane %v2067_v18, 5  ;;  %v2091_v28 = vsel %vm609_vm1, %v2090_v17, %v2089_v20 }
 0x14c   : > { %v2093_v35 = vsel %vm612_vm2, %v2092_v25, %v2091_v28 }
 0x14d   : > { %v2115_v36 = vsel %vm612_vm2, %v2114_v27, %v2113_v29  ;;  %v2095_v42 = vsel %vm615_vm3, %v2094_v32, %v2093_v35 }
 0x14e   : > { %v2097_v48 = vsel %vm618_vm4, %v2096_v39, %v2095_v42  ;;  %v2072_v39 = vld [vmem:[%s4345_s14 + $0x1] sm:$0x1]  ;;  %v2076_v42 = vld [vmem:[%s4345_s14 + $0x9] sm:$0x1] }
 0x1d8   : > { %v1102_v52 = vpop.xlane.xlu0 %1101 }
 0x1d9   : > { %v1103_v53 = vsub.f32 %v1095_v26, %v1102_v52  ;;  %v2068_v26 = vld [vmem:[%s4284_s13 + $0x9] sm:$0x1]  ;;  %v2122_v52 = vrot.slane %v2071_v46, 1  ;;  %v2079_v46 = vld [vmem:[%s4345_s14 + $0xf] sm:$0x1] }
 0x1da   : > { %v2116_v34 = vrot.slane %v2068_v26, 4 }
 0x1db   : > { %v1104_v54 = vmul.f32 1.442695, %v1103_v53  ;;  %v2099_v53 = vsel %vm621_vm5, %v2098_v45, %v2097_v48  ;;  %v2595_v48 = vrot.slane %v2075_v40, 5  ;;  %v557_v40 = vld [vmem:[%s548_s10] sm:$0xff] }
 0x1dc   : > { %v2117_v43 = vsel %vm615_vm3, %v2116_v34, %v2115_v36  ;;  %v2073_v36 = vld [vmem:[%s4345_s14 + $0x3] sm:$0x1] }
 0x1dd   : > { %4128 = vpow2.f32 %v1104_v54  ;;  %v2119_v49 = vsel %vm618_vm4, %v2118_v41, %v2117_v43  ;;  %v2591_v38 = vrot.slane %v2073_v36, 7  ;;  %v2593_v41 = vrot.slane %v2074_v37, 6  ;;  %v2077_v43 = vld [vmem:[%s4345_s14 + $0xb] sm:$0x1] }
 0x1de   : > { %v2121_v54 = vsel %vm621_vm5, %v2120_v47, %v2119_v49  ;;  %v2597_v49 = vrot.slane %v2076_v42, 4 }
 0x1df   : > { %v2592_v45 = vsel %vm606_vm0, %v2591_v38, %v2072_v39  ;;  %v3692_v39 = vld [vmem:[%s4573_s4] ss:$0 sm:$0xff] }
 0x1e0   : > { %v2594_v47 = vsel %vm609_vm1, %v2593_v41, %v2592_v45  ;;  %v564_v41 = vadd.f32 %v3692_v39, %v557_v40 }
 0x1e7   : > { %v4129_v56 = vpop.eup %4128 }
 0x1e8   : > { %v1133_v57 = vsel %vm1099_vm9, %v4129_v56, 0  ;;  %v1106_v58 = vsel %vm1099_vm9, %v4129_v56, 0.0  ;;  %v2101_v56 = vsel %vm624_vm7, %v2100_v50, %v2099_v53  ;;  %v2599_v50 = vrot.slane %v2077_v43, 3 }
 0x1e9   : > { %v4373_v61 = vand.u32 4294901760, %v1133_v57  ;;  %1107 = vadd.xlane.f32.xlu0 %v1106_v58  ;;  %v2124_v58 = vsel %vm648_vm8, %v2101_v56, 0  ;;  %v2596_v53 = vsel %vm612_vm2, %v2595_v48, %v2594_v47 }
 0x1ea   : > { %v2194_v63 = vand.u32 4294901760, %v2124_v58  ;;  %v2598_v56 = vsel %vm615_vm3, %v2597_v49, %v2596_v53 }
 0x1eb   : > { %v4376_v62 = vsub.f32 %v1133_v57, %v4373_v61  ;;  %v2123_v57 = vsel %vm624_vm7, %v2122_v52, %v2121_v54  ;;  %v2601_v52 = vrot.slane %v2078_v44, 2  ;;  %v2603_v54 = vrot.slane %v2079_v46, 1 }
 0x1ec   : > { %v2126_v60 = vsel %vm648_vm8, %v2123_v57, 0  ;;  %v2195_v1 = vsub.f32 %v2124_v58, %v2194_v63  ;;  %v2600_v57 = vsel %vm618_vm4, %v2599_v50, %v2598_v56 }
 0x1ed   : > { %v1203_v3 = vand.u32 4294901760, %v4376_v62  ;;  %v2129_v0 = vand.u32 4294901760, %v2126_v60  ;;  %v2602_v58 = vsel %vm621_vm5, %v2601_v52, %v2600_v57 }
 0x1ee   : > { %v2196_v4 = vand.u32 4294901760, %v2195_v1 }
 0x1ef   : > { %v1204_v7 = vsub.f32 %v4376_v62, %v1203_v3  ;;  %v2206_v2 = vsub.f32 %v2126_v60, %v2129_v0  ;;  %v2604_v60 = vsel %vm624_vm7, %v2603_v54, %v2602_v58 }
 0x1f1   : > { %v1205_v13 = vand.u32 4294901760, %v1204_v7 }
 0x1f3   : > { %3814 = vmatmul.mubr.f32.vlgmr.msra.gmra.mrb[2].mxu0 %v1205_v13 }
 0x1f4   : > { %3817 = vmatpush3.msra.mxu0 %v1216_v10  ;;  %3818 = vmatprep.mubr.msk.f32.mxu0 %vm4177_vm6, %v4176_v24 }
 0x1f5   : > { %3821 = vmatprep.subr.mxu0 %v4176_v24 }
 0x1fb   : > { %3819 = vmatmul.mubr.f32.vlgmr.msra.gmra.mrb[2].mxu0 %v4373_v61 }
 0x1fc   : > { %3822 = vmatpush3.msra.mxu0 %v4367_v55  ;;  %3823 = vmatprep.mubr.msk.f32.mxu0 %vm4177_vm6, %v4176_v24  ;;  %v2197_v55 = vsub.f32 %v2195_v1, %v2196_v4 }
 0x1fd   : > { %3826 = vmatprep.subr.mxu0 %v4176_v24 }
 0x203   : > { %3824 = vmatmul.mubr.f32.vlgmr.msra.gmra.mrb[2].mxu0 %v4376_v62  ;;  %v2207_v62 = vand.u32 4294901760, %v2206_v2 }
 0x204   : > { %3827 = vmatpush3.msra.mxu0 %v4362_v51  ;;  %3828 = vmatprep.mubr.msk.f32.mxu0 %vm4177_vm6, %v4176_v24 }
 0x205   : > { %3831 = vmatprep.subr.mxu0 %v4176_v24 }
 0x20b   : > { %3829 = vmatmul.mubr.f32.vlgmr.msra.gmra.mrb[2].mxu0 %v1203_v3  ;;  %v2198_v3 = vand.u32 4294901760, %v2197_v55 }
 0x20c   : > { %3832 = vmatpush3.msra.mxu0 %v1214_v59  ;;  %3833 = vmatprep.mubr.msk.f32.mxu0 %vm4177_vm6, %v4176_v24  ;;  %v2208_v59 = vsub.f32 %v2206_v2, %v2207_v62 }
 0x20d   : > { %3836 = vmatprep.subr.mxu0 %v4176_v24 }
 0x20e   : > { %v2209_v5 = vand.u32 4294901760, %v2208_v59 }
 0x213   : > { %3834 = vmatmul.mubr.f32.vlgmr.msra.gmra.mrb[2].mxu0 %v4373_v61 }
 0x214   : > { %3837 = vmatpush3.msra.mxu0 %v4362_v51  ;;  %3838 = vmatprep.mubr.msk.f32.mxu0 %vm4177_vm6, %v4176_v24  ;;  %v1583_v51 = vld [vmem:[%s4572_s3] sm:$0xff] }
 0x215   : > { %3883 = vmatprep.subr.mxu0 %v4176_v24  ;;  %v1589_v7 = vand.u32 4294901760, %v1583_v51 }
 0x217   : > { %v1667_v10 = vsub.f32 %v1583_v51, %v1589_v7 }
 0x219   : > { %v1668_v12 = vand.u32 4294901760, %v1667_v10 }
 0x21b   : > { %3839 = vmatmul.mubr.f32.vlgmr.msra.gmra.mrb[2].mxu0 %v4373_v61  ;;  %v1584_v61 = vld [vmem:[%s4572_s3 + $0x8] sm:$0xff]  ;;  %v1669_v14 = vsub.f32 %v1667_v10, %v1668_v12 }
 0x21c   : > { %3884 = vmatpush3.xpose.msra.mxu0 %v2129_v0  ;;  %3885 = vmatprep.mubr.msk.f32.mxu0 %vm4177_vm6, %v4176_v24  ;;  %v1592_v8 = vand.u32 4294901760, %v1584_v61 }
 0x21d   : > { %3888 = vmatprep.subr.mxu0 %v4176_v24  ;;  %v1670_v16 = vand.u32 4294901760, %v1669_v14 }
 0x21e   : > { %v3986_v9 = vpack.c.bf16 %v1592_v8, %v1589_v7  ;;  %v1674_v11 = vsub.f32 %v1584_v61, %v1592_v8 }
 0x21f   : > { %3886 = vmatmul.mubr.f32.vlgmr.msra.gmra.mrb[4].mxu0 %v2198_v3 }
 0x220   : > { %3889 = vmatpush3.xpose.msra.mxu0 %v2209_v5  ;;  %3890 = vmatprep.mubr.msk.f32.mxu0 %vm4177_vm6, %v4176_v24  ;;  %v1675_v13 = vand.u32 4294901760, %v1674_v11  ;;  %v3992_v19 = vpack.c.bf16 %v1674_v11, %v1667_v10 }
 0x221   : > { %3893 = vmatprep.subr.mxu0 %v4176_v24  ;;  %3987 = vmatpush3.bf16.msra.mxu1 %v3986_v9 }
 0x222   : > { %3988 = vmatprep.subr.bf16.mxu1 %v4178_v6  ;;  %v1676_v15 = vsub.f32 %v1674_v11, %v1675_v13  ;;  %v3998_v20 = vpack.c.bf16 %v1675_v13, %v1668_v12  ;;  %v3693_v11 = vld [vmem:[%s4572_s3 + $0x10] sm:$0xff]  ;;  %v3694_v12 = vld [vmem:[%s4572_s3 + $0x18] sm:$0xff] }
 0x223   : > { %v3064_v13 = vand.u32 4294901760, %v3693_v11  ;;  %v3067_v14 = vand.u32 4294901760, %v3694_v12 }
 0x224   : > { %v1677_v17 = vand.u32 4294901760, %v1676_v15 }
 0x225   : > { %v4004_v15 = vpack.c.bf16 %v3067_v14, %v3064_v13 }
 0x226   : > { %v3989_v18 = vpack.c.bf16 %v1677_v17, %v1670_v16  ;;  %v3142_v16 = vsub.f32 %v3693_v11, %v3064_v13  ;;  %v3149_v17 = vsub.f32 %v3694_v12, %v3067_v14 }
 0x227   : > { %3891 = vmatmul.mubr.f32.vlgmr.msra.gmra.mrb[4].mxu0 %v2194_v63 }
 0x228   : > { %3894 = vmatpush3.xpose.msra.mxu0 %v2206_v2  ;;  %3895 = vmatprep.mubr.msk.f32.mxu0 %vm4177_vm6, %v4176_v24 }
 0x229   : > { %3898 = vmatprep.subr.mxu0 %v4176_v24 }
 0x22f   : > { %3896 = vmatmul.mubr.f32.vlgmr.msra.gmra.mrb[4].mxu0 %v2195_v1 }
 0x230   : > { %3899 = vmatpush3.xpose.msra.mxu0 %v2129_v0  ;;  %3900 = vmatprep.mubr.msk.f32.mxu0 %vm4177_vm6, %v4176_v24 }
 0x231   : > { %3903 = vmatprep.subr.mxu0 %v4176_v24 }
 0x237   : > { %3901 = vmatmul.mubr.f32.vlgmr.msra.gmra.mrb[4].mxu0 %v2196_v4 }
 0x238   : > { %3904 = vmatpush3.xpose.msra.mxu0 %v2207_v62  ;;  %3905 = vmatprep.mubr.msk.f32.mxu0 %vm4177_vm6, %v4176_v24 }
 0x239   : > { %3908 = vmatprep.subr.mxu0 %v4176_v24 }
 0x23f   : > { %3906 = vmatmul.mubr.f32.vlgmr.msra.gmra.mrb[4].mxu0 %v2194_v63 }
 0x240   : > { %3909 = vmatpush3.xpose.msra.mxu0 %v2129_v0  ;;  %3910 = vmatprep.mubr.msk.f32.mxu0 %vm4177_vm6, %v4176_v24 }
 0x247   : > { %3911 = vmatmul.mubr.f32.vlgmr.msra.gmra.mrb[4].mxu0 %v2194_v63  ;;  %v2610_v63 = vand.u32 4294901760, %v2604_v60 }
 0x249   : > { %v2687_v4 = vsub.f32 %v2604_v60, %v2610_v63 }
 0x24b   : > { %v2688_v3 = vand.u32 4294901760, %v2687_v4 }
 0x24d   : > { %v2689_v61 = vsub.f32 %v2687_v4, %v2688_v3 }
 0x276   : > { %v1108_v21 = vpop.xlane.xlu0 %1107 }
 0x277   : > { %4130 = vrcp.f32 %v1108_v21 }
 0x281   : > { %v4131_v22 = vpop.eup %4130 }
 0x2ee   : > { %v1577_v23 = vpop.f32.mrb[2].mxu0 }
 0x2ef   : > { %v1582_v25 = vmul.f32 %v4131_v22, %v1577_v23  ;;  %v3840_v26 = vpop.f32.mrb[3].mxu0 }
 0x2f0   : > { %v4010_v26 = vpack.c.bf16 %v3149_v17, %v3142_v16 }
 0x2f1   : > { %v1586_v27 = vsel %vm648_vm8, %v1582_v25, 0 }
 0x2f2   : > { %v1655_v28 = vand.u32 4294901760, %v1586_v27 }
 0x2f4   : > { %v1656_v29 = vsub.f32 %v1586_v27, %v1655_v28 }
 0x2f6   : > { %v1657_v30 = vand.u32 4294901760, %v1656_v29 }
 0x2f8   : > { %v1658_v31 = vsub.f32 %v1656_v29, %v1657_v30 }
 0x2fa   : > { %v1659_v32 = vand.u32 4294901760, %v1658_v31 }
 0x2fc   : > { %3846 = vmatmul.mubr.f32.vlgmr.msra.gmra.mrb[0].mxu1 %v1659_v32 }
 0x2fd   : > { %3990 = vmatpush3.bf16.msra.mxu1 %v3989_v18  ;;  %3852 = vmatprep.mubr.msk.f32.mxu1 %vm4177_vm6, %v4176_v24  ;;  %v3143_v18 = vand.u32 4294901760, %v3142_v16 }
 0x2fe   : > { %3991 = vmatprep.subr.bf16.mxu1 %v4178_v6 }
 0x304   : > { %3853 = vmatmul.mubr.f32.vlgmr.msra.gmra.mrb[0].mxu1 %v1655_v28 }
 0x305   : > { %3993 = vmatpush3.bf16.msra.mxu1 %v3992_v19  ;;  %3859 = vmatprep.mubr.msk.f32.mxu1 %vm4177_vm6, %v4176_v24  ;;  %v3150_v19 = vand.u32 4294901760, %v3149_v17 }
 0x306   : > { %3994 = vmatprep.subr.bf16.mxu1 %v4178_v6 }
 0x307   : > { %v3151_v21 = vsub.f32 %v3149_v17, %v3150_v19  ;;  %v4016_v27 = vpack.c.bf16 %v3150_v19, %v3143_v18 }
 0x309   : > { %v3152_v23 = vand.u32 4294901760, %v3151_v21 }
 0x30c   : > { %3860 = vmatmul.mubr.f32.vlgmr.msra.gmra.mrb[0].mxu1 %v1656_v29 }
 0x30d   : > { %3996 = vmatpush3.bf16.msra.mxu1 %v3986_v9  ;;  %3866 = vmatprep.mubr.msk.f32.mxu1 %vm4177_vm6, %v4176_v24 }
 0x30e   : > { %3997 = vmatprep.subr.bf16.mxu1 %v4178_v6 }
 0x314   : > { %3867 = vmatmul.mubr.f32.vlgmr.msra.gmra.mrb[0].mxu1 %v1657_v30 }
 0x315   : > { %3999 = vmatpush3.bf16.msra.mxu1 %v3998_v20  ;;  %3873 = vmatprep.mubr.msk.f32.mxu1 %vm4177_vm6, %v4176_v24  ;;  %v3144_v20 = vsub.f32 %v3142_v16, %v3143_v18 }
 0x316   : > { %4000 = vmatprep.subr.bf16.mxu1 %v4178_v6 }
 0x317   : > { %v3145_v22 = vand.u32 4294901760, %v3144_v20 }
 0x319   : > { %v4007_v25 = vpack.c.bf16 %v3152_v23, %v3145_v22 }
 0x31a   : > { %v2570_v33 = vpop.f32.mrb[4].mxu0 }
 0x31b   : > { %v3912_v34 = vpop.f32.mrb[5].mxu0  ;;  %v2574_v35 = vsel %vm1099_vm9, %v2570_v33, -inf }
 0x31c   : > { %3874 = vmatmul.mubr.f32.vlgmr.msra.gmra.mrb[0].mxu1 %v1655_v28  ;;  %2575 = vmax.xlane.f32.xlu1 %v2574_v35 }
 0x31d   : > { %4002 = vmatpush3.bf16.msra.mxu1 %v3986_v9  ;;  %3880 = vmatprep.mubr.msk.f32.mxu1 %vm4177_vm6, %v4176_v24  ;;  %v2690_v9 = vand.u32 4294901760, %v2689_v61 }
 0x31e   : > { %3913 = vmatprep.subr.mxu1 %v4176_v24 }
 0x324   : > { %3881 = vmatmul.mubr.f32.vlgmr.msra.gmra.mrb[0].mxu1 %v1655_v28 }
 0x325   : > { %3915 = vmatprep.mubr.msk.f32.mxu1 %vm4177_vm6, %v4176_v24  ;;  %3914 = vmatpush3.msra.mxu1 %v2610_v63 }
 0x326   : > { %3918 = vmatprep.subr.mxu1 %v4176_v24 }
 0x3a9   : > { %v2576_v0 = vpop.xlane.xlu1 %2575 }
 0x3aa   : > { %v2577_v1 = vsub.f32 %v2570_v33, %v2576_v0 }
 0x3ac   : > { %v2578_v2 = vmul.f32 1.442695, %v2577_v1 }
 0x3ae   : > { %4132 = vpow2.f32 %v2578_v2 }
 0x3b8   : > { %v4133_v62 = vpop.eup %4132 }
 0x3b9   : > { %v2607_v55 = vsel %vm1099_vm9, %v4133_v62, 0  ;;  %v2580_v59 = vsel %vm1099_vm9, %v4133_v62, 0.0 }
 0x3ba   : > { %v2675_v5 = vand.u32 4294901760, %v2607_v55  ;;  %2581 = vadd.xlane.f32.xlu1 %v2580_v59 }
 0x3bc   : > { %v2676_v51 = vsub.f32 %v2607_v55, %v2675_v5 }
 0x3be   : > { %v2677_v7 = vand.u32 4294901760, %v2676_v51 }
 0x3c0   : > { %v2678_v8 = vsub.f32 %v2676_v51, %v2677_v7 }
 0x3c2   : > { %v2679_v10 = vand.u32 4294901760, %v2678_v8 }
 0x3c4   : > { %3916 = vmatmul.mubr.f32.vlgmr.msra.gmra.mrb[2].mxu1 %v2679_v10 }
 0x3c5   : > { %3919 = vmatpush3.msra.mxu1 %v2690_v9  ;;  %3920 = vmatprep.mubr.msk.f32.mxu1 %vm4177_vm6, %v4176_v24 }
 0x3c6   : > { %3923 = vmatprep.subr.mxu1 %v4176_v24 }
 0x3cc   : > { %3921 = vmatmul.mubr.f32.vlgmr.msra.gmra.mrb[2].mxu1 %v2675_v5 }
 0x3cd   : > { %3924 = vmatpush3.msra.mxu1 %v2687_v4  ;;  %3925 = vmatprep.mubr.msk.f32.mxu1 %vm4177_vm6, %v4176_v24 }
 0x3ce   : > { %3928 = vmatprep.subr.mxu1 %v4176_v24 }
 0x3d4   : > { %3926 = vmatmul.mubr.f32.vlgmr.msra.gmra.mrb[2].mxu1 %v2676_v51 }
 0x3d5   : > { %3929 = vmatpush3.msra.mxu1 %v2610_v63  ;;  %3930 = vmatprep.mubr.msk.f32.mxu1 %vm4177_vm6, %v4176_v24 }
 0x3d6   : > { %3933 = vmatprep.subr.mxu1 %v4176_v24 }
 0x3dc   : > { %3931 = vmatmul.mubr.f32.vlgmr.msra.gmra.mrb[2].mxu1 %v2677_v7 }
 0x3dd   : > { %3934 = vmatpush3.msra.mxu1 %v2688_v3  ;;  %3935 = vmatprep.mubr.msk.f32.mxu1 %vm4177_vm6, %v4176_v24 }
 0x3de   : > { %3938 = vmatprep.subr.mxu1 %v4176_v24 }
 0x3e4   : > { %3936 = vmatmul.mubr.f32.vlgmr.msra.gmra.mrb[2].mxu1 %v2675_v5 }
 0x3e5   : > { %3939 = vmatpush3.msra.mxu1 %v2610_v63  ;;  %3940 = vmatprep.mubr.msk.f32.mxu1 %vm4177_vm6, %v4176_v24 }
 0x3e6   : > { %4003 = vmatprep.subr.bf16.mxu1 %v4178_v6 }
 0x3ec   : > { %3941 = vmatmul.mubr.f32.vlgmr.msra.gmra.mrb[2].mxu1 %v2675_v5 }
 0x3ed   : > { %3947 = vmatprep.mubr.msk.f32.mxu1 %vm4177_vm6, %v4176_v24  ;;  %4005 = vmatpush3.bf16.msra.mxu1 %v4004_v15 }
 0x3ee   : > { %4006 = vmatprep.subr.bf16.mxu1 %v4178_v6 }
 0x447   : > { %v2582_v28 = vpop.xlane.xlu1 %2581 }
 0x448   : > { %4134 = vrcp.f32 %v2582_v28 }
 0x452   : > { %v4135_v29 = vpop.eup %4134 }
 0x4bf   : > { %v3051_v30 = vpop.f32.mrb[2].mxu1 }
 0x4c0   : > { %v3056_v31 = vmul.f32 %v4135_v29, %v3051_v30  ;;  %v3942_v32 = vpop.f32.mrb[3].mxu1 }
 0x4c2   : > { %v3061_v33 = vsel %vm648_vm8, %v3056_v31, 0 }
 0x4c3   : > { %v3130_v34 = vand.u32 4294901760, %v3061_v33 }
 0x4c5   : > { %v3131_v35 = vsub.f32 %v3061_v33, %v3130_v34 }
 0x4c7   : > { %v3132_v36 = vand.u32 4294901760, %v3131_v35 }
 0x4c9   : > { %v3133_v37 = vsub.f32 %v3131_v35, %v3132_v36 }
 0x4cb   : > { %v3134_v38 = vand.u32 4294901760, %v3133_v37 }
 0x4cd   : > { %3948 = vmatmul.mubr.f32.vlgmr.msra.gmra.mrb[0].mxu1 %v3134_v38 }
 0x4ce   : > { %4008 = vmatpush3.bf16.msra.mxu1 %v4007_v25  ;;  %3954 = vmatprep.mubr.msk.f32.mxu1 %vm4177_vm6, %v4176_v24 }
 0x4cf   : > { %4009 = vmatprep.subr.bf16.mxu1 %v4178_v6 }
 0x4d5   : > { %3955 = vmatmul.mubr.f32.vlgmr.msra.gmra.mrb[0].mxu1 %v3130_v34 }
 0x4d6   : > { %4011 = vmatpush3.bf16.msra.mxu1 %v4010_v26  ;;  %3961 = vmatprep.mubr.msk.f32.mxu1 %vm4177_vm6, %v4176_v24 }
 0x4d7   : > { %4012 = vmatprep.subr.bf16.mxu1 %v4178_v6 }
 0x4dd   : > { %3962 = vmatmul.mubr.f32.vlgmr.msra.gmra.mrb[0].mxu1 %v3131_v35 }
 0x4de   : > { %4014 = vmatpush3.bf16.msra.mxu1 %v4004_v15  ;;  %3968 = vmatprep.mubr.msk.f32.mxu1 %vm4177_vm6, %v4176_v24 }
 0x4df   : > { %4015 = vmatprep.subr.bf16.mxu1 %v4178_v6 }
 0x4e5   : > { %3969 = vmatmul.mubr.f32.vlgmr.msra.gmra.mrb[0].mxu1 %v3132_v36 }
 0x4e6   : > { %4017 = vmatpush3.bf16.msra.mxu1 %v4016_v27  ;;  %3975 = vmatprep.mubr.msk.f32.mxu1 %vm4177_vm6, %v4176_v24 }
 0x4e7   : > { %4018 = vmatprep.subr.bf16.mxu1 %v4178_v6 }
 0x4ed   : > { %3976 = vmatmul.mubr.f32.vlgmr.msra.gmra.mrb[0].mxu1 %v3130_v34 }
 0x4ee   : > { %4020 = vmatpush3.bf16.msra.mxu1 %v4004_v15  ;;  %3982 = vmatprep.mubr.msk.f32.mxu1 %vm4177_vm6, %v4176_v24 }
 0x4f5   : > { %3983 = vmatmul.mubr.f32.vlgmr.msra.gmra.mrb[0].mxu1 %v3130_v34 }
 0x5c8   : > { %v3518_v6 = vpop.f32.mrb[0].mxu1 }
 0x5c9   : > { %v4021_v24 = vadd.f32 %v3518_v6, %v564_v41  ;;  %v3984_v42 = vpop.f32.mrb[1].mxu1 }
 0x5cb   : > { %3524 = vst.msk [vmem:[%s555_s21] sm:$0xff] %vm3523_vm10, %v4021_v24 }
 0x5cc PF: > { %s16_s25 = sadd.s32 1, %s4174_s25   ;;  %s4577_s21 = smov %s4162_s22 }
 0x5cd   : > { %p13_p10 = scmp.ge.s32.totalorder %s16_s25, 4   ;;  %s4578_s22 = smov %s4253_s30 }
 0x5ce   : > { %s4579_s23 = smov %s4170_s24  ;;  %s4580_s24 = smov %s4582_s26 }
 0x5cf   :  { %15 = sbr.rel (!%p13_p10) target bundleno = 3 (0x3), region = 222 }

// kernel: transformer_cross_attn_forward.19
= control target key start
LH: loop header
LB: loop body
LE: loop exit
PB: predicated region body
PF: predicated region fallthrough
CT: control target
= control target key end

     0   :  { %vm22_vm0 = vcmask 261120   ;;  %vm634_vm1 = vcmask 523264   ;;  %s919_s0 = inlined_call_operand.vmem [shape: f32[16,32], index: 0, kind: input, shape index: {}]   ;;  %s920_s3 = inlined_call_operand.vmem [shape: f32[32,64], index: 3, kind: input, shape index: {}]   ;;  %s921_s1 = inlined_call_operand.vmem [shape: f32[1,32], index: 1, kind: input, shape index: {}]   ;;  %s922_s2 = inlined_call_operand.vmem [shape: f32[1,32], index: 2, kind: input, shape index: {}]   ;;  %s923_s4 = inlined_call_operand.vmem [shape: f32[1,64], index: 4, kind: input, shape index: {}]   ;;  %s924_s5 = inlined_call_operand.vmem [shape: f32[16,64], index: 5, kind: output, shape index: {}]  }
   0x1   :  { %v847_v0 = vld [vmem:[%s919_s0] sm:$0xff]  ;;  %v852_v1 = vld [vmem:[%s919_s0 + $0x8] sm:$0xff]  ;;  %v73_v10 = vld [vmem:[%s920_s3 + $0x10] sm:$0xff] }
   0x2   :  { %v23_v2 = vsel %vm22_vm0, %v847_v0, 0.0  ;;  %v29_v3 = vmul.f32 %v847_v0, %v847_v0  ;;  %v30_v4 = vmul.f32 %v852_v1, %v852_v1  ;;  %v26_v6 = vsel %vm22_vm0, %v852_v1, 0.0  ;;  %v71_v8 = vld [vmem:[%s920_s3] sm:$0xff]  ;;  %v72_v9 = vld [vmem:[%s920_s3 + $0x8] sm:$0xff]  ;;  %v74_v13 = vld [vmem:[%s920_s3 + $0x18] sm:$0xff] }
   0x3   :  { %24 = vadd.xlane.f32.xlu0 %v23_v2  ;;  %v89_v11 = vand.u32 4294901760, %v71_v8  ;;  %v92_v12 = vand.u32 4294901760, %v72_v9  ;;  %v95_v14 = vand.u32 4294901760, %v73_v10  ;;  %v98_v15 = vand.u32 4294901760, %v74_v13  ;;  %v641_v56 = vld [vmem:[%s921_s1] ss:$0 sm:$0xff] }
   0x4   :  { %v31_v5 = vsel %vm22_vm0, %v29_v3, 0.0  ;;  %v34_v7 = vsel %vm22_vm0, %v30_v4, 0.0  ;;  %v642_v58 = vld [vmem:[%s922_s2] ss:$0 sm:$0xff] }
   0x5   :  { %32 = vadd.xlane.f32.xlu1 %v31_v5  ;;  %v876_v16 = vpack.c.bf16 %v92_v12, %v89_v11  ;;  %v878_v17 = vpack.c.bf16 %v98_v15, %v95_v14  ;;  %v179_v18 = vsub.f32 %v71_v8, %v89_v11  ;;  %v186_v19 = vsub.f32 %v72_v9, %v92_v12 }
   0x6   :  { %v193_v25 = vsub.f32 %v73_v10, %v95_v14  ;;  %v200_v26 = vsub.f32 %v74_v13, %v98_v15 }
   0x7   :  { %27 = vadd.xlane.f32.xlu0 %v26_v6  ;;  %771 = vmatprep.subr.bf16.mxu0 %v876_v16  ;;  %v180_v20 = vand.u32 4294901760, %v179_v18  ;;  %v187_v21 = vand.u32 4294901760, %v186_v19  ;;  %v762_v38 = vpack.c.bf16 %v186_v19, %v179_v18 }
   0x8   :  { %747 = vmatprep.subr.bf16.mxu1 %v876_v16  ;;  %773 = vmatpush3.bf16.msra.mxu0 %v876_v16  ;;  %v194_v29 = vand.u32 4294901760, %v193_v25  ;;  %v201_v30 = vand.u32 4294901760, %v200_v26  ;;  %v891_v39 = vpack.c.bf16 %v200_v26, %v193_v25 }
   0x9   :  { %35 = vadd.xlane.f32.xlu1 %v34_v7  ;;  %749 = vmatpush3.bf16.msra.mxu1 %v876_v16  ;;  %v888_v22 = vpack.c.bf16 %v187_v21, %v180_v20  ;;  %v181_v23 = vsub.f32 %v179_v18, %v180_v20  ;;  %v188_v24 = vsub.f32 %v186_v19, %v187_v21 }
   0xa   :  { %775 = vmatprep.subr.bf16.mxu0 %v878_v17  ;;  %751 = vmatprep.subr.bf16.mxu1 %v878_v17  ;;  %v782_v32 = vpack.c.bf16 %v201_v30, %v194_v29  ;;  %v195_v33 = vsub.f32 %v193_v25, %v194_v29  ;;  %v202_v34 = vsub.f32 %v200_v26, %v201_v30 }
   0xb   :  { %v182_v27 = vand.u32 4294901760, %v181_v23  ;;  %v189_v28 = vand.u32 4294901760, %v188_v24 }
   0xc   :  { %777 = vmatpush3.bf16.msra.mxu0 %v878_v17  ;;  %v196_v35 = vand.u32 4294901760, %v195_v33  ;;  %v203_v36 = vand.u32 4294901760, %v202_v34 }
   0xd   :  { %753 = vmatpush3.bf16.msra.mxu1 %v878_v17  ;;  %779 = vmatprep.subr.bf16.mxu0 %v888_v22  ;;  %v754_v31 = vpack.c.bf16 %v189_v28, %v182_v27 }
   0xe   :  { %v758_v37 = vpack.c.bf16 %v203_v36, %v196_v35 }
   0xf   :  { %755 = vmatprep.subr.bf16.mxu1 %v754_v31 }
  0x90   :  { %v25_v40 = vpop.xlane.xlu0 %24 }
  0x91   :  { %v37_v41 = vmul.f32 0.03125, %v25_v40 }
  0x92   :  { %v33_v42 = vpop.xlane.xlu1 %32 }
  0x93   :  { %v41_v43 = vmul.f32 %v37_v41, %v37_v41  ;;  %v39_v44 = vmul.f32 0.03125, %v33_v42  ;;  %v45_v54 = vsub.f32 %v847_v0, %v37_v41 }
  0x94   :  { %v28_v45 = vpop.xlane.xlu0 %27 }
  0x95   :  { %v43_v46 = vsub.f32 %v39_v44, %v41_v43  ;;  %v38_v47 = vmul.f32 0.03125, %v28_v45 }
  0x96   :  { %v36_v48 = vpop.xlane.xlu1 %35 }
  0x97   :  { %v47_v49 = vadd.f32 1e-05, %v43_v46  ;;  %v42_v50 = vmul.f32 %v38_v47, %v38_v47  ;;  %v40_v51 = vmul.f32 0.03125, %v36_v48  ;;  %v46_v59 = vsub.f32 %v852_v1, %v38_v47 }
  0x99   :  { %806 = vrsqrt.f32 %v47_v49  ;;  %v44_v52 = vsub.f32 %v40_v51, %v42_v50 }
  0x9b   :  { %v48_v53 = vadd.f32 1e-05, %v44_v52 }
  0x9d   :  { %808 = vrsqrt.f32 %v48_v53 }
  0xa3   :  { %v807_v55 = vpop.eup %806 }
  0xa4   :  { %v51_v57 = vmul.f32 %v807_v55, %v45_v54 }
  0xa6   :  { %v60_v60 = vmul.f32 %v641_v56, %v51_v57 }
  0xa7   :  { %v809_v61 = vpop.eup %808 }
  0xa8   :  { %v52_v62 = vmul.f32 %v809_v61, %v46_v59  ;;  %v69_v63 = vadd.f32 %v642_v58, %v60_v60 }
  0xaa   :  { %v61_v2 = vmul.f32 %v641_v56, %v52_v62  ;;  %v83_v3 = vsel %vm22_vm0, %v69_v63, 0 }
  0xab   :  { %v157_v0 = vand.u32 4294901760, %v83_v3 }
  0xac   :  { %v70_v4 = vadd.f32 %v642_v58, %v61_v2 }
  0xad   :  { %v158_v5 = vsub.f32 %v83_v3, %v157_v0 }
  0xae   :  { %v86_v6 = vsel %vm22_vm0, %v70_v4, 0 }
  0xaf   :  { %v159_v7 = vand.u32 4294901760, %v158_v5  ;;  %v167_v8 = vand.u32 4294901760, %v86_v6 }
  0xb1   :  { %721 = vmatprep.mubr.f32.mxu0 %v159_v7  ;;  %v160_v9 = vsub.f32 %v158_v5, %v159_v7  ;;  %v168_v10 = vsub.f32 %v86_v6, %v167_v8 }
  0xb3   :  { %v161_v11 = vand.u32 4294901760, %v160_v9  ;;  %v169_v12 = vand.u32 4294901760, %v168_v10 }
  0xb5   :  { %688 = vmatprep.mubr.f32.mxu1 %v161_v11  ;;  %722 = vmatmul.mubr.f32.vlgmr.msra.gmra.mrb[0].mxu0 %v169_v12  ;;  %v170_v1 = vsub.f32 %v168_v10, %v169_v12 }
  0xb6   :  { %781 = vmatpush3.bf16.msra.mxu0 %v888_v22  ;;  %732 = vmatprep.mubr.f32.mxu0 %v157_v0 }
  0xb7   :  { %v171_v13 = vand.u32 4294901760, %v170_v1  ;;  %783 = vmatprep.subr.bf16.mxu0 %v782_v32 }
  0xb9   :  { %689 = vmatmul.mubr.f32.vlgmr.msra.gmra.mrb[0].mxu1 %v171_v13 }
  0xba   :  { %757 = vmatpush3.bf16.msra.mxu1 %v754_v31  ;;  %699 = vmatprep.mubr.f32.mxu1 %v157_v0 }
  0xbb   :  { %785 = vmatpush3.bf16.msra.mxu0 %v782_v32  ;;  %759 = vmatprep.subr.bf16.mxu1 %v758_v37 }
  0xbc   :  { %787 = vmatprep.subr.bf16.mxu0 %v876_v16 }
  0xbe   :  { %761 = vmatpush3.bf16.msra.mxu1 %v758_v37  ;;  %733 = vmatmul.mubr.f32.vlgmr.msra.gmra.mrb[0].mxu0 %v167_v8 }
  0xbf   :  { %789 = vmatpush3.bf16.msra.mxu0 %v876_v16  ;;  %743 = vmatprep.mubr.f32.mxu0 %v157_v0  ;;  %v643_v16 = vld [vmem:[%s923_s4] ss:$0 sm:$0xff] }
  0xc0   :  { %763 = vmatprep.subr.bf16.mxu1 %v762_v38  ;;  %791 = vmatprep.subr.bf16.mxu0 %v878_v17 }
  0xc1   :  { %700 = vmatmul.mubr.f32.vlgmr.msra.gmra.mrb[0].mxu1 %v167_v8 }
  0xc2   :  { %765 = vmatpush3.bf16.msra.mxu1 %v762_v38  ;;  %710 = vmatprep.mubr.f32.mxu1 %v158_v5 }
  0xc3   :  { %793 = vmatpush3.bf16.msra.mxu0 %v878_v17  ;;  %767 = vmatprep.subr.bf16.mxu1 %v891_v39 }
  0xc6   :  { %769 = vmatpush3.bf16.msra.mxu1 %v891_v39  ;;  %744 = vmatmul.mubr.f32.vlgmr.msra.gmra.mrb[0].mxu0 %v167_v8 }
  0xc9   :  { %711 = vmatmul.mubr.f32.vlgmr.msra.gmra.mrb[0].mxu1 %v168_v10 }
 0x199   :  { %v745_v14 = vpop.f32.mrb[0].mxu0 }
 0x19a   :  { %v606_v15 = vpop.f32.mrb[1].mxu0 }
 0x19c   :  { %v712_v18 = vpop.f32.mrb[0].mxu1 }
 0x19d   :  { %v794_v19 = vadd.f32 %v712_v18, %v643_v16  ;;  %v350_v20 = vpop.f32.mrb[1].mxu1 }
 0x19e   :  { %v796_v21 = vadd.f32 %v643_v16, %v350_v20 }
 0x19f   :  { %v795_v22 = vadd.f32 %v794_v19, %v745_v14 }
 0x1a0   :  { %v797_v23 = vadd.f32 %v796_v21, %v606_v15 }
 0x1a1   :  { %v617_v24 = vmul.f32 %v795_v22, %v795_v22 }
 0x1a2   :  { %v616_v17 = vmul.f32 %v797_v23, %v797_v23 }
 0x1a3   :  { %v619_v25 = vmul.f32 %v795_v22, %v617_v24 }
 0x1a4   :  { %v618_v26 = vmul.f32 %v797_v23, %v616_v17 }
 0x1a5   :  { %v621_v27 = vmul.f32 0.044715, %v619_v25 }
 0x1a6   :  { %v620_v28 = vmul.f32 0.044715, %v618_v26 }
 0x1a7   :  { %v623_v29 = vadd.f32 %v795_v22, %v621_v27 }
 0x1a8   :  { %v622_v30 = vadd.f32 %v797_v23, %v620_v28 }
 0x1a9   :  { %v625_v31 = vmul.f32 0.7978846, %v623_v29 }
 0x1aa   :  { %v624_v32 = vmul.f32 0.7978846, %v622_v30 }
 0x1ab   :  { %810 = vtanh.f32 %v625_v31 }
 0x1ac   :  { %812 = vtanh.f32 %v624_v32 }
 0x1b5   :  { %v811_v33 = vpop.eup %810 }
 0x1b6   :  { %v813_v34 = vpop.eup %812  ;;  %v629_v35 = vadd.f32 1.0, %v811_v33 }
 0x1b7   :  { %v628_v36 = vadd.f32 1.0, %v813_v34 }
 0x1b8   :  { %v631_v37 = vmul.f32 0.5, %v629_v35 }
 0x1b9   :  { %v630_v38 = vmul.f32 0.5, %v628_v36 }
 0x1ba   :  { %v633_v39 = vmul.f32 %v795_v22, %v631_v37 }
 0x1bb   :  { %v632_v40 = vmul.f32 %v797_v23, %v630_v38 }
 0x1bc   :  { %636 = vst.msk [vmem:[%s924_s5 + $0x8] sm:$0xff] %vm634_vm1, %v633_v39 }
 0x1bd   :  { %635 = vst.msk [vmem:[%s924_s5] sm:$0xff] %vm634_vm1, %v632_v40 }

// kernel: transformer_cross_attn_forward.20
= control target key start
LH: loop header
LB: loop body
LE: loop exit
PB: predicated region body
PF: predicated region fallthrough
CT: control target
= control target key end

     0   :  { %vm34_vm0 = vcmask 523264   ;;  %vm625_vm1 = vcmask 261120   ;;  %s1076_s1 = inlined_call_operand.vmem [shape: f32[64,32], index: 1, kind: input, shape index: {}]   ;;  %s1077_s0 = inlined_call_operand.vmem [shape: f32[16,64], index: 0, kind: input, shape index: {}]   ;;  %s1078_s2 = inlined_call_operand.vmem [shape: f32[1,32], index: 2, kind: input, shape index: {}]   ;;  %s1079_s3 = inlined_call_operand.vmem [shape: f32[16,32], index: 3, kind: input, shape index: {}]   ;;  %s1080_s4 = inlined_call_operand.vmem [shape: f32[16,32], index: 4, kind: output, shape index: {}]  }
   0x1   :  { %v19_v0 = vld [vmem:[%s1076_s1] sm:$0xff]  ;;  %v20_v1 = vld [vmem:[%s1076_s1 + $0x8] sm:$0xff]  ;;  %v21_v2 = vld [vmem:[%s1076_s1 + $0x10] sm:$0xff] }
   0x2   :  { %v42_v3 = vand.u32 4294901760, %v19_v0  ;;  %v45_v4 = vand.u32 4294901760, %v20_v1  ;;  %v22_v5 = vld [vmem:[%s1076_s1 + $0x18] sm:$0xff]  ;;  %v48_v6 = vand.u32 4294901760, %v21_v2  ;;  %v23_v7 = vld [vmem:[%s1076_s1 + $0x20] sm:$0xff]  ;;  %v24_v8 = vld [vmem:[%s1076_s1 + $0x28] sm:$0xff] }
   0x3   :  { %v51_v9 = vand.u32 4294901760, %v22_v5  ;;  %v54_v10 = vand.u32 4294901760, %v23_v7  ;;  %v57_v11 = vand.u32 4294901760, %v24_v8  ;;  %v25_v12 = vld [vmem:[%s1076_s1 + $0x30] sm:$0xff]  ;;  %v17_v13 = vld [vmem:[%s1077_s0] sm:$0xff]  ;;  %v26_v15 = vld [vmem:[%s1076_s1 + $0x38] sm:$0xff] }
   0x4   :  { %v964_v14 = vpack.c.bf16 %v45_v4, %v42_v3  ;;  %v18_v16 = vld [vmem:[%s1077_s0 + $0x8] sm:$0xff]  ;;  %v36_v17 = vsel %vm34_vm0, %v17_v13, 0  ;;  %v60_v19 = vand.u32 4294901760, %v25_v12  ;;  %v984_v24 = vsub.f32 %v19_v0, %v42_v3 }
   0x5   :  { %v973_v18 = vpack.c.bf16 %v51_v9, %v48_v6  ;;  %v39_v20 = vsel %vm34_vm0, %v18_v16, 0  ;;  %v976_v21 = vand.u32 4294901760, %v36_v17  ;;  %v980_v22 = vpack.c.bf16 %v57_v11, %v54_v10 }
   0x6   :  { %808 = vmatprep.subr.bf16.mxu1 %v964_v14  ;;  %856 = vmatprep.subr.bf16.mxu0 %v964_v14  ;;  %v982_v23 = vand.u32 4294901760, %v39_v20  ;;  %v986_v25 = vsub.f32 %v20_v1, %v45_v4  ;;  %v63_v26 = vand.u32 4294901760, %v26_v15  ;;  %v993_v28 = vsub.f32 %v21_v2, %v48_v6 }
   0x7   :  { %810 = vmatpush3.bf16.msra.mxu1 %v964_v14  ;;  %858 = vmatpush3.bf16.msra.mxu0 %v964_v14  ;;  %v991_v27 = vsub.f32 %v36_v17, %v976_v21  ;;  %v995_v29 = vsub.f32 %v22_v5, %v51_v9  ;;  %v137_v30 = vand.u32 4294901760, %v984_v24  ;;  %v1004_v33 = vsub.f32 %v23_v7, %v54_v10 }
   0x8   :  { %812 = vmatprep.subr.bf16.mxu1 %v973_v18  ;;  %860 = vmatprep.subr.bf16.mxu0 %v973_v18  ;;  %v144_v31 = vand.u32 4294901760, %v986_v25  ;;  %v1002_v32 = vsub.f32 %v39_v20, %v982_v23  ;;  %v151_v35 = vand.u32 4294901760, %v993_v28  ;;  %v1012_v40 = vsub.f32 %v24_v8, %v57_v11  ;;  %v622_v20 = vld [vmem:[%s1079_s3 + $0x8] sm:$0xff] }
   0x9   :  { %v116_v34 = vand.u32 4294901760, %v991_v27  ;;  %v158_v36 = vand.u32 4294901760, %v995_v29  ;;  %v138_v37 = vsub.f32 %v984_v24, %v137_v30  ;;  %v1021_v44 = vpack.c.bf16 %v63_v26, %v60_v19 }
   0xa   :  { %v145_v38 = vsub.f32 %v986_v25, %v144_v31  ;;  %v126_v39 = vand.u32 4294901760, %v1002_v32  ;;  %v152_v42 = vsub.f32 %v993_v28, %v151_v35  ;;  %v165_v47 = vand.u32 4294901760, %v1004_v33 }
   0xb   :  { %814 = vmatpush3.bf16.msra.mxu1 %v973_v18  ;;  %862 = vmatpush3.bf16.msra.mxu0 %v973_v18  ;;  %v117_v41 = vsub.f32 %v991_v27, %v116_v34  ;;  %v159_v43 = vsub.f32 %v995_v29, %v158_v36  ;;  %v139_v45 = vand.u32 4294901760, %v138_v37  ;;  %v172_v50 = vand.u32 4294901760, %v1012_v40 }
   0xc   :  { %816 = vmatprep.subr.bf16.mxu1 %v980_v22  ;;  %864 = vmatprep.subr.bf16.mxu0 %v980_v22  ;;  %v146_v46 = vand.u32 4294901760, %v145_v38  ;;  %v127_v49 = vsub.f32 %v1002_v32, %v126_v39  ;;  %v1026_v51 = vsub.f32 %v25_v12, %v60_v19  ;;  %v871_v52 = vpack.c.bf16 %v144_v31, %v137_v30 }
   0xd   :  { %v118_v48 = vand.u32 4294901760, %v117_v41  ;;  %766 = vmatprep.mubr.f32.mxu0 %v116_v34  ;;  %v153_v53 = vand.u32 4294901760, %v152_v42  ;;  %v160_v54 = vand.u32 4294901760, %v159_v43  ;;  %v185_v55 = vsub.f32 %v26_v15, %v63_v26 }
   0xe   :  { %v823_v56 = vpack.c.bf16 %v146_v46, %v139_v45  ;;  %v166_v57 = vsub.f32 %v1004_v33, %v165_v47  ;;  %v173_v58 = vsub.f32 %v1012_v40, %v172_v50  ;;  %v179_v59 = vand.u32 4294901760, %v1026_v51 }
   0xf   :  { %818 = vmatpush3.bf16.msra.mxu1 %v980_v22  ;;  %866 = vmatpush3.bf16.msra.mxu0 %v980_v22  ;;  %v186_v60 = vand.u32 4294901760, %v185_v55  ;;  %v128_v61 = vand.u32 4294901760, %v127_v49  ;;  %v827_v62 = vpack.c.bf16 %v160_v54, %v153_v53  ;;  %v875_v63 = vpack.c.bf16 %v158_v36, %v151_v35 }
  0x10   :  { %820 = vmatprep.subr.bf16.mxu1 %v1021_v44  ;;  %868 = vmatprep.subr.bf16.mxu0 %v1021_v44  ;;  %v167_v0 = vand.u32 4294901760, %v166_v57  ;;  %v174_v1 = vand.u32 4294901760, %v173_v58  ;;  %v180_v2 = vsub.f32 %v1026_v51, %v179_v59  ;;  %v879_v5 = vpack.c.bf16 %v172_v50, %v165_v47 }
  0x11   :  { %709 = vmatprep.mubr.f32.mxu1 %v118_v48  ;;  %v187_v3 = vsub.f32 %v185_v55, %v186_v60  ;;  %v883_v9 = vpack.c.bf16 %v186_v60, %v179_v59  ;;  %v839_v10 = vpack.c.bf16 %v986_v25, %v984_v24  ;;  %v843_v11 = vpack.c.bf16 %v995_v29, %v993_v28  ;;  %v621_v24 = vld [vmem:[%s1079_s3] sm:$0xff] }
  0x12   :  { %v831_v4 = vpack.c.bf16 %v174_v1, %v167_v0  ;;  %v181_v6 = vand.u32 4294901760, %v180_v2  ;;  %v847_v12 = vpack.c.bf16 %v1012_v40, %v1004_v33  ;;  %v851_v13 = vpack.c.bf16 %v185_v55, %v1026_v51 }
  0x13   :  { %822 = vmatpush3.bf16.msra.mxu1 %v1021_v44  ;;  %870 = vmatpush3.bf16.msra.mxu0 %v1021_v44  ;;  %v188_v7 = vand.u32 4294901760, %v187_v3 }
  0x14   :  { %824 = vmatprep.subr.bf16.mxu1 %v823_v56  ;;  %872 = vmatprep.subr.bf16.mxu0 %v871_v52 }
  0x15   :  { %v835_v8 = vpack.c.bf16 %v188_v7, %v181_v6 }
  0x16   :  { %710 = vmatmul.mubr.f32.vlgmr.msra.gmra.mrb[0].mxu1 %v128_v61  ;;  %767 = vmatmul.mubr.f32.vlgmr.msra.gmra.mrb[0].mxu0 %v126_v39 }
  0x17   :  { %826 = vmatpush3.bf16.msra.mxu1 %v823_v56  ;;  %874 = vmatpush3.bf16.msra.mxu0 %v871_v52 }
  0x18   :  { %828 = vmatprep.subr.bf16.mxu1 %v827_v62  ;;  %876 = vmatprep.subr.bf16.mxu0 %v875_v63 }
  0x19   :  { %728 = vmatprep.mubr.f32.mxu1 %v976_v21  ;;  %785 = vmatprep.mubr.f32.mxu0 %v976_v21 }
  0x1b   :  { %830 = vmatpush3.bf16.msra.mxu1 %v827_v62  ;;  %878 = vmatpush3.bf16.msra.mxu0 %v875_v63 }
  0x1c   :  { %832 = vmatprep.subr.bf16.mxu1 %v831_v4  ;;  %880 = vmatprep.subr.bf16.mxu0 %v879_v5 }
  0x1f   :  { %834 = vmatpush3.bf16.msra.mxu1 %v831_v4  ;;  %882 = vmatpush3.bf16.msra.mxu0 %v879_v5 }
  0x20   :  { %836 = vmatprep.subr.bf16.mxu1 %v835_v8  ;;  %884 = vmatprep.subr.bf16.mxu0 %v883_v9 }
  0x23   :  { %838 = vmatpush3.bf16.msra.mxu1 %v835_v8  ;;  %886 = vmatpush3.bf16.msra.mxu0 %v883_v9 }
  0x24   :  { %840 = vmatprep.subr.bf16.mxu1 %v839_v10  ;;  %888 = vmatprep.subr.bf16.mxu0 %v964_v14 }
  0x26   :  { %729 = vmatmul.mubr.f32.vlgmr.msra.gmra.mrb[0].mxu1 %v982_v23  ;;  %786 = vmatmul.mubr.f32.vlgmr.msra.gmra.mrb[0].mxu0 %v982_v23 }
  0x27   :  { %842 = vmatpush3.bf16.msra.mxu1 %v839_v10  ;;  %890 = vmatpush3.bf16.msra.mxu0 %v964_v14  ;;  %v632_v14 = vld [vmem:[%s1078_s2] ss:$0 sm:$0xff] }
  0x28   :  { %844 = vmatprep.subr.bf16.mxu1 %v843_v11  ;;  %892 = vmatprep.subr.bf16.mxu0 %v973_v18 }
  0x29   :  { %747 = vmatprep.mubr.f32.mxu1 %v991_v27  ;;  %804 = vmatprep.mubr.f32.mxu0 %v976_v21 }
  0x2b   :  { %846 = vmatpush3.bf16.msra.mxu1 %v843_v11  ;;  %894 = vmatpush3.bf16.msra.mxu0 %v973_v18 }
  0x2c   :  { %848 = vmatprep.subr.bf16.mxu1 %v847_v12  ;;  %896 = vmatprep.subr.bf16.mxu0 %v980_v22 }
  0x2f   :  { %850 = vmatpush3.bf16.msra.mxu1 %v847_v12  ;;  %898 = vmatpush3.bf16.msra.mxu0 %v980_v22 }
  0x30   :  { %852 = vmatprep.subr.bf16.mxu1 %v851_v13  ;;  %900 = vmatprep.subr.bf16.mxu0 %v1021_v44 }
  0x33   :  { %854 = vmatpush3.bf16.msra.mxu1 %v851_v13  ;;  %902 = vmatpush3.bf16.msra.mxu0 %v1021_v44 }
  0x36   :  { %748 = vmatmul.mubr.f32.vlgmr.msra.gmra.mrb[0].mxu1 %v1002_v32  ;;  %805 = vmatmul.mubr.f32.vlgmr.msra.gmra.mrb[0].mxu0 %v982_v23 }
 0x109   :  { %v749_v15 = vpop.f32.mrb[0].mxu1  ;;  %v806_v16 = vpop.f32.mrb[0].mxu0 }
 0x10a   :  { %v903_v17 = vadd.f32 %v749_v15, %v632_v14  ;;  %v335_v18 = vpop.f32.mrb[1].mxu1  ;;  %v611_v19 = vpop.f32.mrb[1].mxu0 }
 0x10b   :  { %v905_v21 = vadd.f32 %v632_v14, %v335_v18 }
 0x10c   :  { %v904_v22 = vadd.f32 %v903_v17, %v806_v16 }
 0x10d   :  { %v906_v23 = vadd.f32 %v905_v21, %v611_v19 }
 0x10e   :  { %v624_v25 = vadd.f32 %v904_v22, %v622_v20 }
 0x10f   :  { %v623_v26 = vadd.f32 %v906_v23, %v621_v24 }
 0x110   :  { %627 = vst.msk [vmem:[%s1080_s4 + $0x8] sm:$0xff] %vm625_vm1, %v624_v25 }
 0x111   :  { %626 = vst.msk [vmem:[%s1080_s4] sm:$0xff] %vm625_vm1, %v623_v26 }

// kernel: transformer_cross_attn_forward.27
= control target key start
LH: loop header
LB: loop body
LE: loop exit
PB: predicated region body
PF: predicated region fallthrough
CT: control target
= control target key end

     0   :  { %vm35_vm0 = vcmask 523264   ;;  %s1125_s0 = inlined_call_operand.vmem [shape: f32[16,64], index: 0, kind: input, shape index: {}]   ;;  %s1126_s1 = inlined_call_operand.vmem [shape: f32[64,32], index: 1, kind: input, shape index: {}]   ;;  %s1127_s2 = inlined_call_operand.vmem [shape: f32[1,32], index: 2, kind: input, shape index: {}]   ;;  %s1128_s3 = inlined_call_operand.vmem [shape: f32[16,32], index: 3, kind: input, shape index: {}]   ;;  %s1129_s4 = inlined_call_operand.hbm [shape: f32[16,32], index: 4, kind: output, shape index: {}]  }
   0x1   :  { %v20_v0 = vld [vmem:[%s1126_s1] sm:$0xff]  ;;  %v21_v1 = vld [vmem:[%s1126_s1 + $0x8] sm:$0xff]  ;;  %v22_v2 = vld [vmem:[%s1126_s1 + $0x10] sm:$0xff] }
   0x2   :  { %v43_v3 = vand.u32 4294901760, %v20_v0  ;;  %v46_v4 = vand.u32 4294901760, %v21_v1  ;;  %v23_v5 = vld [vmem:[%s1126_s1 + $0x18] sm:$0xff]  ;;  %v49_v6 = vand.u32 4294901760, %v22_v2  ;;  %v24_v7 = vld [vmem:[%s1126_s1 + $0x20] sm:$0xff]  ;;  %v25_v8 = vld [vmem:[%s1126_s1 + $0x28] sm:$0xff] }
   0x3   :  { %v52_v9 = vand.u32 4294901760, %v23_v5  ;;  %v55_v10 = vand.u32 4294901760, %v24_v7  ;;  %v58_v11 = vand.u32 4294901760, %v25_v8  ;;  %v26_v12 = vld [vmem:[%s1126_s1 + $0x30] sm:$0xff]  ;;  %v18_v13 = vld [vmem:[%s1125_s0] sm:$0xff]  ;;  %v27_v15 = vld [vmem:[%s1126_s1 + $0x38] sm:$0xff] }
   0x4   :  { %v1007_v14 = vpack.c.bf16 %v46_v4, %v43_v3  ;;  %v19_v16 = vld [vmem:[%s1125_s0 + $0x8] sm:$0xff]  ;;  %v37_v17 = vsel %vm35_vm0, %v18_v13, 0  ;;  %v61_v19 = vand.u32 4294901760, %v26_v12 }
   0x5   :  { %v1016_v18 = vpack.c.bf16 %v52_v9, %v49_v6  ;;  %v40_v20 = vsel %vm35_vm0, %v19_v16, 0  ;;  %v1019_v21 = vand.u32 4294901760, %v37_v17 }
   0x6   :  { %9 = vsyncpa [#allocation3], 0  ;;  %821 = vmatprep.subr.bf16.mxu1 %v1007_v14  ;;  %869 = vmatprep.subr.bf16.mxu0 %v1007_v14  ;;  %v1023_v22 = vpack.c.bf16 %v58_v11, %v55_v10  ;;  %v1025_v23 = vand.u32 4294901760, %v40_v20  ;;  %v1027_v24 = vsub.f32 %v20_v0, %v43_v3  ;;  %v1029_v25 = vsub.f32 %v21_v1, %v46_v4  ;;  %s955_s11 = smov [#allocation2]  }
   0x7   :  { %823 = vmatpush3.bf16.msra.mxu1 %v1007_v14  ;;  %871 = vmatpush3.bf16.msra.mxu0 %v1007_v14  ;;  %v64_v26 = vand.u32 4294901760, %v27_v15  ;;  %v1034_v27 = vsub.f32 %v37_v17, %v1019_v21  ;;  %v1036_v28 = vsub.f32 %v22_v2, %v49_v6  ;;  %v1038_v29 = vsub.f32 %v23_v5, %v52_v9  ;;  %s634_s12 = sshll.u32 %s955_s11, 4  ;;  %s635_s12 = int_to_ptr.vmem [resolvable:$true] %s634_s12 }
   0x8   :  { %825 = vmatprep.subr.bf16.mxu1 %v1016_v18  ;;  %873 = vmatprep.subr.bf16.mxu0 %v1016_v18  ;;  %v138_v30 = vand.u32 4294901760, %v1027_v24  ;;  %v145_v31 = vand.u32 4294901760, %v1029_v25  ;;  %v1045_v32 = vsub.f32 %v40_v20, %v1025_v23  ;;  %v1047_v33 = vsub.f32 %v24_v7, %v55_v10  ;;  %v623_v20 = vld [vmem:[%s1128_s3 + $0x8] sm:$0xff]  ;;  %p936_p1 = scmp.lt.s32.totalorder %s635_s12, %s635_s12 }
   0x9   :  { %v117_v34 = vand.u32 4294901760, %v1034_v27  ;;  %v152_v35 = vand.u32 4294901760, %v1036_v28  ;;  %v159_v36 = vand.u32 4294901760, %v1038_v29  ;;  %v1055_v40 = vsub.f32 %v25_v8, %v58_v11 }
   0xa   :  { %v139_v37 = vsub.f32 %v1027_v24, %v138_v30  ;;  %v146_v38 = vsub.f32 %v1029_v25, %v145_v31  ;;  %v127_v39 = vand.u32 4294901760, %v1045_v32  ;;  %v1064_v44 = vpack.c.bf16 %v64_v26, %v61_v19 }
   0xb   :  { %827 = vmatpush3.bf16.msra.mxu1 %v1016_v18  ;;  %875 = vmatpush3.bf16.msra.mxu0 %v1016_v18  ;;  %v118_v41 = vsub.f32 %v1034_v27, %v117_v34  ;;  %v153_v42 = vsub.f32 %v1036_v28, %v152_v35  ;;  %v160_v43 = vsub.f32 %v1038_v29, %v159_v36  ;;  %v166_v47 = vand.u32 4294901760, %v1047_v33 }
   0xc   :  { %829 = vmatprep.subr.bf16.mxu1 %v1023_v22  ;;  %877 = vmatprep.subr.bf16.mxu0 %v1023_v22  ;;  %v140_v45 = vand.u32 4294901760, %v139_v37  ;;  %v147_v46 = vand.u32 4294901760, %v146_v38  ;;  %v128_v49 = vsub.f32 %v1045_v32, %v127_v39  ;;  %v173_v50 = vand.u32 4294901760, %v1055_v40 }
   0xd   :  { %v119_v48 = vand.u32 4294901760, %v118_v41  ;;  %779 = vmatprep.mubr.f32.mxu0 %v117_v34  ;;  %v1069_v51 = vsub.f32 %v26_v12, %v61_v19  ;;  %v884_v52 = vpack.c.bf16 %v145_v31, %v138_v30  ;;  %v154_v53 = vand.u32 4294901760, %v153_v42 }
   0xe   :  { %v161_v54 = vand.u32 4294901760, %v160_v43  ;;  %v186_v55 = vsub.f32 %v27_v15, %v64_v26  ;;  %v836_v56 = vpack.c.bf16 %v147_v46, %v140_v45  ;;  %v167_v57 = vsub.f32 %v1047_v33, %v166_v47 }
   0xf   :  { %831 = vmatpush3.bf16.msra.mxu1 %v1023_v22  ;;  %879 = vmatpush3.bf16.msra.mxu0 %v1023_v22  ;;  %v174_v58 = vsub.f32 %v1055_v40, %v173_v50  ;;  %v180_v59 = vand.u32 4294901760, %v1069_v51  ;;  %v129_v61 = vand.u32 4294901760, %v128_v49  ;;  %v888_v63 = vpack.c.bf16 %v159_v36, %v152_v35 }
  0x10   :  { %833 = vmatprep.subr.bf16.mxu1 %v1064_v44  ;;  %881 = vmatprep.subr.bf16.mxu0 %v1064_v44  ;;  %v187_v60 = vand.u32 4294901760, %v186_v55  ;;  %v840_v62 = vpack.c.bf16 %v161_v54, %v154_v53  ;;  %v168_v0 = vand.u32 4294901760, %v167_v57  ;;  %v892_v5 = vpack.c.bf16 %v173_v50, %v166_v47 }
  0x11   :  { %722 = vmatprep.mubr.f32.mxu1 %v119_v48  ;;  %v175_v1 = vand.u32 4294901760, %v174_v58  ;;  %v181_v2 = vsub.f32 %v1069_v51, %v180_v59  ;;  %v852_v10 = vpack.c.bf16 %v1029_v25, %v1027_v24  ;;  %v856_v11 = vpack.c.bf16 %v1038_v29, %v1036_v28 }
  0x12   :  { %v188_v3 = vsub.f32 %v186_v55, %v187_v60  ;;  %v896_v9 = vpack.c.bf16 %v187_v60, %v180_v59  ;;  %v860_v12 = vpack.c.bf16 %v1055_v40, %v1047_v33  ;;  %v864_v13 = vpack.c.bf16 %v186_v55, %v1069_v51 }
  0x13   :  { %835 = vmatpush3.bf16.msra.mxu1 %v1064_v44  ;;  %883 = vmatpush3.bf16.msra.mxu0 %v1064_v44  ;;  %v844_v4 = vpack.c.bf16 %v175_v1, %v168_v0  ;;  %v182_v6 = vand.u32 4294901760, %v181_v2  ;;  %vm626_vm1 = vcmask 261120  }
  0x14   :  { %837 = vmatprep.subr.bf16.mxu1 %v836_v56  ;;  %885 = vmatprep.subr.bf16.mxu0 %v884_v52  ;;  %v189_v7 = vand.u32 4294901760, %v188_v3 }
  0x16   :  { %723 = vmatmul.mubr.f32.vlgmr.msra.gmra.mrb[0].mxu1 %v129_v61  ;;  %780 = vmatmul.mubr.f32.vlgmr.msra.gmra.mrb[0].mxu0 %v127_v39  ;;  %v848_v8 = vpack.c.bf16 %v189_v7, %v182_v6 }
  0x17   :  { %839 = vmatpush3.bf16.msra.mxu1 %v836_v56  ;;  %887 = vmatpush3.bf16.msra.mxu0 %v884_v52 }
  0x18   :  { %841 = vmatprep.subr.bf16.mxu1 %v840_v62  ;;  %889 = vmatprep.subr.bf16.mxu0 %v888_v63 }
  0x19   :  { %741 = vmatprep.mubr.f32.mxu1 %v1019_v21  ;;  %798 = vmatprep.mubr.f32.mxu0 %v1019_v21 }
  0x1b   :  { %843 = vmatpush3.bf16.msra.mxu1 %v840_v62  ;;  %891 = vmatpush3.bf16.msra.mxu0 %v888_v63 }
  0x1c   :  { %845 = vmatprep.subr.bf16.mxu1 %v844_v4  ;;  %893 = vmatprep.subr.bf16.mxu0 %v892_v5 }
  0x1f   :  { %847 = vmatpush3.bf16.msra.mxu1 %v844_v4  ;;  %895 = vmatpush3.bf16.msra.mxu0 %v892_v5 }
  0x20   :  { %849 = vmatprep.subr.bf16.mxu1 %v848_v8  ;;  %897 = vmatprep.subr.bf16.mxu0 %v896_v9 }
  0x23   :  { %851 = vmatpush3.bf16.msra.mxu1 %v848_v8  ;;  %899 = vmatpush3.bf16.msra.mxu0 %v896_v9 }
  0x24   :  { %853 = vmatprep.subr.bf16.mxu1 %v852_v10  ;;  %901 = vmatprep.subr.bf16.mxu0 %v1007_v14 }
  0x26   :  { %742 = vmatmul.mubr.f32.vlgmr.msra.gmra.mrb[0].mxu1 %v1025_v23  ;;  %799 = vmatmul.mubr.f32.vlgmr.msra.gmra.mrb[0].mxu0 %v1025_v23 }
  0x27   :  { %855 = vmatpush3.bf16.msra.mxu1 %v852_v10  ;;  %903 = vmatpush3.bf16.msra.mxu0 %v1007_v14  ;;  %v645_v14 = vld [vmem:[%s1127_s2] ss:$0 sm:$0xff]  ;;  %s931_s2 = scalar_lea.vmem %s635_s12, 256 }
  0x28   :  { %857 = vmatprep.subr.bf16.mxu1 %v856_v11  ;;  %905 = vmatprep.subr.bf16.mxu0 %v1016_v18  ;;  %p932_p0 = scmp.ne.s32.totalorder %s635_s12, %s931_s2  ;;  %p937_p2 = scmp.lt.s32.totalorder %s931_s2, %s931_s2 }
  0x29   :  { %760 = vmatprep.mubr.f32.mxu1 %v1034_v27  ;;  %817 = vmatprep.mubr.f32.mxu0 %v1019_v21 }
  0x2a   :  { %p938_p3 = por %p937_p2, %p936_p1 }
  0x2b   :  { %859 = vmatpush3.bf16.msra.mxu1 %v856_v11  ;;  %907 = vmatpush3.bf16.msra.mxu0 %v1016_v18 }
  0x2c   :  { %861 = vmatprep.subr.bf16.mxu1 %v860_v12  ;;  %909 = vmatprep.subr.bf16.mxu0 %v1023_v22  ;;  %p939_p4 = pnand %p938_p3, %p932_p0 }
  0x2f   :  { %863 = vmatpush3.bf16.msra.mxu1 %v860_v12  ;;  %911 = vmatpush3.bf16.msra.mxu0 %v1023_v22 }
  0x30   :  { %865 = vmatprep.subr.bf16.mxu1 %v864_v13  ;;  %913 = vmatprep.subr.bf16.mxu0 %v1064_v44 }
  0x33   :  { %867 = vmatpush3.bf16.msra.mxu1 %v864_v13  ;;  %915 = vmatpush3.bf16.msra.mxu0 %v1064_v44 }
  0x36   :  { %761 = vmatmul.mubr.f32.vlgmr.msra.gmra.mrb[0].mxu1 %v1045_v32  ;;  %818 = vmatmul.mubr.f32.vlgmr.msra.gmra.mrb[0].mxu0 %v1025_v23  ;;  %v622_v23 = vld [vmem:[%s1128_s3] sm:$0xff] }
 0x109   :  { %v762_v15 = vpop.f32.mrb[0].mxu1  ;;  %v819_v16 = vpop.f32.mrb[0].mxu0 }
 0x10a   :  { %v916_v17 = vadd.f32 %v762_v15, %v645_v14  ;;  %v336_v18 = vpop.f32.mrb[1].mxu1  ;;  %v612_v19 = vpop.f32.mrb[1].mxu0 }
 0x10b   :  { %v918_v21 = vadd.f32 %v645_v14, %v336_v18 }
 0x10c   :  { %v917_v22 = vadd.f32 %v916_v17, %v819_v16 }
 0x10d   :  { %v919_v24 = vadd.f32 %v918_v21, %v612_v19 }
 0x10e   :  { %v625_v25 = vadd.f32 %v917_v22, %v623_v20 }
 0x10f   :  { %v624_v26 = vadd.f32 %v919_v24, %v622_v23 }
 0x110   :  { %628 = vst.msk [vmem:[#allocation2 + $0x8] sm:$0xff] %vm626_vm1, %v625_v25 }
 0x111   :  { %627 = vst.msk [vmem:[#allocation2] sm:$0xff] %vm626_vm1, %v624_v26 }
 0x112   :  { %942 = shalt.err (!%p939_p4)
}
 0x113   :  { %s943_s17 = scalar_lea.hbm %s1129_s4, 256 }
 0x114   :  { %p944_p5 = scmp.ne.s32.totalorder %s1129_s4, %s943_s17  ;;  %p947_p6 = scmp.lt.u32.totalorder %s943_s17, %s1129_s4 }
 0x116   :  { %p949_p7 = pnand %p947_p6, %p944_p5 }
 0x118   :  { %952 = shalt.err (!%p949_p7)
}
 0x119   :  { %s956_s21 = smov 128   ;;  %s957_s22 = smov 8  }
 0x11a   :  { %640 = dma.vmem_to_hbm [thread:$0]  %s635_s12, 256, %s1129_s4, [#allocation3], %s956_s21, %s956_s21, %s957_s22  }
 0x11b   :  { %953 = dma.done.wait [#allocation3], 256  }
 0x11c   :  { %954 = vsyncadd [#allocation3], 4294967040 }
 0x11d   :  { %644 = vsyncpa [#allocation3], 1 }

// kernel: transformer_cross_attn_forward.18
= control target key start
LH: loop header
LB: loop body
LE: loop exit
PB: predicated region body
PF: predicated region fallthrough
CT: control target
= control target key end

     0   :  { %s4536_s21 = smov 0   ;;  %s4538_s22 = smov 0   ;;  %s5025_s0 = inlined_call_operand.vmem [shape: f32[2,8,1,2,16], index: 0, kind: input, shape index: {}]   ;;  %s5026_s1 = inlined_call_operand.vmem [shape: f32[2,16,2,2,16], index: 1, kind: input, shape index: {}, may-alias: {1,2}]   ;;  %s5027_s2 = inlined_call_operand.vmem [shape: f32[2,16,2,2,16], index: 2, kind: input, shape index: {}, may-alias: {1,2}]   ;;  %s5028_s3 = inlined_call_operand.vmem [shape: f32[2,16,32], index: 3, kind: input, shape index: {}]   ;;  %s5029_s4 = inlined_call_operand.vmem [shape: f32[1,32], index: 4, kind: input, shape index: {}]   ;;  %s5030_s5 = inlined_call_operand.vmem [shape: f32[2,8,32], index: 5, kind: input, shape index: {}]   ;;  %s5031_s6 = inlined_call_operand.vmem [shape: f32[2,8,32], index: 6, kind: output, shape index: {}]  }
   0x1   :  { %s4540_s23 = smov 0   ;;  %s4542_s24 = smov 0  }
   0x2   :  { %s4544_s25 = smov 0  }
   0x3 LB: > { %s28_s26 = sadd.s32 1, %s4492_s24  ;;  %p70_p1 = scmp.ne.s32.totalorder %s4484_s22, %s4480_s21  ;;  %s4496_s25 = sphi %s4544_s25, %s16_s25   ;;  %s4492_s24 = sphi %s4542_s24, %s5036_s24   ;;  %s4488_s23 = sphi %s4540_s23, %s5035_s23   ;;  %s4484_s22 = sphi %s4538_s22, %s5034_s22   ;;  %s4480_s21 = sphi %s4536_s21, %s5033_s21  }
   0x4   : > { %p30_p0 = scmp.ge.s32.totalorder %s28_s26, 2  ;;  %p71_p2 = scmp.eq.s32.totalorder %s4496_s25, 0 }
   0x5   : > { %s63_s29 = sadd.s32 1, %s4484_s22  ;;  %p3838_p5 = scmp.ge.s32.totalorder %s4496_s25, 2 }
   0x6   : > { %s5038_s26 = smov (%p30_p0, %s28_s26), 0  ;;  %p4567_p3 = por %p71_p2, %p70_p1 }
   0x7   : > { %s60_s28 = ssub.s32 %s4492_s24, %s5038_s26  ;;  %226 = sbr.rel (%p3838_p5) target bundleno = 42 (0x2a), region = 24 }
   0x8   : > { %p61_p4 = scmp.eq.s32.totalorder %s60_s28, 0 }
   0xa   : > { %s4575_s30 = scalar_select %p61_p4, %s4484_s22, %s63_s29  }
   0xe   : > { %242 = sbr.rel (!%p4567_p3) target bundleno = 28 (0x1c), region = 32  ;;  %s244_s7 = sand.u32 (%p4567_p3), 1, %s4484_s22  }
   0xf   : > { %s3873_s8 = sshll.u32 (%p4567_p3), %s4492_s24, 6  ;;  %s3839_s9 = sshll.u32 (%p4567_p3), %s244_s7, 5 }
  0x10   : > { %s4585_s12 = scalar_lea.vmem (%p4567_p3), %s5026_s1, %s3873_s8  ;;  %s246_s13 = scalar_lea.vmem (%p4567_p3), [#allocation2], %s3839_s9 }
  0x11   : > { %v265_v0 = vld [vmem:[%s4585_s12] sm:$0x3] (%p4567_p3)  ;;  %v267_v1 = vld [vmem:[%s4585_s12 + $0x4] sm:$0x3] (%p4567_p3)  ;;  %v269_v2 = vld [vmem:[%s4585_s12 + $0x8] sm:$0x3] (%p4567_p3) }
  0x12   : > { %266 = vst [vmem:[%s246_s13] sm:$0x3] (%p4567_p3), %v265_v0  ;;  %268 = vst [vmem:[%s246_s13 + $0x2] sm:$0x3] (%p4567_p3), %v267_v1  ;;  %v271_v3 = vld [vmem:[%s4585_s12 + $0xc] sm:$0x3] (%p4567_p3) }
  0x13   : > { %v273_v4 = vld [vmem:[%s4585_s12 + $0x10] sm:$0x3] (%p4567_p3)  ;;  %270 = vst [vmem:[%s246_s13 + $0x4] sm:$0x3] (%p4567_p3), %v269_v2  ;;  %272 = vst [vmem:[%s246_s13 + $0x6] sm:$0x3] (%p4567_p3), %v271_v3 }
  0x14   : > { %274 = vst [vmem:[%s246_s13 + $0x8] sm:$0x3] (%p4567_p3), %v273_v4  ;;  %v275_v5 = vld [vmem:[%s4585_s12 + $0x14] sm:$0x3] (%p4567_p3)  ;;  %v277_v6 = vld [vmem:[%s4585_s12 + $0x18] sm:$0x3] (%p4567_p3) }
  0x15   : > { %v279_v7 = vld [vmem:[%s4585_s12 + $0x1c] sm:$0x3]  ;;  %276 = vst [vmem:[%s246_s13 + $0xa] sm:$0x3] %v275_v5  ;;  %278 = vst [vmem:[%s246_s13 + $0xc] sm:$0x3] %v277_v6 }
  0x16   : > { %280 = vst [vmem:[%s246_s13 + $0xe] sm:$0x3] %v279_v7  ;;  %v281_v8 = vld [vmem:[%s4585_s12 + $0x20] sm:$0x3]  ;;  %v283_v9 = vld [vmem:[%s4585_s12 + $0x24] sm:$0x3] }
  0x17   : > { %v285_v10 = vld [vmem:[%s4585_s12 + $0x28] sm:$0x3]  ;;  %282 = vst [vmem:[%s246_s13 + $0x10] sm:$0x3] %v281_v8  ;;  %284 = vst [vmem:[%s246_s13 + $0x12] sm:$0x3] %v283_v9 }
  0x18   : > { %286 = vst [vmem:[%s246_s13 + $0x14] sm:$0x3] %v285_v10  ;;  %v287_v11 = vld [vmem:[%s4585_s12 + $0x2c] sm:$0x3]  ;;  %v289_v12 = vld [vmem:[%s4585_s12 + $0x30] sm:$0x3] }
  0x19   : > { %v291_v13 = vld [vmem:[%s4585_s12 + $0x34] sm:$0x3]  ;;  %288 = vst [vmem:[%s246_s13 + $0x16] sm:$0x3] %v287_v11  ;;  %290 = vst [vmem:[%s246_s13 + $0x18] sm:$0x3] %v289_v12 }
  0x1a   : > { %292 = vst [vmem:[%s246_s13 + $0x1a] sm:$0x3] %v291_v13  ;;  %v293_v14 = vld [vmem:[%s4585_s12 + $0x38] sm:$0x3]  ;;  %v295_v15 = vld [vmem:[%s4585_s12 + $0x3c] sm:$0x3] }
  0x1b   : > { %294 = vst [vmem:[%s246_s13 + $0x1c] sm:$0x3] %v293_v14  ;;  %296 = vst [vmem:[%s246_s13 + $0x1e] sm:$0x3] %v295_v15 }
  0x1c PF: > { %351 = sbr.rel (!%p4567_p3) target bundleno = 42 (0x2a), region = 73  ;;  %s353_s14 = sand.u32 (%p4567_p3), 1, %s4484_s22  }
  0x1d   : > { %s3874_s15 = sshll.u32 (%p4567_p3), %s4492_s24, 6  ;;  %s3842_s16 = sshll.u32 (%p4567_p3), %s353_s14, 5 }
  0x1e   : > { %s4610_s19 = scalar_lea.vmem (%p4567_p3), %s5027_s2, %s3874_s15  ;;  %s355_s20 = scalar_lea.vmem (%p4567_p3), [#allocation3], %s3842_s16 }
  0x1f   : > { %v3845_v16 = vld [vmem:[%s4610_s19 + $0x2] sm:$0x3] (%p4567_p3)  ;;  %v3846_v17 = vld [vmem:[%s4610_s19 + $0x6] sm:$0x3] (%p4567_p3)  ;;  %v3847_v18 = vld [vmem:[%s4610_s19 + $0xa] sm:$0x3] (%p4567_p3) }
  0x20   : > { %376 = vst [vmem:[%s355_s20] sm:$0x3] (%p4567_p3), %v3845_v16  ;;  %378 = vst [vmem:[%s355_s20 + $0x2] sm:$0x3] (%p4567_p3), %v3846_v17  ;;  %v3848_v19 = vld [vmem:[%s4610_s19 + $0xe] sm:$0x3] (%p4567_p3) }
  0x21   : > { %v3849_v20 = vld [vmem:[%s4610_s19 + $0x12] sm:$0x3] (%p4567_p3)  ;;  %380 = vst [vmem:[%s355_s20 + $0x4] sm:$0x3] (%p4567_p3), %v3847_v18  ;;  %382 = vst [vmem:[%s355_s20 + $0x6] sm:$0x3] (%p4567_p3), %v3848_v19 }
  0x22   : > { %384 = vst [vmem:[%s355_s20 + $0x8] sm:$0x3] (%p4567_p3), %v3849_v20  ;;  %v3850_v21 = vld [vmem:[%s4610_s19 + $0x16] sm:$0x3] (%p4567_p3)  ;;  %v3851_v22 = vld [vmem:[%s4610_s19 + $0x1a] sm:$0x3] (%p4567_p3) }
  0x23   : > { %v3852_v23 = vld [vmem:[%s4610_s19 + $0x1e] sm:$0x3]  ;;  %386 = vst [vmem:[%s355_s20 + $0xa] sm:$0x3] %v3850_v21  ;;  %388 = vst [vmem:[%s355_s20 + $0xc] sm:$0x3] %v3851_v22 }
  0x24   : > { %390 = vst [vmem:[%s355_s20 + $0xe] sm:$0x3] %v3852_v23  ;;  %v3853_v24 = vld [vmem:[%s4610_s19 + $0x22] sm:$0x3]  ;;  %v3854_v25 = vld [vmem:[%s4610_s19 + $0x26] sm:$0x3] }
  0x25   : > { %v3855_v26 = vld [vmem:[%s4610_s19 + $0x2a] sm:$0x3]  ;;  %392 = vst [vmem:[%s355_s20 + $0x10] sm:$0x3] %v3853_v24  ;;  %394 = vst [vmem:[%s355_s20 + $0x12] sm:$0x3] %v3854_v25 }
  0x26   : > { %396 = vst [vmem:[%s355_s20 + $0x14] sm:$0x3] %v3855_v26  ;;  %v3856_v27 = vld [vmem:[%s4610_s19 + $0x2e] sm:$0x3]  ;;  %v3857_v28 = vld [vmem:[%s4610_s19 + $0x32] sm:$0x3] }
  0x27   : > { %v3858_v29 = vld [vmem:[%s4610_s19 + $0x36] sm:$0x3]  ;;  %398 = vst [vmem:[%s355_s20 + $0x16] sm:$0x3] %v3856_v27  ;;  %400 = vst [vmem:[%s355_s20 + $0x18] sm:$0x3] %v3857_v28 }
  0x28   : > { %402 = vst [vmem:[%s355_s20 + $0x1a] sm:$0x3] %v3858_v29  ;;  %v3859_v30 = vld [vmem:[%s4610_s19 + $0x3a] sm:$0x3]  ;;  %v3860_v31 = vld [vmem:[%s4610_s19 + $0x3e] sm:$0x3] }
  0x29   : > { %404 = vst [vmem:[%s355_s20 + $0x1c] sm:$0x3] %v3859_v30  ;;  %406 = vst [vmem:[%s355_s20 + $0x1e] sm:$0x3] %v3860_v31 }
  0x2a PF: > { %p3861_p6 = scmp.ge.s32.totalorder %s4496_s25, 1  ;;  %p470_p7 = scmp.lt.s32.totalorder %s4496_s25, 3 }
  0x2c   : > { %p471_p8 = pnand %p3861_p6, %p470_p7 }
  0x2d   : > { %s477_s27 = sand.u32 (!%p471_p8), 1, %s4480_s21   ;;  %v4498_v32 = vmov (!%p471_p8), 0.0|0.0   ;;  %vm625_vm0 = vcmask (!%p471_p8), 1041409   ;;  %vm628_vm1 = vcmask (!%p471_p8), 1042434   ;;  %vm631_vm2 = vcmask (!%p471_p8), 1043459   ;;  %p536_p9 = scmp.lt.s32.totalorder (!%p471_p8), %s4488_s23, 1 }
  0x2e   : > { %474 = sbr.rel (%p471_p8) target bundleno = 1334 (0x536), region = 118  ;;  %4236 = vmatprep.subr.bf16.mxu0 (!%p471_p8), %v4498_v32  ;;  %s4632_s28 = sshll.u32 (!%p471_p8), %s477_s27, 5  ;;  %4254 = vmatprep.subr.bf16.mxu1 (!%p471_p8), %v4498_v32  ;;  %vm634_vm3 = vcmask (!%p471_p8), 1044484   ;;  %vm637_vm4 = vcmask (!%p471_p8), 1045509   ;;  %vm4499_vm5 = vmmov (!%p471_p8), 0   ;;  %v4500_v33 = vmov (!%p471_p8), 0.0  }
  0x2f   : > { %3988 = vmatprep.mubr.msk.f32.mxu0 (!%p471_p8), %vm4499_vm5, %v4500_v33  ;;  %4030 = vmatprep.mubr.msk.f32.mxu1 (!%p471_p8), %vm4499_vm5, %v4500_v33  ;;  %s4641_s21 = scalar_lea.vmem (!%p471_p8), [#allocation2], %s4632_s28  ;;  %vm640_vm6 = vcmask (!%p471_p8), 1046534   ;;  %vm643_vm7 = vcmask (!%p471_p8), 1047559   ;;  %vm689_vm8 = vcmask (!%p471_p8), 130048   ;;  %s4826_s10 = scalar_lea.vmem (!%p471_p8), [#allocation3], %s4632_s28  ;;  %vm3703_vm9 = vcmask (!%p471_p8), 261120  }
  0x30   : > { %v585_v34 = vld [vmem:[%s4641_s21 + $0x2] sm:$0x1] (!%p471_p8)  ;;  %v586_v35 = vld [vmem:[%s4641_s21 + $0x4] sm:$0x1] (!%p471_p8)  ;;  %v587_v36 = vld [vmem:[%s4641_s21 + $0x6] sm:$0x1] (!%p471_p8) }
  0x31   : > { %v584_v37 = vld [vmem:[%s4641_s21] sm:$0x1] (!%p471_p8)  ;;  %v588_v38 = vld [vmem:[%s4641_s21 + $0x8] sm:$0x1] (!%p471_p8)  ;;  %v589_v39 = vld [vmem:[%s4641_s21 + $0xa] sm:$0x1] (!%p471_p8) }
  0x32   : > { %v590_v40 = vld [vmem:[%s4641_s21 + $0xc] sm:$0x1] (!%p471_p8)  ;;  %v591_v41 = vld [vmem:[%s4641_s21 + $0xe] sm:$0x1] (!%p471_p8)  ;;  %v592_v42 = vld [vmem:[%s4641_s21 + $0x10] sm:$0x1] (!%p471_p8) }
  0x33   : > { %v593_v43 = vld [vmem:[%s4641_s21 + $0x12] sm:$0x1] (!%p471_p8)  ;;  %v594_v44 = vld [vmem:[%s4641_s21 + $0x14] sm:$0x1] (!%p471_p8)  ;;  %v595_v45 = vld [vmem:[%s4641_s21 + $0x16] sm:$0x1] (!%p471_p8) }
  0x34   : > { %v596_v46 = vld [vmem:[%s4641_s21 + $0x18] sm:$0x1] (!%p471_p8)  ;;  %v597_v47 = vld [vmem:[%s4641_s21 + $0x1a] sm:$0x1] (!%p471_p8)  ;;  %v598_v48 = vld [vmem:[%s4641_s21 + $0x1c] sm:$0x1] (!%p471_p8) }
  0x35   : > { %v599_v49 = vld [vmem:[%s4641_s21 + $0x1e] sm:$0x1]  ;;  %v661_v50 = vrot.slane %v585_v34, 7  ;;  %v663_v51 = vrot.slane %v586_v35, 6  ;;  %v665_v52 = vrot.slane %v587_v36, 5  ;;  %v667_v53 = vrot.slane %v588_v38, 4 }
  0x36   : > { %v669_v54 = vrot.slane %v589_v39, 3  ;;  %v671_v55 = vrot.slane %v590_v40, 2  ;;  %v675_v56 = vrot.slane %v593_v43, 7  ;;  %s5040_s23 = smov (!%p536_p9, %s4488_s23), 1  ;;  %v677_v58 = vrot.slane %v594_v44, 6 }
  0x37   : > { %v662_v57 = vsel %vm625_vm0, %v661_v50, %v584_v37  ;;  %v679_v59 = vrot.slane %v595_v45, 5  ;;  %v681_v60 = vrot.slane %v596_v46, 4  ;;  %v673_v62 = vrot.slane %v591_v41, 1  ;;  %s3875_s29 = sshll.u32 %s5040_s23, 4  ;;  %s3866_s19 = sshll.u32 %s5040_s23, 3 }
  0x38   : > { %v664_v61 = vsel %vm628_vm1, %v663_v51, %v662_v57  ;;  %v676_v63 = vsel %vm625_vm0, %v675_v56, %v592_v42  ;;  %v683_v0 = vrot.slane %v597_v47, 3  ;;  %v685_v3 = vrot.slane %v598_v48, 2  ;;  %s4673_s9 = scalar_lea.vmem %s5025_s0, %s3875_s29  ;;  %s551_s28 = scalar_lea.vmem %s5030_s5, %s3866_s19 }
  0x39   : > { %v666_v1 = vsel %vm631_vm2, %v665_v52, %v664_v61  ;;  %v678_v2 = vsel %vm628_vm1, %v677_v58, %v676_v63  ;;  %v687_v4 = vrot.slane %v599_v49, 1  ;;  %v568_v7 = vld [vmem:[%s4673_s9] sm:$0x1]  ;;  %v569_v8 = vld [vmem:[%s4673_s9 + $0x2] sm:$0x1] }
  0x3a   : > { %v668_v5 = vsel %vm634_vm3, %v667_v53, %v666_v1  ;;  %v680_v6 = vsel %vm631_vm2, %v679_v59, %v678_v2  ;;  %v570_v9 = vld [vmem:[%s4673_s9 + $0x4] sm:$0x1]  ;;  %v571_v12 = vld [vmem:[%s4673_s9 + $0x6] sm:$0x1]  ;;  %v572_v13 = vld [vmem:[%s4673_s9 + $0x8] sm:$0x1] }
  0x3b   : > { %v670_v10 = vsel %vm637_vm4, %v669_v54, %v668_v5  ;;  %v682_v11 = vsel %vm634_vm3, %v681_v60, %v680_v6  ;;  %v573_v14 = vld [vmem:[%s4673_s9 + $0xa] sm:$0x1]  ;;  %v574_v17 = vld [vmem:[%s4673_s9 + $0xc] sm:$0x1]  ;;  %v575_v18 = vld [vmem:[%s4673_s9 + $0xe] sm:$0x1] }
  0x3c   : > { %v672_v15 = vsel %vm640_vm6, %v671_v55, %v670_v10  ;;  %v684_v16 = vsel %vm637_vm4, %v683_v0, %v682_v11  ;;  %v576_v19 = vmul.f32 0.25, %v568_v7  ;;  %v577_v20 = vmul.f32 0.25, %v569_v8  ;;  %v2156_v0 = vld [vmem:[%s4641_s21 + $0x3] sm:$0x1]  ;;  %v2164_v1 = vld [vmem:[%s4641_s21 + $0x13] sm:$0x1] }
  0x3d   : > { %v674_v21 = vsel %vm643_vm7, %v673_v62, %v672_v15  ;;  %v686_v22 = vsel %vm640_vm6, %v685_v3, %v684_v16  ;;  %v578_v23 = vmul.f32 0.25, %v570_v9  ;;  %v579_v24 = vmul.f32 0.25, %v571_v12  ;;  %v2140_v62 = vld [vmem:[%s4673_s9 + $0x3] sm:$0x1]  ;;  %v2157_v3 = vld [vmem:[%s4641_s21 + $0x5] sm:$0x1] }
  0x3e   : > { %v688_v25 = vsel %vm643_vm7, %v687_v4, %v686_v22  ;;  %v692_v26 = vsel %vm689_vm8, %v674_v21, 0  ;;  %v580_v27 = vmul.f32 0.25, %v572_v13  ;;  %v581_v28 = vmul.f32 0.25, %v573_v14  ;;  %v2141_v4 = vld [vmem:[%s4673_s9 + $0x5] sm:$0x1] }
  0x3f   : > { %v694_v29 = vsel %vm689_vm8, %v688_v25, 0  ;;  %v697_v30 = vand.u32 4294901760, %v692_v26  ;;  %v582_v31 = vmul.f32 0.25, %v574_v17  ;;  %v583_v34 = vmul.f32 0.25, %v575_v18  ;;  %v2165_v7 = vld [vmem:[%s4641_s21 + $0x15] sm:$0x1] }
  0x40   : > { %v700_v35 = vand.u32 4294901760, %v694_v29  ;;  %v624_v36 = vrot.slane %v577_v20, 7  ;;  %v627_v37 = vrot.slane %v578_v23, 6  ;;  %v630_v38 = vrot.slane %v579_v24, 5  ;;  %v2139_v10 = vld [vmem:[%s4673_s9 + $0x1] sm:$0x1] }
  0x41   : > { %v4694_v39 = vsub.f32 %v692_v26, %v697_v30  ;;  %v633_v40 = vrot.slane %v580_v27, 4  ;;  %v636_v44 = vrot.slane %v581_v28, 3  ;;  %v639_v46 = vrot.slane %v582_v31, 2  ;;  %v2155_v12 = vld [vmem:[%s4641_s21 + $0x1] sm:$0x1] }
  0x42   : > { %v4696_v41 = vpack.c.bf16 %v700_v35, %v697_v30  ;;  %v4698_v42 = vsub.f32 %v694_v29, %v700_v35  ;;  %v626_v43 = vsel %vm625_vm0, %v624_v36, %v576_v19  ;;  %v642_v48 = vrot.slane %v583_v34, 1  ;;  %v2163_v13 = vld [vmem:[%s4641_s21 + $0x11] sm:$0x1]  ;;  %v2158_v14 = vld [vmem:[%s4641_s21 + $0x7] sm:$0x1] }
  0x43   : > { %v629_v45 = vsel %vm628_vm1, %v627_v37, %v626_v43  ;;  %v776_v50 = vand.u32 4294901760, %v4694_v39  ;;  %v2148_v5 = vmul.f32 0.25, %v2140_v62  ;;  %v2225_v8 = vrot.slane %v2156_v0, 7  ;;  %v2142_v15 = vld [vmem:[%s4673_s9 + $0x7] sm:$0x1] }
  0x44   : > { %4238 = vmatpush3.bf16.xpose.msra.mxu0 %v4696_v41  ;;  %v632_v47 = vsel %vm631_vm2, %v630_v38, %v629_v45  ;;  %v783_v51 = vand.u32 4294901760, %v4698_v42  ;;  %v2239_v9 = vrot.slane %v2164_v1, 7  ;;  %v2149_v16 = vmul.f32 0.25, %v2141_v4  ;;  %v2166_v17 = vld [vmem:[%s4641_s21 + $0x17] sm:$0x1] }
  0x45   : > { %4239 = vmatprep.subr.bf16.mxu0 %v4498_v32  ;;  %v635_v49 = vsel %vm634_vm3, %v633_v40, %v632_v47  ;;  %v777_v56 = vsub.f32 %v4694_v39, %v776_v50  ;;  %v2227_v18 = vrot.slane %v2157_v3, 6  ;;  %v2241_v19 = vrot.slane %v2165_v7, 6  ;;  %v2159_v24 = vld [vmem:[%s4641_s21 + $0x9] sm:$0x1]  ;;  %v2167_v27 = vld [vmem:[%s4641_s21 + $0x19] sm:$0x1] }
  0x46   : > { %v638_v52 = vsel %vm637_vm4, %v636_v44, %v635_v49  ;;  %v784_v57 = vsub.f32 %v4698_v42, %v783_v51  ;;  %v2147_v20 = vmul.f32 0.25, %v2139_v10  ;;  %v2195_v21 = vrot.slane %v2148_v5, 7  ;;  %v2143_v25 = vld [vmem:[%s4673_s9 + $0x9] sm:$0x1]  ;;  %v2160_v37 = vld [vmem:[%s4641_s21 + $0xb] sm:$0x1] }
  0x47   : > { %v641_v53 = vsel %vm640_vm6, %v639_v46, %v638_v52  ;;  %v778_v60 = vand.u32 4294901760, %v777_v56  ;;  %v2226_v22 = vsel %vm625_vm0, %v2225_v8, %v2155_v12  ;;  %v2240_v23 = vsel %vm625_vm0, %v2239_v9, %v2163_v13  ;;  %v2144_v38 = vld [vmem:[%s4673_s9 + $0xb] sm:$0x1]  ;;  %v2168_v43 = vld [vmem:[%s4641_s21 + $0x1b] sm:$0x1] }
  0x48   : > { %v644_v54 = vsel %vm643_vm7, %v642_v48, %v641_v53  ;;  %v785_v61 = vand.u32 4294901760, %v784_v57  ;;  %v2150_v26 = vmul.f32 0.25, %v2142_v15  ;;  %v2229_v28 = vrot.slane %v2158_v14, 5  ;;  %v2161_v52 = vld [vmem:[%s4641_s21 + $0xd] sm:$0x1] }
  0x49   : > { %v690_v55 = vsel %vm689_vm8, %v644_v54, 0  ;;  %v2243_v29 = vrot.slane %v2166_v17, 5  ;;  %v2197_v30 = vrot.slane %v2149_v16, 6  ;;  %v2228_v31 = vsel %vm628_vm1, %v2227_v18, %v2226_v22  ;;  %v2145_v53 = vld [vmem:[%s4673_s9 + $0xd] sm:$0x1] }
  0x4a   : > { %v4718_v58 = vand.u32 4294901760, %v690_v55  ;;  %v4240_v6 = vpack.c.bf16 %v785_v61, %v778_v60  ;;  %v2242_v34 = vsel %vm628_vm1, %v2241_v19, %v2240_v23  ;;  %v2196_v35 = vsel %vm625_vm0, %v2195_v21, %v2147_v20  ;;  %v2162_v1 = vld [vmem:[%s4641_s21 + $0xf] sm:$0x1]  ;;  %v2170_v4 = vld [vmem:[%s4641_s21 + $0x1f] sm:$0x1] }
  0x4b   : > { %v4243_v36 = vpack.c.bf16 %v4698_v42, %v4694_v39  ;;  %v2151_v40 = vmul.f32 0.25, %v2143_v25  ;;  %v2231_v44 = vrot.slane %v2159_v24, 4  ;;  %v2245_v45 = vrot.slane %v2167_v27, 4 }
  0x4c   : > { %v4721_v59 = vsub.f32 %v690_v55, %v4718_v58  ;;  %v2199_v46 = vrot.slane %v2150_v26, 5  ;;  %v2230_v47 = vsel %vm631_vm2, %v2229_v28, %v2228_v31  ;;  %v2244_v48 = vsel %vm631_vm2, %v2243_v29, %v2242_v34  ;;  %v2169_v55 = vld [vmem:[%s4641_s21 + $0x1d] sm:$0x1] }
  0x4d   : > { %v2198_v49 = vsel %vm628_vm1, %v2197_v30, %v2196_v35  ;;  %v2152_v54 = vmul.f32 0.25, %v2144_v38  ;;  %v2233_v56 = vrot.slane %v2160_v37, 3  ;;  %v2247_v57 = vrot.slane %v2168_v43, 3 }
  0x4e   : > { %v765_v63 = vand.u32 4294901760, %v4721_v59  ;;  %v2201_v60 = vrot.slane %v2151_v40, 4  ;;  %v2232_v61 = vsel %vm634_vm3, %v2231_v44, %v2230_v47  ;;  %v2246_v62 = vsel %vm634_vm3, %v2245_v45, %v2244_v48  ;;  %v609_v47 = vld [vmem:[%s4826_s10 + $0x12] sm:$0x1]  ;;  %v602_v48 = vld [vmem:[%s4826_s10 + $0x4] sm:$0x1] }
  0x4f   : > { %v2200_v0 = vsel %vm631_vm2, %v2199_v46, %v2198_v49  ;;  %v2153_v3 = vmul.f32 0.25, %v2145_v53  ;;  %v2235_v5 = vrot.slane %v2161_v52, 2  ;;  %v2203_v7 = vrot.slane %v2152_v54, 3  ;;  %v601_v46 = vld [vmem:[%s4826_s10 + $0x2] sm:$0x1] }
  0x50   : > { %v766_v2 = vsub.f32 %v4721_v59, %v765_v63  ;;  %v2234_v8 = vsel %vm637_vm4, %v2233_v56, %v2232_v61  ;;  %v2248_v9 = vsel %vm637_vm4, %v2247_v57, %v2246_v62  ;;  %v2202_v10 = vsel %vm634_vm3, %v2201_v60, %v2200_v0  ;;  %v610_v49 = vld [vmem:[%s4826_s10 + $0x14] sm:$0x1]  ;;  %v600_v54 = vld [vmem:[%s4826_s10] sm:$0x1]  ;;  %v608_v56 = vld [vmem:[%s4826_s10 + $0x10] sm:$0x1] }
  0x51   : > { %v2237_v12 = vrot.slane %v2162_v1, 1  ;;  %v2251_v13 = vrot.slane %v2170_v4, 1  ;;  %v2205_v14 = vrot.slane %v2153_v3, 2  ;;  %v2236_v15 = vsel %vm640_vm6, %v2235_v5, %v2234_v8  ;;  %v604_v57 = vld [vmem:[%s4826_s10 + $0x8] sm:$0x1] }
  0x52   : > { %v767_v11 = vand.u32 4294901760, %v766_v2  ;;  %v2146_v2 = vld [vmem:[%s4673_s9 + $0xf] sm:$0x1]  ;;  %v2204_v17 = vsel %vm637_vm4, %v2203_v7, %v2202_v10  ;;  %v4249_v22 = vpack.c.bf16 %v783_v51, %v776_v50  ;;  %v1180_v52 = vrot.slane %v601_v46, 7  ;;  %v611_v60 = vld [vmem:[%s4826_s10 + $0x16] sm:$0x1]  ;;  %s558_s9 = scalar_lea.vmem %s5031_s6, %s3866_s19 }
  0x53   : > { %v2238_v19 = vsel %vm643_vm7, %v2237_v12, %v2236_v15  ;;  %v2206_v21 = vsel %vm640_vm6, %v2205_v14, %v2204_v17  ;;  %v1194_v53 = vrot.slane %v609_v47, 7  ;;  %v612_v61 = vld [vmem:[%s4826_s10 + $0x18] sm:$0x1]  ;;  %v605_v0 = vld [vmem:[%s4826_s10 + $0xa] sm:$0x1] }
  0x54   : > { %3989 = vmatmul.mubr.f32.vlgmr.msra.gmra.mrb[0].mxu0 %v767_v11  ;;  %v2154_v11 = vmul.f32 0.25, %v2146_v2  ;;  %v2255_v23 = vsel %vm689_vm8, %v2238_v19, 0  ;;  %v1181_v62 = vsel %vm625_vm0, %v1180_v52, %v600_v54  ;;  %v613_v1 = vld [vmem:[%s4826_s10 + $0x1a] sm:$0x1]  ;;  %v1182_v2 = vrot.slane %v602_v48, 6 }
  0x55   : > { %4241 = vmatpush3.bf16.xpose.msra.mxu0 %v4240_v6  ;;  %3995 = vmatprep.mubr.msk.f32.mxu0 %vm4499_vm5, %v4500_v33  ;;  %v2249_v6 = vrot.slane %v2169_v55, 2  ;;  %v2260_v26 = vand.u32 4294901760, %v2255_v23  ;;  %v603_v55 = vld [vmem:[%s4826_s10 + $0x6] sm:$0x1]  ;;  %v606_v4 = vld [vmem:[%s4826_s10 + $0xc] sm:$0x1]  ;;  %v1195_v8 = vsel %vm625_vm0, %v1194_v53, %v608_v56 }
  0x56   : > { %4242 = vmatprep.subr.bf16.mxu0 %v4498_v32  ;;  %v2207_v18 = vrot.slane %v2154_v11, 1  ;;  %v1184_v3 = vrot.slane %v603_v55, 5  ;;  %v614_v5 = vld [vmem:[%s4826_s10 + $0x1c] sm:$0x1]  ;;  %v1188_v7 = vrot.slane %v605_v0, 3  ;;  %v1183_v11 = vsel %vm628_vm1, %v1182_v2, %v1181_v62  ;;  %v1674_v2 = vld [vmem:[%s5028_s3] sm:$0xff] }
  0x57   : > { %v2250_v16 = vsel %vm640_vm6, %v2249_v6, %v2248_v9  ;;  %v2338_v50 = vsub.f32 %v2255_v23, %v2260_v26  ;;  %v1186_v6 = vrot.slane %v604_v57, 4  ;;  %v607_v9 = vld [vmem:[%s4826_s10 + $0xe] sm:$0x1]  ;;  %v615_v10 = vld [vmem:[%s4826_s10 + $0x1e] sm:$0x1]  ;;  %v1190_v12 = vrot.slane %v606_v4, 2 }
  0x58   : > { %v2252_v20 = vsel %vm643_vm7, %v2251_v13, %v2250_v16  ;;  %v2208_v25 = vsel %vm643_vm7, %v2207_v18, %v2206_v21  ;;  %v1196_v13 = vrot.slane %v610_v49, 6  ;;  %v1185_v14 = vsel %vm631_vm2, %v1184_v3, %v1183_v11  ;;  %v1675_v3 = vld [vmem:[%s5028_s3 + $0x8] sm:$0xff] }
  0x59   : > { %v2257_v24 = vsel %vm689_vm8, %v2252_v20, 0  ;;  %v2253_v39 = vsel %vm689_vm8, %v2208_v25, 0  ;;  %v1192_v15 = vrot.slane %v607_v9, 1  ;;  %v1198_v16 = vrot.slane %v611_v60, 5 }
  0x5a   : > { %v2263_v27 = vand.u32 4294901760, %v2257_v24  ;;  %v2326_v42 = vand.u32 4294901760, %v2253_v39  ;;  %v1200_v17 = vrot.slane %v612_v61, 4  ;;  %v1187_v18 = vsel %vm634_vm3, %v1186_v6, %v1185_v14 }
  0x5b   : > { %v1197_v19 = vsel %vm628_vm1, %v1196_v13, %v1195_v8  ;;  %v1202_v20 = vrot.slane %v613_v1, 3  ;;  %v1204_v21 = vrot.slane %v614_v5, 2  ;;  %v1680_v4 = vand.u32 4294901760, %v1674_v2 }
  0x5c   : > { %3996 = vmatmul.mubr.f32.vlgmr.msra.gmra.mrb[0].mxu0 %v4718_v58  ;;  %v2345_v51 = vsub.f32 %v2257_v24, %v2263_v27  ;;  %v2327_v28 = vsub.f32 %v2253_v39, %v2326_v42  ;;  %v4291_v30 = vpack.c.bf16 %v2263_v27, %v2260_v26  ;;  %v1199_v23 = vsel %vm631_vm2, %v1198_v16, %v1197_v19 }
  0x5d   : > { %4244 = vmatpush3.bf16.xpose.msra.mxu0 %v4243_v36  ;;  %4002 = vmatprep.mubr.msk.f32.mxu0 %vm4499_vm5, %v4500_v33  ;;  %v1206_v24 = vrot.slane %v615_v10, 1  ;;  %v1201_v26 = vsel %vm634_vm3, %v1200_v17, %v1199_v23  ;;  %v1683_v5 = vand.u32 4294901760, %v1675_v3 }
  0x5e   : > { %4245 = vmatprep.subr.bf16.mxu0 %v4498_v32  ;;  %v2328_v29 = vand.u32 4294901760, %v2327_v28  ;;  %v4297_v40 = vpack.c.bf16 %v2345_v51, %v2338_v50  ;;  %v1203_v39 = vsel %vm637_vm4, %v1202_v20, %v1201_v26  ;;  %v2172_v26 = vld [vmem:[%s4826_s10 + $0x3] sm:$0x1] }
  0x5f   : > { %v4890_v6 = vpack.c.bf16 %v1683_v5, %v1680_v4  ;;  %v1765_v8 = vsub.f32 %v1675_v3, %v1683_v5 }
  0x60   : > { %v2329_v35 = vsub.f32 %v2327_v28, %v2328_v29 }
  0x61   : > { %v1766_v10 = vand.u32 4294901760, %v1765_v8 }
  0x62   : > { %v2330_v37 = vand.u32 4294901760, %v2329_v35 }
  0x64   : > { %4003 = vmatmul.mubr.f32.vlgmr.msra.gmra.mrb[0].mxu0 %v4721_v59  ;;  %v2339_v59 = vand.u32 4294901760, %v2338_v50 }
  0x65   : > { %4247 = vmatpush3.bf16.xpose.msra.mxu0 %v4696_v41  ;;  %4009 = vmatprep.mubr.msk.f32.mxu0 %vm4499_vm5, %v4500_v33 }
  0x66   : > { %4248 = vmatprep.subr.bf16.mxu0 %v4498_v32  ;;  %v2340_v31 = vsub.f32 %v2338_v50, %v2339_v59 }
  0x68   : > { %v2341_v36 = vand.u32 4294901760, %v2340_v31 }
  0x6c   : > { %4010 = vmatmul.mubr.f32.vlgmr.msra.gmra.mrb[0].mxu0 %v765_v63  ;;  %v2346_v63 = vand.u32 4294901760, %v2345_v51 }
  0x6d   : > { %4250 = vmatpush3.bf16.xpose.msra.mxu0 %v4249_v22  ;;  %4016 = vmatprep.mubr.msk.f32.mxu0 %vm4499_vm5, %v4500_v33  ;;  %v1189_v22 = vsel %vm637_vm4, %v1188_v7, %v1187_v18  ;;  %v1758_v7 = vsub.f32 %v1674_v2, %v1680_v4 }
  0x6e   : > { %4251 = vmatprep.subr.bf16.mxu0 %v4498_v32  ;;  %v2347_v34 = vsub.f32 %v2345_v51, %v2346_v63  ;;  %v1191_v25 = vsel %vm640_vm6, %v1190_v12, %v1189_v22  ;;  %v1767_v12 = vsub.f32 %v1765_v8, %v1766_v10 }
  0x6f   : > { %v1193_v27 = vsel %vm643_vm7, %v1192_v15, %v1191_v25  ;;  %v1759_v9 = vand.u32 4294901760, %v1758_v7  ;;  %v4279_v16 = vpack.c.bf16 %v1765_v8, %v1758_v7 }
  0x70   : > { %v1214_v50 = vand.u32 4294901760, %v1193_v27  ;;  %v1768_v14 = vand.u32 4294901760, %v1767_v12 }
  0x71   : > { %v1760_v11 = vsub.f32 %v1758_v7, %v1759_v9  ;;  %v4894_v17 = vpack.c.bf16 %v1766_v10, %v1759_v9 }
  0x73   : > { %v1761_v13 = vand.u32 4294901760, %v1760_v11 }
  0x74   : > { %4017 = vmatmul.mubr.f32.vlgmr.msra.gmra.mrb[0].mxu0 %v4718_v58 }
  0x75   : > { %4253 = vmatpush3.bf16.xpose.msra.mxu0 %v4696_v41  ;;  %4023 = vmatprep.mubr.msk.f32.mxu0 %vm4499_vm5, %v4500_v33  ;;  %v2348_v41 = vand.u32 4294901760, %v2347_v34  ;;  %v4276_v15 = vpack.c.bf16 %v1768_v14, %v1761_v13 }
  0x76   : > { %4290 = vmatprep.subr.bf16.mxu0 %v4498_v32 }
  0x77   : > { %v4294_v38 = vpack.c.bf16 %v2348_v41, %v2341_v36 }
  0x7c   : > { %4024 = vmatmul.mubr.f32.vlgmr.msra.gmra.mrb[0].mxu0 %v4718_v58  ;;  %v4303_v58 = vpack.c.bf16 %v2346_v63, %v2339_v59  ;;  %v1292_v59 = vsub.f32 %v1193_v27, %v1214_v50  ;;  %v2180_v27 = vld [vmem:[%s4826_s10 + $0x13] sm:$0x1] }
  0x7d   : > { %4292 = vmatpush3.bf16.xpose.msra.mxu0 %v4291_v30  ;;  %4114 = vmatprep.mubr.msk.f32.mxu0 %vm4499_vm5, %v4500_v33 }
  0x7e   : > { %4293 = vmatprep.subr.bf16.mxu0 %v4498_v32 }
  0x84   : > { %4115 = vmatmul.mubr.f32.vlgmr.msra.gmra.mrb[2].mxu0 %v2330_v37 }
  0x85   : > { %4295 = vmatpush3.bf16.xpose.msra.mxu0 %v4294_v38  ;;  %4121 = vmatprep.mubr.msk.f32.mxu0 %vm4499_vm5, %v4500_v33 }
  0x86   : > { %4296 = vmatprep.subr.bf16.mxu0 %v4498_v32 }
  0x8c   : > { %4122 = vmatmul.mubr.f32.vlgmr.msra.gmra.mrb[2].mxu0 %v2326_v42 }
  0x8d   : > { %4298 = vmatpush3.bf16.xpose.msra.mxu0 %v4297_v40  ;;  %4128 = vmatprep.mubr.msk.f32.mxu0 %vm4499_vm5, %v4500_v33 }
  0x8e   : > { %4299 = vmatprep.subr.bf16.mxu0 %v4498_v32 }
  0x94   : > { %4129 = vmatmul.mubr.f32.vlgmr.msra.gmra.mrb[2].mxu0 %v2327_v28 }
  0x95   : > { %4301 = vmatpush3.bf16.xpose.msra.mxu0 %v4291_v30  ;;  %4135 = vmatprep.mubr.msk.f32.mxu0 %vm4499_vm5, %v4500_v33 }
  0x96   : > { %4302 = vmatprep.subr.bf16.mxu0 %v4498_v32 }
  0x9c   : > { %4136 = vmatmul.mubr.f32.vlgmr.msra.gmra.mrb[2].mxu0 %v2328_v29 }
  0x9d   : > { %4304 = vmatpush3.bf16.xpose.msra.mxu0 %v4303_v58  ;;  %4142 = vmatprep.mubr.msk.f32.mxu0 %vm4499_vm5, %v4500_v33 }
  0x9e   : > { %4305 = vmatprep.subr.bf16.mxu0 %v4498_v32 }
  0xa4   : > { %4143 = vmatmul.mubr.f32.vlgmr.msra.gmra.mrb[2].mxu0 %v2326_v42 }
  0xa5   : > { %4307 = vmatpush3.bf16.xpose.msra.mxu0 %v4291_v30  ;;  %4149 = vmatprep.mubr.msk.f32.mxu0 %vm4499_vm5, %v4500_v33  ;;  %v1293_v30 = vand.u32 4294901760, %v1292_v59 }
  0xa7   : > { %v1294_v31 = vsub.f32 %v1292_v59, %v1293_v30 }
  0xa9   : > { %v1295_v35 = vand.u32 4294901760, %v1294_v31  ;;  %v2174_v31 = vld [vmem:[%s4826_s10 + $0x7] sm:$0x1] }
  0xac   : > { %4150 = vmatmul.mubr.f32.vlgmr.msra.gmra.mrb[2].mxu0 %v2326_v42  ;;  %v1205_v42 = vsel %vm640_vm6, %v1204_v21, %v1203_v39 }
  0xad   : > { %v1207_v51 = vsel %vm643_vm7, %v1206_v24, %v1205_v42 }
  0xae   : > { %v1217_v28 = vand.u32 4294901760, %v1207_v51 }
  0xb0   : > { %v4255_v63 = vpack.c.bf16 %v1217_v28, %v1214_v50  ;;  %v1299_v29 = vsub.f32 %v1207_v51, %v1217_v28  ;;  %v2173_v50 = vld [vmem:[%s4826_s10 + $0x5] sm:$0x1]  ;;  %v2181_v51 = vld [vmem:[%s4826_s10 + $0x15] sm:$0x1]  ;;  %v2743_v28 = vrot.slane %v2172_v26, 7 }
  0xb2   : > { %4256 = vmatpush3.bf16.msra.mxu1 %v4255_v63  ;;  %v1300_v34 = vand.u32 4294901760, %v1299_v29 }
  0xb3   : > { %4257 = vmatprep.subr.bf16.mxu1 %v4498_v32 }
  0xb4   : > { %v1301_v36 = vsub.f32 %v1299_v29, %v1300_v34 }
  0xb6   : > { %v1302_v41 = vand.u32 4294901760, %v1301_v36  ;;  %v2759_v36 = vrot.slane %v2181_v51, 6  ;;  %v3869_v51 = vld [vmem:[%s5028_s3 + $0x10] sm:$0xff] }
  0xb8   : > { %v4258_v40 = vpack.c.bf16 %v1302_v41, %v1295_v35  ;;  %v2745_v35 = vrot.slane %v2173_v50, 6 }
 0x14f   : > { %v4821_v43 = vpop.f32.mrb[0].mxu0 }
 0x150   : > { %v4025_v44 = vpop.f32.mrb[1].mxu0  ;;  %v1155_v45 = vsel %vm689_vm8, %v4821_v43, -inf }
 0x151   : > { %1156 = vmax.xlane.f32.xlu0 %v1155_v45  ;;  %v4261_v44 = vpack.c.bf16 %v1299_v29, %v1292_v59  ;;  %v4267_v45 = vpack.c.bf16 %v1300_v34, %v1293_v30  ;;  %v2757_v59 = vrot.slane %v2180_v27, 7  ;;  %v2179_v29 = vld [vmem:[%s4826_s10 + $0x11] sm:$0x1]  ;;  %v2182_v34 = vld [vmem:[%s4826_s10 + $0x17] sm:$0x1] }
 0x17f   : > { %v2714_v37 = vpop.f32.mrb[2].mxu0 }
 0x180   : > { %v2718_v38 = vsel %vm689_vm8, %v2714_v37, -inf  ;;  %v4151_v58 = vpop.f32.mrb[3].mxu0 }
 0x181   : > { %2719 = vmax.xlane.f32.xlu1 %v2718_v38  ;;  %v2175_v38 = vld [vmem:[%s4826_s10 + $0x9] sm:$0x1]  ;;  %v2747_v58 = vrot.slane %v2174_v31, 5 }
 0x1de   : > { %v1157_v46 = vpop.xlane.xlu0 %1156 }
 0x1df   : > { %v1158_v47 = vsub.f32 %v4821_v43, %v1157_v46 }
 0x1e1   : > { %v1159_v48 = vmul.f32 1.442695, %v1158_v47  ;;  %v2176_v47 = vld [vmem:[%s4826_s10 + $0xb] sm:$0x1] }
 0x1e3   : > { %4450 = vpow2.f32 %v1159_v48  ;;  %v2184_v48 = vld [vmem:[%s4826_s10 + $0x1b] sm:$0x1] }
 0x1ed   : > { %v4451_v49 = vpop.eup %4450 }
 0x1ee   : > { %v1161_v52 = vsel %vm689_vm8, %v4451_v49, 0.0  ;;  %v1211_v53 = vsel %vm689_vm8, %v4451_v49, 0  ;;  %v2749_v49 = vrot.slane %v2175_v38, 4 }
 0x1ef   : > { %1162 = vadd.xlane.f32.xlu0 %v1161_v52  ;;  %v1280_v54 = vand.u32 4294901760, %v1211_v53 }
 0x1f1   : > { %v1281_v55 = vsub.f32 %v1211_v53, %v1280_v54 }
 0x1f3   : > { %v1282_v56 = vand.u32 4294901760, %v1281_v55 }
 0x1f5   : > { %v1283_v57 = vsub.f32 %v1281_v55, %v1282_v56 }
 0x1f7   : > { %v1284_v60 = vand.u32 4294901760, %v1283_v57  ;;  %v2751_v57 = vrot.slane %v2176_v47, 3 }
 0x1f9   : > { %4031 = vmatmul.mubr.f32.vlgmr.msra.gmra.mrb[0].mxu1 %v1284_v60  ;;  %v2765_v60 = vrot.slane %v2184_v48, 3 }
 0x1fa   : > { %4259 = vmatpush3.bf16.msra.mxu1 %v4258_v40  ;;  %4037 = vmatprep.mubr.msk.f32.mxu1 %vm4499_vm5, %v4500_v33  ;;  %v2183_v40 = vld [vmem:[%s4826_s10 + $0x19] sm:$0x1] }
 0x1fb   : > { %4260 = vmatprep.subr.bf16.mxu1 %v4498_v32  ;;  %v2763_v52 = vrot.slane %v2183_v40, 4 }
 0x201   : > { %4038 = vmatmul.mubr.f32.vlgmr.msra.gmra.mrb[0].mxu1 %v1280_v54 }
 0x202   : > { %4262 = vmatpush3.bf16.msra.mxu1 %v4261_v44  ;;  %4044 = vmatprep.mubr.msk.f32.mxu1 %vm4499_vm5, %v4500_v33  ;;  %v2761_v44 = vrot.slane %v2182_v34, 5 }
 0x203   : > { %4263 = vmatprep.subr.bf16.mxu1 %v4498_v32 }
 0x209   : > { %4045 = vmatmul.mubr.f32.vlgmr.msra.gmra.mrb[0].mxu1 %v1281_v55  ;;  %v2177_v55 = vld [vmem:[%s4826_s10 + $0xd] sm:$0x1] }
 0x20a   : > { %4265 = vmatpush3.bf16.msra.mxu1 %v4255_v63  ;;  %4051 = vmatprep.mubr.msk.f32.mxu1 %vm4499_vm5, %v4500_v33  ;;  %v2753_v2 = vrot.slane %v2177_v55, 2 }
 0x20b   : > { %4266 = vmatprep.subr.bf16.mxu1 %v4498_v32 }
 0x20e   : > { %v2720_v43 = vpop.xlane.xlu1 %2719 }
 0x20f   : > { %v2721_v61 = vsub.f32 %v2714_v37, %v2720_v43  ;;  %v2758_v37 = vsel %vm625_vm0, %v2757_v59, %v2179_v29  ;;  %v3244_v59 = vand.u32 4294901760, %v3869_v51 }
 0x210   : > { %v2760_v46 = vsel %vm628_vm1, %v2759_v36, %v2758_v37 }
 0x211   : > { %4052 = vmatmul.mubr.f32.vlgmr.msra.gmra.mrb[0].mxu1 %v1282_v56  ;;  %v2722_v62 = vmul.f32 1.442695, %v2721_v61  ;;  %v2185_v56 = vld [vmem:[%s4826_s10 + $0x1d] sm:$0x1] }
 0x212   : > { %4268 = vmatpush3.bf16.msra.mxu1 %v4267_v45  ;;  %4058 = vmatprep.mubr.msk.f32.mxu1 %vm4499_vm5, %v4500_v33  ;;  %v2767_v3 = vrot.slane %v2185_v56, 2 }
 0x213   : > { %4269 = vmatprep.subr.bf16.mxu1 %v4498_v32  ;;  %4452 = vpow2.f32 %v2722_v62  ;;  %v2178_v62 = vld [vmem:[%s4826_s10 + $0xf] sm:$0x1] }
 0x214   : > { %v2755_v7 = vrot.slane %v2178_v62, 1 }
 0x219   : > { %4059 = vmatmul.mubr.f32.vlgmr.msra.gmra.mrb[0].mxu1 %v1280_v54 }
 0x21a   : > { %4271 = vmatpush3.bf16.msra.mxu1 %v4255_v63  ;;  %4065 = vmatprep.mubr.msk.f32.mxu1 %vm4499_vm5, %v4500_v33  ;;  %v2171_v63 = vld [vmem:[%s4826_s10 + $0x1] sm:$0x1] }
 0x21b   : > { %4272 = vmatprep.subr.bf16.mxu1 %v4498_v32  ;;  %v2744_v41 = vsel %vm625_vm0, %v2743_v28, %v2171_v63  ;;  %v3870_v28 = vld [vmem:[%s5028_s3 + $0x18] sm:$0xff] }
 0x21c   : > { %v2746_v45 = vsel %vm628_vm1, %v2745_v35, %v2744_v41  ;;  %v3247_v63 = vand.u32 4294901760, %v3870_v28 }
 0x21d   : > { %v4878_v0 = vpop.eup %4452  ;;  %v2748_v53 = vsel %vm631_vm2, %v2747_v58, %v2746_v45 }
 0x21e   : > { %v2724_v1 = vsel %vm689_vm8, %v4878_v0, 0.0  ;;  %v2750_v43 = vsel %vm634_vm3, %v2749_v49, %v2748_v53  ;;  %v4327_v29 = vpack.c.bf16 %v3247_v63, %v3244_v59  ;;  %v3329_v31 = vsub.f32 %v3870_v28, %v3247_v63 }
 0x21f   : > { %2725 = vadd.xlane.f32.xlu1 %v2724_v1  ;;  %v2186_v1 = vld [vmem:[%s4826_s10 + $0x1f] sm:$0x1]  ;;  %v2752_v4 = vsel %vm637_vm4, %v2751_v57, %v2750_v43  ;;  %v560_v43 = vld [vmem:[%s551_s28] sm:$0xff] }
 0x220   : > { %v2769_v8 = vrot.slane %v2186_v1, 1  ;;  %v2754_v9 = vsel %vm640_vm6, %v2753_v2, %v2752_v4  ;;  %v3330_v35 = vand.u32 4294901760, %v3329_v31 }
 0x221   : > { %4066 = vmatmul.mubr.f32.vlgmr.msra.gmra.mrb[0].mxu1 %v1280_v54  ;;  %v2762_v54 = vsel %vm631_vm2, %v2761_v44, %v2760_v46  ;;  %v2756_v11 = vsel %vm643_vm7, %v2755_v7, %v2754_v9 }
 0x222   : > { %4072 = vmatprep.mubr.msk.f32.mxu1 %vm4499_vm5, %v4500_v33  ;;  %4274 = vmatpush3.bf16.msra.mxu1 %v4890_v6  ;;  %v2764_v61 = vsel %vm634_vm3, %v2763_v52, %v2762_v54  ;;  %v2777_v13 = vand.u32 4294901760, %v2756_v11  ;;  %v3331_v41 = vsub.f32 %v3329_v31, %v3330_v35 }
 0x223   : > { %4275 = vmatprep.subr.bf16.mxu1 %v4498_v32  ;;  %v2766_v5 = vsel %vm637_vm4, %v2765_v60, %v2764_v61  ;;  %v3868_v60 = vld [vmem:[%s5029_s4] ss:$0 sm:$0xff] }
 0x224   : > { %v2768_v10 = vsel %vm640_vm6, %v2767_v3, %v2766_v5  ;;  %v3332_v38 = vand.u32 4294901760, %v3331_v41  ;;  %v567_v61 = vadd.f32 %v3868_v60, %v560_v43 }
 0x225   : > { %v2770_v12 = vsel %vm643_vm7, %v2769_v8, %v2768_v10 }
 0x226   : > { %v2780_v14 = vand.u32 4294901760, %v2770_v12 }
 0x27c   : > { %v1163_v18 = vpop.xlane.xlu0 %1162 }
 0x27d   : > { %4454 = vrcp.f32 %v1163_v18  ;;  %v2862_v18 = vsub.f32 %v2770_v12, %v2780_v14 }
 0x287   : > { %v4455_v19 = vpop.eup %4454 }
 0x2ac   : > { %v2726_v45 = vpop.xlane.xlu1 %2725 }
 0x2ad   : > { %4456 = vrcp.f32 %v2726_v45 }
 0x2b7   : > { %v4457_v46 = vpop.eup %4456 }
 0x2f4   : > { %v1668_v20 = vpop.f32.mrb[0].mxu1 }
 0x2f5   : > { %v1673_v21 = vmul.f32 %v4455_v19, %v1668_v20  ;;  %v4067_v22 = vpop.f32.mrb[1].mxu1 }
 0x2f7   : > { %v1677_v23 = vsel %vm689_vm8, %v1673_v21, 0  ;;  %v2863_v21 = vand.u32 4294901760, %v2862_v18 }
 0x2f8   : > { %v4897_v24 = vand.u32 4294901760, %v1677_v23 }
 0x2fa   : > { %v4900_v25 = vsub.f32 %v1677_v23, %v4897_v24 }
 0x2fc   : > { %v1748_v39 = vand.u32 4294901760, %v4900_v25 }
 0x2fe   : > { %v1749_v42 = vsub.f32 %v4900_v25, %v1748_v39 }
 0x300   : > { %v1750_v30 = vand.u32 4294901760, %v1749_v42 }
 0x302   : > { %4073 = vmatmul.mubr.f32.vlgmr.msra.gmra.mrb[2].mxu1 %v1750_v30  ;;  %v3322_v30 = vsub.f32 %v3869_v51, %v3244_v59 }
 0x303   : > { %4277 = vmatpush3.bf16.msra.mxu1 %v4276_v15  ;;  %4079 = vmatprep.mubr.msk.f32.mxu1 %vm4499_vm5, %v4500_v33  ;;  %v2774_v15 = vsel %vm689_vm8, %v4878_v0, 0 }
 0x304   : > { %4278 = vmatprep.subr.bf16.mxu1 %v4498_v32  ;;  %v2843_v19 = vand.u32 4294901760, %v2774_v15  ;;  %v3323_v34 = vand.u32 4294901760, %v3322_v30  ;;  %v4333_v58 = vpack.c.bf16 %v3329_v31, %v3322_v30 }
 0x306   : > { %v2844_v22 = vsub.f32 %v2774_v15, %v2843_v19  ;;  %v3324_v36 = vsub.f32 %v3322_v30, %v3323_v34  ;;  %v4339_v44 = vpack.c.bf16 %v3330_v35, %v3323_v34 }
 0x308   : > { %v2845_v23 = vand.u32 4294901760, %v2844_v22  ;;  %v3325_v37 = vand.u32 4294901760, %v3324_v36 }
 0x30a   : > { %4080 = vmatmul.mubr.f32.vlgmr.msra.gmra.mrb[2].mxu1 %v4897_v24  ;;  %v4330_v40 = vpack.c.bf16 %v3332_v38, %v3325_v37 }
 0x30b   : > { %4280 = vmatpush3.bf16.msra.mxu1 %v4279_v16  ;;  %4086 = vmatprep.mubr.msk.f32.mxu1 %vm4499_vm5, %v4500_v33  ;;  %v2855_v16 = vsub.f32 %v2756_v11, %v2777_v13 }
 0x30c   : > { %4281 = vmatprep.subr.bf16.mxu1 %v4498_v32 }
 0x30d   : > { %v2856_v20 = vand.u32 4294901760, %v2855_v16  ;;  %v4315_v50 = vpack.c.bf16 %v2862_v18, %v2855_v16 }
 0x30f   : > { %v2857_v0 = vsub.f32 %v2855_v16, %v2856_v20 }
 0x311   : > { %v2858_v26 = vand.u32 4294901760, %v2857_v0 }
 0x312   : > { %4087 = vmatmul.mubr.f32.vlgmr.msra.gmra.mrb[2].mxu1 %v4900_v25  ;;  %v4309_v25 = vpack.c.bf16 %v2780_v14, %v2777_v13 }
 0x313   : > { %4283 = vmatpush3.bf16.msra.mxu1 %v4890_v6  ;;  %4093 = vmatprep.mubr.msk.f32.mxu1 %vm4499_vm5, %v4500_v33 }
 0x314   : > { %4284 = vmatprep.subr.bf16.mxu1 %v4498_v32 }
 0x31a   : > { %4094 = vmatmul.mubr.f32.vlgmr.msra.gmra.mrb[2].mxu1 %v1748_v39  ;;  %v2846_v39 = vsub.f32 %v2844_v22, %v2845_v23 }
 0x31b   : > { %4286 = vmatpush3.bf16.msra.mxu1 %v4894_v17  ;;  %4100 = vmatprep.mubr.msk.f32.mxu1 %vm4499_vm5, %v4500_v33  ;;  %v2864_v17 = vsub.f32 %v2862_v18, %v2863_v21 }
 0x31c   : > { %4287 = vmatprep.subr.bf16.mxu1 %v4498_v32 }
 0x31d   : > { %v2865_v27 = vand.u32 4294901760, %v2864_v17 }
 0x31f   : > { %v4312_v42 = vpack.c.bf16 %v2865_v27, %v2858_v26 }
 0x322   : > { %4101 = vmatmul.mubr.f32.vlgmr.msra.gmra.mrb[2].mxu1 %v4897_v24 }
 0x323   : > { %4289 = vmatpush3.bf16.msra.mxu1 %v4890_v6  ;;  %4107 = vmatprep.mubr.msk.f32.mxu1 %vm4499_vm5, %v4500_v33  ;;  %v2847_v6 = vand.u32 4294901760, %v2846_v39 }
 0x324   : > { %4308 = vmatprep.subr.bf16.mxu1 %v4498_v32 }
 0x32a   : > { %4108 = vmatmul.mubr.f32.vlgmr.msra.gmra.mrb[2].mxu1 %v4897_v24  ;;  %v4321_v24 = vpack.c.bf16 %v2863_v21, %v2856_v20 }
 0x32b   : > { %4310 = vmatpush3.bf16.msra.mxu1 %v4309_v25  ;;  %4156 = vmatprep.mubr.msk.f32.mxu1 %vm4499_vm5, %v4500_v33 }
 0x32c   : > { %4311 = vmatprep.subr.bf16.mxu1 %v4498_v32 }
 0x32e   : > { %4157 = vmatmul.mubr.f32.vlgmr.msra.gmra.mrb[4].mxu1 %v2847_v6 }
 0x32f   : > { %4313 = vmatpush3.bf16.msra.mxu1 %v4312_v42  ;;  %4163 = vmatprep.mubr.msk.f32.mxu1 %vm4499_vm5, %v4500_v33 }
 0x330   : > { %4314 = vmatprep.subr.bf16.mxu1 %v4498_v32 }
 0x336   : > { %4164 = vmatmul.mubr.f32.vlgmr.msra.gmra.mrb[4].mxu1 %v2843_v19 }
 0x337   : > { %4316 = vmatpush3.bf16.msra.mxu1 %v4315_v50  ;;  %4170 = vmatprep.mubr.msk.f32.mxu1 %vm4499_vm5, %v4500_v33 }
 0x338   : > { %4317 = vmatprep.subr.bf16.mxu1 %v4498_v32 }
 0x33e   : > { %4171 = vmatmul.mubr.f32.vlgmr.msra.gmra.mrb[4].mxu1 %v2844_v22 }
 0x33f   : > { %4319 = vmatpush3.bf16.msra.mxu1 %v4309_v25  ;;  %4177 = vmatprep.mubr.msk.f32.mxu1 %vm4499_vm5, %v4500_v33 }
 0x340   : > { %4320 = vmatprep.subr.bf16.mxu1 %v4498_v32 }
 0x346   : > { %4178 = vmatmul.mubr.f32.vlgmr.msra.gmra.mrb[4].mxu1 %v2845_v23 }
 0x347   : > { %4322 = vmatpush3.bf16.msra.mxu1 %v4321_v24  ;;  %4184 = vmatprep.mubr.msk.f32.mxu1 %vm4499_vm5, %v4500_v33 }
 0x348   : > { %4323 = vmatprep.subr.bf16.mxu1 %v4498_v32 }
 0x34e   : > { %4185 = vmatmul.mubr.f32.vlgmr.msra.gmra.mrb[4].mxu1 %v2843_v19 }
 0x34f   : > { %4325 = vmatpush3.bf16.msra.mxu1 %v4309_v25  ;;  %4191 = vmatprep.mubr.msk.f32.mxu1 %vm4499_vm5, %v4500_v33 }
 0x350   : > { %4326 = vmatprep.subr.bf16.mxu1 %v4498_v32 }
 0x356   : > { %4192 = vmatmul.mubr.f32.vlgmr.msra.gmra.mrb[4].mxu1 %v2843_v19 }
 0x357   : > { %4198 = vmatprep.mubr.msk.f32.mxu1 %vm4499_vm5, %v4500_v33  ;;  %4328 = vmatpush3.bf16.msra.mxu1 %v4327_v29 }
 0x358   : > { %4329 = vmatprep.subr.bf16.mxu1 %v4498_v32 }
 0x429   : > { %v3231_v47 = vpop.f32.mrb[4].mxu1 }
 0x42a   : > { %v3236_v48 = vmul.f32 %v4457_v46, %v3231_v47  ;;  %v4193_v49 = vpop.f32.mrb[5].mxu1 }
 0x42c   : > { %v3241_v52 = vsel %vm689_vm8, %v3236_v48, 0 }
 0x42d   : > { %v3310_v53 = vand.u32 4294901760, %v3241_v52 }
 0x42f   : > { %v3311_v54 = vsub.f32 %v3241_v52, %v3310_v53 }
 0x431   : > { %v3312_v55 = vand.u32 4294901760, %v3311_v54 }
 0x433   : > { %v3313_v56 = vsub.f32 %v3311_v54, %v3312_v55 }
 0x435   : > { %v3314_v57 = vand.u32 4294901760, %v3313_v56 }
 0x437   : > { %4199 = vmatmul.mubr.f32.vlgmr.msra.gmra.mrb[2].mxu1 %v3314_v57 }
 0x438   : > { %4331 = vmatpush3.bf16.msra.mxu1 %v4330_v40  ;;  %4205 = vmatprep.mubr.msk.f32.mxu1 %vm4499_vm5, %v4500_v33 }
 0x439   : > { %4332 = vmatprep.subr.bf16.mxu1 %v4498_v32 }
 0x43f   : > { %4206 = vmatmul.mubr.f32.vlgmr.msra.gmra.mrb[2].mxu1 %v3310_v53 }
 0x440   : > { %4334 = vmatpush3.bf16.msra.mxu1 %v4333_v58  ;;  %4212 = vmatprep.mubr.msk.f32.mxu1 %vm4499_vm5, %v4500_v33 }
 0x441   : > { %4335 = vmatprep.subr.bf16.mxu1 %v4498_v32 }
 0x447   : > { %4213 = vmatmul.mubr.f32.vlgmr.msra.gmra.mrb[2].mxu1 %v3311_v54 }
 0x448   : > { %4337 = vmatpush3.bf16.msra.mxu1 %v4327_v29  ;;  %4219 = vmatprep.mubr.msk.f32.mxu1 %vm4499_vm5, %v4500_v33 }
 0x449   : > { %4338 = vmatprep.subr.bf16.mxu1 %v4498_v32 }
 0x44f   : > { %4220 = vmatmul.mubr.f32.vlgmr.msra.gmra.mrb[2].mxu1 %v3312_v55 }
 0x450   : > { %4340 = vmatpush3.bf16.msra.mxu1 %v4339_v44  ;;  %4226 = vmatprep.mubr.msk.f32.mxu1 %vm4499_vm5, %v4500_v33 }
 0x451   : > { %4341 = vmatprep.subr.bf16.mxu1 %v4498_v32 }
 0x457   : > { %4227 = vmatmul.mubr.f32.vlgmr.msra.gmra.mrb[2].mxu1 %v3310_v53 }
 0x458   : > { %4343 = vmatpush3.bf16.msra.mxu1 %v4327_v29  ;;  %4233 = vmatprep.mubr.msk.f32.mxu1 %vm4499_vm5, %v4500_v33 }
 0x45f   : > { %4234 = vmatmul.mubr.f32.vlgmr.msra.gmra.mrb[2].mxu1 %v3310_v53 }
 0x532   : > { %v3698_v32 = vpop.f32.mrb[2].mxu1 }
 0x533   : > { %v4344_v62 = vadd.f32 %v3698_v32, %v567_v61  ;;  %v4235_v33 = vpop.f32.mrb[3].mxu1 }
 0x535   : > { %3704 = vst.msk [vmem:[%s558_s9] sm:$0xff] %vm3703_vm9, %v4344_v62 }
 0x536 PF: > { %s16_s25 = sadd.s32 1, %s4496_s25   ;;  %s5033_s21 = smov %s4484_s22 }
 0x537   : > { %p13_p10 = scmp.ge.s32.totalorder %s16_s25, 4   ;;  %s5034_s22 = smov %s4575_s30 }
 0x538   : > { %s5035_s23 = smov %s4492_s24  ;;  %s5036_s24 = smov %s5038_s26 }
 0x539   :  { %15 = sbr.rel (!%p13_p10) target bundleno = 3 (0x3), region = 176 }

</bundles_post_ra>
